<compile_context>
chip_gen: v7x
topology: tpu7x:2x2x1
jax: 0.10.0
libtpu: 0.0.40
codegen_flags: <defaults>
</compile_context>

<pallas_src>
import functools
import math

import jax
import jax.numpy as jnp
import numpy as np
from jax.experimental import pallas as pl
from jax.experimental.pallas import tpu as pltpu


# ------------------------------ shared math -------------------------------- #

def _layernorm(x, g, b):
    mu = jnp.mean(x, axis=-1, keepdims=True)
    xc = x - mu
    var = jnp.mean(xc * xc, axis=-1, keepdims=True)
    return xc * jax.lax.rsqrt(var + 1e-5) * g + b


def causal_mask(sz):
    # generate_square_subsequent_mask: 0 where j <= i, -inf where j > i.
    i = jnp.arange(sz)[:, None]
    j = jnp.arange(sz)[None, :]
    return jnp.where(j <= i, 0.0, -jnp.inf).astype(jnp.float32)


# ------------------- fully fused encoder + classifier kernel ---------------- #

def _gpt2_kernel(x_ref, ln1_g_ref, ln1_b_ref, w_in_ref, b_in_ref,
                 w_out_ref, b_out_ref, ln2_g_ref, ln2_b_ref,
                 w_ff1_ref, b_ff1_ref, w_ff2_ref, b_ff2_ref,
                 cls_w_ref, cls_b_ref,
                 logits_ref,
                 h_ref, ctx_ref, mask_ref,
                 *, nhead, scale):
    # Grid: (sequence blocks ["parallel"], layers ["arbitrary"]).
    # x block: (TN, L, D) -- TN = chunk of the module's sequence axis (the
    # attention "batch"), L = module batch axis (the masked axis), D = d_model.
    layer = pl.program_id(1)
    TN, L, D = x_ref.shape
    M = TN * L
    hd = D // nhead

    # ---- once per sequence block: load the activation carry + build mask ----
    @pl.when(layer == 0)
    def _():
        h_ref[...] = x_ref[...].reshape(M, D)
        row = jax.lax.broadcasted_iota(jnp.int32, (L, L), 0)
        col = jax.lax.broadcasted_iota(jnp.int32, (L, L), 1)
        # -1e30 instead of -inf: the diagonal is always unmasked so no row is
        # fully masked and the softmax matches the reference.
        mask_ref[...] = jnp.where(col <= row, 0.0, -1e30).astype(jnp.float32)

    x = h_ref[...]                         # (M, D) f32 activation carry
    neg = mask_ref[...][None]              # (1, L, L)

    # ---- norm1 ----
    h = _layernorm(x, ln1_g_ref[...], ln1_b_ref[...])

    # ---- fused QKV projection (bf16 operands, f32 accumulation on the MXU) --
    qkv = jnp.dot(h.astype(jnp.bfloat16), w_in_ref[...],
                  preferred_element_type=jnp.float32) + b_in_ref[...]

    # ---- multi-head attention, all heads resident in VMEM ----
    # Heads unrolled statically (nhead is tiny); per-head context written into
    # a VMEM scratch so the output projection below is ONE K=D matmul.
    for hh in range(nhead):
        lo = hh * hd
        qh = qkv[:, lo:lo + hd].reshape(TN, L, hd)
        kh = qkv[:, D + lo:D + lo + hd].reshape(TN, L, hd)
        vh = qkv[:, 2 * D + lo:2 * D + lo + hd].reshape(TN, L, hd)
        s = jnp.einsum('nld,nmd->nlm', qh, kh,
                       preferred_element_type=jnp.float32) * scale + neg
        s = s - jnp.max(s, axis=-1, keepdims=True)
        p = jnp.exp(s)
        p = p * pl.reciprocal(jnp.sum(p, axis=-1, keepdims=True), approx=True)
        oh = jnp.einsum('nlm,nmd->nld', p, vh,
                        preferred_element_type=jnp.float32)
        ctx_ref[:, lo:lo + hd] = oh.reshape(M, hd)

    # ---- single output projection: (M, D) @ (D, D), bf16 operands ----
    attn = jnp.dot(ctx_ref[...].astype(jnp.bfloat16), w_out_ref[...],
                   preferred_element_type=jnp.float32) + b_out_ref[...]

    # ---- residual on the normed input (module quirk) ----
    h = h + attn

    # ---- norm2 + FFN + residual ----
    h2 = _layernorm(h, ln2_g_ref[...], ln2_b_ref[...])
    ff = jnp.maximum(
        jnp.dot(h2.astype(jnp.bfloat16), w_ff1_ref[...],
                preferred_element_type=jnp.float32) + b_ff1_ref[...], 0.0)
    ff = jnp.dot(ff.astype(jnp.bfloat16), w_ff2_ref[...],
                 preferred_element_type=jnp.float32) + b_ff2_ref[...]
    out = h2 + ff

    # carry for the next layer step
    h_ref[...] = out

    # ---- classifier fused into the last layer step (lane-dense V-wide out) --
    @pl.when(layer == pl.num_programs(1) - 1)
    def _():
        logits_ref[...] = jnp.dot(out.astype(jnp.bfloat16), cls_w_ref[...],
                                  preferred_element_type=jnp.float32) \
                          + cls_b_ref[...]


def gpt2_fused_forward(x_nld, kp, *, nhead, seq_block):
    """x_nld: (N=S, L=B, D) activations.  Returns (N*L, vocab) logits."""
    N, L, D = x_nld.shape
    NL = kp["w_in"].shape[0]                  # number of encoder layers
    FF = kp["w_ff1"].shape[-1]
    V = kp["cls_w"].shape[-1]
    assert NL >= 1 and N % seq_block == 0 and D % nhead == 0
    grid = (N // seq_block, NL)

    def lspec(*dims):
        # Per-layer stacked parameter: squeeze the leading layer axis; weights
        # are re-fetched (double-buffered behind compute) as the layer axis
        # advances.  (pipeline_mode=pl.Buffered(1) would halve their VMEM at
        # large d_model; irrelevant at D=32 so omitted for compile safety.)
        nd = len(dims)
        return pl.BlockSpec((None,) + dims, lambda n, l: (l,) + (0,) * nd)

    def cspec(*dims):
        nd = len(dims)
        return pl.BlockSpec(dims, lambda n, l: (0,) * nd)

    kernel = functools.partial(_gpt2_kernel, nhead=nhead,
                               scale=1.0 / math.sqrt(D // nhead))

    return pl.pallas_call(
        kernel,
        out_shape=jax.ShapeDtypeStruct((N * L, V), jnp.float32),
        grid=grid,
        in_specs=[
            pl.BlockSpec((seq_block, L, D), lambda n, l: (n, 0, 0)),
            lspec(1, D), lspec(1, D),              # ln1 gamma / beta
            lspec(D, 3 * D), lspec(1, 3 * D),      # w_in / b_in
            lspec(D, D), lspec(1, D),              # w_out / b_out
            lspec(1, D), lspec(1, D),              # ln2 gamma / beta
            lspec(D, FF), lspec(1, FF),            # w_ff1 / b_ff1
            lspec(FF, D), lspec(1, D),             # w_ff2 / b_ff2
            cspec(D, V), cspec(1, V),              # classifier w / b
        ],
        out_specs=pl.BlockSpec((seq_block * L, V), lambda n, l: (n, 0)),
        scratch_shapes=[
            pltpu.VMEM((seq_block * L, D), jnp.float32),   # activation carry
            pltpu.VMEM((seq_block * L, D), jnp.float32),   # attention context
            pltpu.VMEM((L, L), jnp.float32),               # cached causal mask
        ],
        compiler_params=pltpu.CompilerParams(
            dimension_semantics=("parallel", "arbitrary"),
            # Actual footprint is < 1 MiB; 16 MiB is a safe cap on every
            # generation (v5e 16/128, v6e 32/128, v7x 32/64 MiB scoped/phys).
            vmem_limit_bytes=16 * 1024 * 1024,
        ),
    )(x_nld,
      kp["ln1_g"], kp["ln1_b"], kp["w_in"], kp["b_in"],
      kp["w_out"], kp["b_out"], kp["ln2_g"], kp["ln2_b"],
      kp["w_ff1"], kp["b_ff1"], kp["w_ff2"], kp["b_ff2"],
      kp["cls_w"], kp["cls_b"])


# ------------------------------ model glue --------------------------------- #

def init_params(key, cfg):
    D, FF, V, MS = cfg["d_model"], cfg["ffn"], cfg["vocab"], cfg["max_seq"]
    n_layers = cfg["num_layers"] - 1   # GPT2Encoder(ltc=True) builds num_layers-1 layers
    keys = jax.random.split(key, 3 + n_layers)

    def nrm(k, shape, s=0.02):
        return jax.random.normal(k, shape, jnp.float32) * s

    params = {
        "tok_emb": nrm(keys[0], (V, D), 1.0),
        "pos_emb": nrm(keys[1], (MS, D), 1.0),
        "cls_w": nrm(keys[2], (D, V)),
        "cls_b": jnp.zeros((V,), jnp.float32),
        "layers": [],
    }
    for li in range(n_layers):
        lk = jax.random.split(keys[3 + li], 8)
        params["layers"].append({
            "ln1_g": jnp.ones((D,), jnp.float32), "ln1_b": jnp.zeros((D,), jnp.float32),
            "ln2_g": jnp.ones((D,), jnp.float32), "ln2_b": jnp.zeros((D,), jnp.float32),
            "w_in": nrm(lk[0], (D, 3 * D)), "b_in": nrm(lk[1], (3 * D,)),
            "w_out": nrm(lk[2], (D, D)),    "b_out": nrm(lk[3], (D,)),
            "w_ff1": nrm(lk[4], (D, FF)),   "b_ff1": nrm(lk[5], (FF,)),
            "w_ff2": nrm(lk[6], (FF, D)),   "b_ff2": nrm(lk[7], (D,)),
        })
    return params


def prep_params(params):
    """Kernel-side copies: per-layer weights stacked on a leading layer axis,
    bf16 MXU operands, 2-D (1, n) biases / LN params."""
    layers = params["layers"]

    def stack_w(name, dtype):
        return jnp.stack([p[name].astype(dtype) for p in layers], axis=0)

    def stack_v(name):
        return jnp.stack([p[name].reshape(1, -1) for p in layers], axis=0)

    return {
        "tok_emb": params["tok_emb"],
        "pos_emb": params["pos_emb"],
        "cls_w": params["cls_w"].astype(jnp.bfloat16),
        "cls_b": params["cls_b"].reshape(1, -1),
        "ln1_g": stack_v("ln1_g"), "ln1_b": stack_v("ln1_b"),
        "ln2_g": stack_v("ln2_g"), "ln2_b": stack_v("ln2_b"),
        "w_in": stack_w("w_in", jnp.bfloat16),  "b_in": stack_v("b_in"),
        "w_out": stack_w("w_out", jnp.bfloat16), "b_out": stack_v("b_out"),
        "w_ff1": stack_w("w_ff1", jnp.bfloat16), "b_ff1": stack_v("b_ff1"),
        "w_ff2": stack_w("w_ff2", jnp.bfloat16), "b_ff2": stack_v("b_ff2"),
    }


def _pick_seq_block(n_seq):
    """Single grid step on single-TensorCore chips (v5e/v6e); two 'parallel'
    sequence blocks on multi-TensorCore chips (v4/v5p/v7x)."""
    try:
        kind = jax.devices()[0].device_kind.lower()
    except Exception:
        kind = ""
    multi_core = any(t in kind for t in ("v7", "7x", "v4", "v5p"))
    if multi_core and n_seq % 2 == 0 and (n_seq // 2) % 8 == 0:
        return n_seq // 2
    return n_seq


def pallas_forward(src_ids, kp, cfg):
    D, nhead = cfg["d_model"], cfg["nhead"]
    B, S = src_ids.shape

    # Embedding lookups stay in XLA (gather; no Pallas win at this size).
    x = jnp.take(kp["tok_emb"], src_ids, axis=0) + kp["pos_emb"][:S][None]  # (B,S,D)

    # nn.MultiheadAttention is seq-first: the module's masked axis is B, its
    # "batch" axis is S.  Lay activations out as (S, B, D) so S — which is
    # embarrassingly parallel through the whole network — is the Pallas grid
    # axis and attention inside the kernel is a clean batched einsum.
    x = x.transpose(1, 0, 2)                       # (N=S, L=B, D)
    N, L, _ = x.shape
    seq_block = _pick_seq_block(N)

    logits = gpt2_fused_forward(x, kp, nhead=nhead, seq_block=seq_block)
    V = logits.shape[-1]
    return logits.reshape(N, L, V).transpose(1, 0, 2)   # (B, S, vocab)


# --------------------------- pure-JAX reference ----------------------------- #

def reference_forward(src_ids, params, cfg):
    D, nhead = cfg["d_model"], cfg["nhead"]
    hd = D // nhead
    B, S = src_ids.shape
    x = params["tok_emb"][src_ids] + params["pos_emb"][:S][None]
    L, N = B, S
    mask = causal_mask(L)

    def split_heads(t):
        return t.reshape(L, N * nhead, hd).transpose(1, 0, 2)

    for p in params["layers"]:
        h = _layernorm(x.reshape(L * N, D), p["ln1_g"], p["ln1_b"])
        qkv = (h @ p["w_in"] + p["b_in"]).reshape(L, N, 3 * D)
        q, k, v = qkv[..., :D], qkv[..., D:2 * D], qkv[..., 2 * D:]
        qh, kh, vh = split_heads(q), split_heads(k), split_heads(v)
        s = jnp.einsum("blh,bmh->blm", qh, kh) / math.sqrt(hd) + mask[None]
        a = jax.nn.softmax(s, axis=-1)
        o = jnp.einsum("blm,bmh->blh", a, vh)
        o = o.transpose(1, 0, 2).reshape(L * N, D) @ p["w_out"] + p["b_out"]
        h = h + o
        h2 = _layernorm(h, p["ln2_g"], p["ln2_b"])
        ff = jnp.maximum(h2 @ p["w_ff1"] + p["b_ff1"], 0.0)
        ff = ff @ p["w_ff2"] + p["b_ff2"]
        x = (h2 + ff).reshape(L, N, D)

    logits = x.reshape(L * N, D) @ params["cls_w"] + params["cls_b"]
    return logits.reshape(L, N, -1)


# TODO(synk): GPT2Model.generate (autoregressive multinomial sampling loop) is
# not part of the forward hot path and is not implemented here.

# --------------------------------- main ------------------------------------ #

if __name__ == "__main__":
    cfg = dict(vocab=256, d_model=32, num_layers=3, nhead=4, ffn=64, max_seq=32)

    key = jax.random.PRNGKey(0)
    pkey, dkey = jax.random.split(key)
    params = init_params(pkey, cfg)
    kparams = prep_params(params)

    B, S = 8, 16
    src = jax.random.randint(dkey, (B, S), 0, cfg["vocab"], dtype=jnp.int32)

    fwd = jax.jit(lambda ids, p: pallas_forward(ids, p, cfg))
    logits = jax.block_until_ready(fwd(src, kparams))

    ref = jax.block_until_ready(reference_forward(src, params, cfg))
    assert logits.shape == (B, S, cfg["vocab"])
    # bf16 MXU operands with f32 accumulation + approx softmax reciprocal
    # -> compare at 1e-2 (documented, intentional mixed precision).
    np.testing.assert_allclose(np.asarray(logits), np.asarray(ref),
                               rtol=1e-2, atol=1e-2)

    print("KERNEL_OK")
</pallas_src>

<mosaic_0001>
module attributes {stable_mosaic.version = 11 : i64} {
  func.func @_gpt2_kernel(%arg0: i32, %arg1: i32, %arg2: memref<16x8x32xf32, #tpu.memory_space<vmem>>, %arg3: memref<1x1x32xf32, #tpu.memory_space<vmem>>, %arg4: memref<1x1x32xf32, #tpu.memory_space<vmem>>, %arg5: memref<1x32x96xbf16, #tpu.memory_space<vmem>>, %arg6: memref<1x1x96xf32, #tpu.memory_space<vmem>>, %arg7: memref<1x32x32xbf16, #tpu.memory_space<vmem>>, %arg8: memref<1x1x32xf32, #tpu.memory_space<vmem>>, %arg9: memref<1x1x32xf32, #tpu.memory_space<vmem>>, %arg10: memref<1x1x32xf32, #tpu.memory_space<vmem>>, %arg11: memref<1x32x64xbf16, #tpu.memory_space<vmem>>, %arg12: memref<1x1x64xf32, #tpu.memory_space<vmem>>, %arg13: memref<1x64x32xbf16, #tpu.memory_space<vmem>>, %arg14: memref<1x1x32xf32, #tpu.memory_space<vmem>>, %arg15: memref<32x256xbf16, #tpu.memory_space<vmem>>, %arg16: memref<1x256xf32, #tpu.memory_space<vmem>>, %arg17: memref<128x256xf32, #tpu.memory_space<vmem>>, %arg18: memref<128x32xf32, #tpu.memory_space<vmem>>, %arg19: memref<128x32xf32, #tpu.memory_space<vmem>>, %arg20: memref<8x8xf32, #tpu.memory_space<vmem>>) attributes {dimension_semantics = [#tpu.dimension_semantics<parallel>, #tpu.dimension_semantics<arbitrary>], iteration_bounds = array<i64: 1, 2>, scalar_prefetch = 0 : i64, scratch_operands = 3 : i64, tpu.core_type = #tpu.core_type<tc>, window_params = [{transform_indices = @transform_0, window_bounds = array<i64: 16, 8, 32>}, {transform_indices = @transform_1, window_bounds = array<i64: 1, 1, 32>}, {transform_indices = @transform_2, window_bounds = array<i64: 1, 1, 32>}, {transform_indices = @transform_3, window_bounds = array<i64: 1, 32, 96>}, {transform_indices = @transform_4, window_bounds = array<i64: 1, 1, 96>}, {transform_indices = @transform_5, window_bounds = array<i64: 1, 32, 32>}, {transform_indices = @transform_6, window_bounds = array<i64: 1, 1, 32>}, {transform_indices = @transform_7, window_bounds = array<i64: 1, 1, 32>}, {transform_indices = @transform_8, window_bounds = array<i64: 1, 1, 32>}, {transform_indices = @transform_9, window_bounds = array<i64: 1, 32, 64>}, {transform_indices = @transform_10, window_bounds = array<i64: 1, 1, 64>}, {transform_indices = @transform_11, window_bounds = array<i64: 1, 64, 32>}, {transform_indices = @transform_12, window_bounds = array<i64: 1, 1, 32>}, {pipeline_mode = #tpu.pipeline_mode<synchronous>, transform_indices = @transform_13, window_bounds = array<i64: 32, 256>}, {pipeline_mode = #tpu.pipeline_mode<synchronous>, transform_indices = @transform_14, window_bounds = array<i64: 1, 256>}, {transform_indices = @transform_15, window_bounds = array<i64: 128, 256>}]} {
    %c0_i32 = arith.constant 0 : i32
    %0 = arith.cmpi eq, %arg1, %c0_i32 : i32
    %1 = arith.extui %0 : i1 to i32
    %c0_i32_0 = arith.constant 0 : i32
    %2 = arith.cmpi ne, %1, %c0_i32_0 : i32
    scf.if %2 {
      %c0_84 = arith.constant 0 : index
      %c0_85 = arith.constant 0 : index
      %c0_86 = arith.constant 0 : index
      %191 = vector.load %arg2[%c0_84, %c0_85, %c0_86] : memref<16x8x32xf32, #tpu.memory_space<vmem>>, vector<16x8x32xf32>
      %192 = vector.shape_cast %191 : vector<16x8x32xf32> to vector<128x32xf32>
      %c0_87 = arith.constant 0 : index
      %c0_88 = arith.constant 0 : index
      %193 = vector.load %arg18[%c0_87, %c0_88] : memref<128x32xf32, #tpu.memory_space<vmem>>, vector<128x32xf32>
      tpu.vector_store %arg18[%c0_87, %c0_88], %192 {strides = array<i32>} : memref<128x32xf32, #tpu.memory_space<vmem>>, vector<128x32xf32>,
      %194 = tpu.iota {dimensions = array<i32: 0>} : vector<8x8xi32>
      %195 = tpu.iota {dimensions = array<i32: 1>} : vector<8x8xi32>
      %196 = arith.cmpi sle, %195, %194 : vector<8x8xi32>
      %cst_89 = arith.constant 0.000000e+00 : f32
      %cst_90 = arith.constant -1.000000e+30 : f32
      %197 = vector.broadcast %cst_89 : f32 to vector<8x8xf32>
      %198 = vector.broadcast %cst_90 : f32 to vector<8x8xf32>
      %199 = arith.select %196, %197, %198 : vector<8x8xi1>, vector<8x8xf32>
      %c0_91 = arith.constant 0 : index
      %c0_92 = arith.constant 0 : index
      %200 = vector.load %arg20[%c0_91, %c0_92] : memref<8x8xf32, #tpu.memory_space<vmem>>, vector<8x8xf32>
      tpu.vector_store %arg20[%c0_91, %c0_92], %199 {strides = array<i32>} : memref<8x8xf32, #tpu.memory_space<vmem>>, vector<8x8xf32>,
    } else {
    }
    %c0 = arith.constant 0 : index
    %c0_1 = arith.constant 0 : index
    %3 = vector.load %arg18[%c0, %c0_1] : memref<128x32xf32, #tpu.memory_space<vmem>>, vector<128x32xf32>
    %c0_2 = arith.constant 0 : index
    %c0_3 = arith.constant 0 : index
    %4 = vector.load %arg20[%c0_2, %c0_3] : memref<8x8xf32, #tpu.memory_space<vmem>>, vector<8x8xf32>
    %5 = vector.shape_cast %4 : vector<8x8xf32> to vector<1x8x8xf32>
    %c0_4 = arith.constant 0 : index
    %c0_5 = arith.constant 0 : index
    %c0_6 = arith.constant 0 : index
    %6 = vector.load %arg3[%c0_4, %c0_5, %c0_6] : memref<1x1x32xf32, #tpu.memory_space<vmem>>, vector<1x1x32xf32>
    %7 = vector.shape_cast %6 : vector<1x1x32xf32> to vector<1x32xf32>
    %c0_7 = arith.constant 0 : index
    %c0_8 = arith.constant 0 : index
    %c0_9 = arith.constant 0 : index
    %8 = vector.load %arg4[%c0_7, %c0_8, %c0_9] : memref<1x1x32xf32, #tpu.memory_space<vmem>>, vector<1x1x32xf32>
    %9 = vector.shape_cast %8 : vector<1x1x32xf32> to vector<1x32xf32>
    %cst = arith.constant dense<0.000000e+00> : vector<128xf32>
    %10 = vector.multi_reduction <add>, %3, %cst [1] : vector<128x32xf32> to vector<128xf32>
    %11 = vector.shape_cast %10 : vector<128xf32> to vector<128x1xf32>
    %cst_10 = arith.constant 3.200000e+01 : f32
    %12 = vector.broadcast %cst_10 : f32 to vector<128x1xf32>
    %13 = arith.divf %11, %12 : vector<128x1xf32>
    %14 = vector.broadcast %13 : vector<128x1xf32> to vector<128x32xf32>
    %15 = arith.subf %3, %14 : vector<128x32xf32>
    %16 = arith.mulf %15, %15 : vector<128x32xf32>
    %cst_11 = arith.constant dense<0.000000e+00> : vector<128xf32>
    %17 = vector.multi_reduction <add>, %16, %cst_11 [1] : vector<128x32xf32> to vector<128xf32>
    %18 = vector.shape_cast %17 : vector<128xf32> to vector<128x1xf32>
    %cst_12 = arith.constant 3.200000e+01 : f32
    %19 = vector.broadcast %cst_12 : f32 to vector<128x1xf32>
    %20 = arith.divf %18, %19 : vector<128x1xf32>
    %cst_13 = arith.constant 9.99999974E-6 : f32
    %21 = vector.broadcast %cst_13 : f32 to vector<128x1xf32>
    %22 = arith.addf %20, %21 : vector<128x1xf32>
    %23 = math.rsqrt %22 : vector<128x1xf32>
    %24 = vector.broadcast %23 : vector<128x1xf32> to vector<128x32xf32>
    %25 = arith.mulf %15, %24 : vector<128x32xf32>
    %26 = vector.broadcast %7 : vector<1x32xf32> to vector<128x32xf32>
    %27 = arith.mulf %25, %26 : vector<128x32xf32>
    %28 = vector.broadcast %9 : vector<1x32xf32> to vector<128x32xf32>
    %29 = arith.addf %27, %28 : vector<128x32xf32>
    %30 = arith.truncf %29 : vector<128x32xf32> to vector<128x32xbf16>
    %c0_14 = arith.constant 0 : index
    %c0_15 = arith.constant 0 : index
    %c0_16 = arith.constant 0 : index
    %31 = vector.load %arg5[%c0_14, %c0_15, %c0_16] : memref<1x32x96xbf16, #tpu.memory_space<vmem>>, vector<1x32x96xbf16>
    %32 = vector.shape_cast %31 : vector<1x32x96xbf16> to vector<32x96xbf16>
    %cst_17 = arith.constant dense<0.000000e+00> : vector<128x96xf32>
    %33 = tpu.matmul %30, %32, %cst_17 {dimension_numbers = #tpu.dot_dimension_numbers<[1], [0], [0], [1], [0, 0, 1, 1], [], []>} : vector<128x32xbf16>, vector<32x96xbf16>, vector<128x96xf32> -> vector<128x96xf32>
    %c0_18 = arith.constant 0 : index
    %c0_19 = arith.constant 0 : index
    %c0_20 = arith.constant 0 : index
    %34 = vector.load %arg6[%c0_18, %c0_19, %c0_20] : memref<1x1x96xf32, #tpu.memory_space<vmem>>, vector<1x1x96xf32>
    %35 = vector.shape_cast %34 : vector<1x1x96xf32> to vector<1x96xf32>
    %36 = vector.broadcast %35 : vector<1x96xf32> to vector<128x96xf32>
    %37 = arith.addf %33, %36 : vector<128x96xf32>
    %38 = vector.extract_strided_slice %37 {offsets = [0, 0], sizes = [128, 8], strides = [1, 1]} : vector<128x96xf32> to vector<128x8xf32>
    %39 = vector.shape_cast %38 : vector<128x8xf32> to vector<16x8x8xf32>
    %40 = vector.extract_strided_slice %37 {offsets = [0, 32], sizes = [128, 8], strides = [1, 1]} : vector<128x96xf32> to vector<128x8xf32>
    %41 = vector.shape_cast %40 : vector<128x8xf32> to vector<16x8x8xf32>
    %42 = vector.extract_strided_slice %37 {offsets = [0, 64], sizes = [128, 8], strides = [1, 1]} : vector<128x96xf32> to vector<128x8xf32>
    %43 = vector.shape_cast %42 : vector<128x8xf32> to vector<16x8x8xf32>
    "tpu.trace_start"() <{level = 10 : i32, message = "nld,nmd->nlm"}> : () -> ()
    %cst_21 = arith.constant dense<0.000000e+00> : vector<16x8x8xf32>
    %44 = tpu.matmul %39, %41, %cst_21 {dimension_numbers = #tpu.dot_dimension_numbers<[2], [2], [1], [1], [0, 0, 0, 1, 1, 1], [0], [0]>} : vector<16x8x8xf32>, vector<16x8x8xf32>, vector<16x8x8xf32> -> vector<16x8x8xf32>
    "tpu.trace_stop"() : () -> ()
    %cst_22 = arith.constant 0.353553385 : f32
    %45 = vector.broadcast %cst_22 : f32 to vector<16x8x8xf32>
    %46 = arith.mulf %44, %45 : vector<16x8x8xf32>
    %47 = vector.broadcast %5 : vector<1x8x8xf32> to vector<16x8x8xf32>
    %48 = arith.addf %46, %47 : vector<16x8x8xf32>
    %cst_23 = arith.constant dense<0xFF800000> : vector<16x8xf32>
    %49 = vector.multi_reduction <maximumf>, %48, %cst_23 [2] : vector<16x8x8xf32> to vector<16x8xf32>
    %50 = vector.shape_cast %49 : vector<16x8xf32> to vector<16x8x1xf32>
    %51 = vector.broadcast %50 : vector<16x8x1xf32> to vector<16x8x8xf32>
    %52 = arith.subf %48, %51 : vector<16x8x8xf32>
    %53 = math.exp %52 : vector<16x8x8xf32>
    %cst_24 = arith.constant dense<0.000000e+00> : vector<16x8xf32>
    %54 = vector.multi_reduction <add>, %53, %cst_24 [2] : vector<16x8x8xf32> to vector<16x8xf32>
    %55 = vector.shape_cast %54 : vector<16x8xf32> to vector<16x8x1xf32>
    %56 = tpu.reciprocal %55 {approx = true} : vector<16x8x1xf32> -> vector<16x8x1xf32>
    %57 = vector.broadcast %56 : vector<16x8x1xf32> to vector<16x8x8xf32>
    %58 = arith.mulf %53, %57 : vector<16x8x8xf32>
    "tpu.trace_start"() <{level = 10 : i32, message = "nlm,nmd->nld"}> : () -> ()
    %cst_25 = arith.constant dense<0.000000e+00> : vector<16x8x8xf32>
    %59 = tpu.matmul %58, %43, %cst_25 {dimension_numbers = #tpu.dot_dimension_numbers<[2], [1], [1], [2], [0, 0, 0, 1, 1, 2], [0], [0]>} : vector<16x8x8xf32>, vector<16x8x8xf32>, vector<16x8x8xf32> -> vector<16x8x8xf32>
    "tpu.trace_stop"() : () -> ()
    %60 = vector.shape_cast %59 : vector<16x8x8xf32> to vector<128x8xf32>
    %c0_26 = arith.constant 0 : index
    %c0_27 = arith.constant 0 : index
    %61 = vector.load %arg19[%c0_26, %c0_27] : memref<128x32xf32, #tpu.memory_space<vmem>>, vector<128x8xf32>
    tpu.vector_store %arg19[%c0_26, %c0_27], %60 {strides = array<i32>} : memref<128x32xf32, #tpu.memory_space<vmem>>, vector<128x8xf32>,
    %62 = vector.extract_strided_slice %37 {offsets = [0, 8], sizes = [128, 8], strides = [1, 1]} : vector<128x96xf32> to vector<128x8xf32>
    %63 = vector.shape_cast %62 : vector<128x8xf32> to vector<16x8x8xf32>
    %64 = vector.extract_strided_slice %37 {offsets = [0, 40], sizes = [128, 8], strides = [1, 1]} : vector<128x96xf32> to vector<128x8xf32>
    %65 = vector.shape_cast %64 : vector<128x8xf32> to vector<16x8x8xf32>
    %66 = vector.extract_strided_slice %37 {offsets = [0, 72], sizes = [128, 8], strides = [1, 1]} : vector<128x96xf32> to vector<128x8xf32>
    %67 = vector.shape_cast %66 : vector<128x8xf32> to vector<16x8x8xf32>
    "tpu.trace_start"() <{level = 10 : i32, message = "nld,nmd->nlm"}> : () -> ()
    %cst_28 = arith.constant dense<0.000000e+00> : vector<16x8x8xf32>
    %68 = tpu.matmul %63, %65, %cst_28 {dimension_numbers = #tpu.dot_dimension_numbers<[2], [2], [1], [1], [0, 0, 0, 1, 1, 1], [0], [0]>} : vector<16x8x8xf32>, vector<16x8x8xf32>, vector<16x8x8xf32> -> vector<16x8x8xf32>
    "tpu.trace_stop"() : () -> ()
    %cst_29 = arith.constant 0.353553385 : f32
    %69 = vector.broadcast %cst_29 : f32 to vector<16x8x8xf32>
    %70 = arith.mulf %68, %69 : vector<16x8x8xf32>
    %71 = vector.broadcast %5 : vector<1x8x8xf32> to vector<16x8x8xf32>
    %72 = arith.addf %70, %71 : vector<16x8x8xf32>
    %cst_30 = arith.constant dense<0xFF800000> : vector<16x8xf32>
    %73 = vector.multi_reduction <maximumf>, %72, %cst_30 [2] : vector<16x8x8xf32> to vector<16x8xf32>
    %74 = vector.shape_cast %73 : vector<16x8xf32> to vector<16x8x1xf32>
    %75 = vector.broadcast %74 : vector<16x8x1xf32> to vector<16x8x8xf32>
    %76 = arith.subf %72, %75 : vector<16x8x8xf32>
    %77 = math.exp %76 : vector<16x8x8xf32>
    %cst_31 = arith.constant dense<0.000000e+00> : vector<16x8xf32>
    %78 = vector.multi_reduction <add>, %77, %cst_31 [2] : vector<16x8x8xf32> to vector<16x8xf32>
    %79 = vector.shape_cast %78 : vector<16x8xf32> to vector<16x8x1xf32>
    %80 = tpu.reciprocal %79 {approx = true} : vector<16x8x1xf32> -> vector<16x8x1xf32>
    %81 = vector.broadcast %80 : vector<16x8x1xf32> to vector<16x8x8xf32>
    %82 = arith.mulf %77, %81 : vector<16x8x8xf32>
    "tpu.trace_start"() <{level = 10 : i32, message = "nlm,nmd->nld"}> : () -> ()
    %cst_32 = arith.constant dense<0.000000e+00> : vector<16x8x8xf32>
    %83 = tpu.matmul %82, %67, %cst_32 {dimension_numbers = #tpu.dot_dimension_numbers<[2], [1], [1], [2], [0, 0, 0, 1, 1, 2], [0], [0]>} : vector<16x8x8xf32>, vector<16x8x8xf32>, vector<16x8x8xf32> -> vector<16x8x8xf32>
    "tpu.trace_stop"() : () -> ()
    %84 = vector.shape_cast %83 : vector<16x8x8xf32> to vector<128x8xf32>
    %c0_33 = arith.constant 0 : index
    %c8 = arith.constant 8 : index
    %85 = vector.load %arg19[%c0_33, %c8] : memref<128x32xf32, #tpu.memory_space<vmem>>, vector<128x8xf32>
    tpu.vector_store %arg19[%c0_33, %c8], %84 {strides = array<i32>} : memref<128x32xf32, #tpu.memory_space<vmem>>, vector<128x8xf32>,
    %86 = vector.extract_strided_slice %37 {offsets = [0, 16], sizes = [128, 8], strides = [1, 1]} : vector<128x96xf32> to vector<128x8xf32>
    %87 = vector.shape_cast %86 : vector<128x8xf32> to vector<16x8x8xf32>
    %88 = vector.extract_strided_slice %37 {offsets = [0, 48], sizes = [128, 8], strides = [1, 1]} : vector<128x96xf32> to vector<128x8xf32>
    %89 = vector.shape_cast %88 : vector<128x8xf32> to vector<16x8x8xf32>
    %90 = vector.extract_strided_slice %37 {offsets = [0, 80], sizes = [128, 8], strides = [1, 1]} : vector<128x96xf32> to vector<128x8xf32>
    %91 = vector.shape_cast %90 : vector<128x8xf32> to vector<16x8x8xf32>
    "tpu.trace_start"() <{level = 10 : i32, message = "nld,nmd->nlm"}> : () -> ()
    %cst_34 = arith.constant dense<0.000000e+00> : vector<16x8x8xf32>
    %92 = tpu.matmul %87, %89, %cst_34 {dimension_numbers = #tpu.dot_dimension_numbers<[2], [2], [1], [1], [0, 0, 0, 1, 1, 1], [0], [0]>} : vector<16x8x8xf32>, vector<16x8x8xf32>, vector<16x8x8xf32> -> vector<16x8x8xf32>
    "tpu.trace_stop"() : () -> ()
    %cst_35 = arith.constant 0.353553385 : f32
    %93 = vector.broadcast %cst_35 : f32 to vector<16x8x8xf32>
    %94 = arith.mulf %92, %93 : vector<16x8x8xf32>
    %95 = vector.broadcast %5 : vector<1x8x8xf32> to vector<16x8x8xf32>
    %96 = arith.addf %94, %95 : vector<16x8x8xf32>
    %cst_36 = arith.constant dense<0xFF800000> : vector<16x8xf32>
    %97 = vector.multi_reduction <maximumf>, %96, %cst_36 [2] : vector<16x8x8xf32> to vector<16x8xf32>
    %98 = vector.shape_cast %97 : vector<16x8xf32> to vector<16x8x1xf32>
    %99 = vector.broadcast %98 : vector<16x8x1xf32> to vector<16x8x8xf32>
    %100 = arith.subf %96, %99 : vector<16x8x8xf32>
    %101 = math.exp %100 : vector<16x8x8xf32>
    %cst_37 = arith.constant dense<0.000000e+00> : vector<16x8xf32>
    %102 = vector.multi_reduction <add>, %101, %cst_37 [2] : vector<16x8x8xf32> to vector<16x8xf32>
    %103 = vector.shape_cast %102 : vector<16x8xf32> to vector<16x8x1xf32>
    %104 = tpu.reciprocal %103 {approx = true} : vector<16x8x1xf32> -> vector<16x8x1xf32>
    %105 = vector.broadcast %104 : vector<16x8x1xf32> to vector<16x8x8xf32>
    %106 = arith.mulf %101, %105 : vector<16x8x8xf32>
    "tpu.trace_start"() <{level = 10 : i32, message = "nlm,nmd->nld"}> : () -> ()
    %cst_38 = arith.constant dense<0.000000e+00> : vector<16x8x8xf32>
    %107 = tpu.matmul %106, %91, %cst_38 {dimension_numbers = #tpu.dot_dimension_numbers<[2], [1], [1], [2], [0, 0, 0, 1, 1, 2], [0], [0]>} : vector<16x8x8xf32>, vector<16x8x8xf32>, vector<16x8x8xf32> -> vector<16x8x8xf32>
    "tpu.trace_stop"() : () -> ()
    %108 = vector.shape_cast %107 : vector<16x8x8xf32> to vector<128x8xf32>
    %c0_39 = arith.constant 0 : index
    %c16 = arith.constant 16 : index
    %109 = vector.load %arg19[%c0_39, %c16] : memref<128x32xf32, #tpu.memory_space<vmem>>, vector<128x8xf32>
    tpu.vector_store %arg19[%c0_39, %c16], %108 {strides = array<i32>} : memref<128x32xf32, #tpu.memory_space<vmem>>, vector<128x8xf32>,
    %110 = vector.extract_strided_slice %37 {offsets = [0, 24], sizes = [128, 8], strides = [1, 1]} : vector<128x96xf32> to vector<128x8xf32>
    %111 = vector.shape_cast %110 : vector<128x8xf32> to vector<16x8x8xf32>
    %112 = vector.extract_strided_slice %37 {offsets = [0, 56], sizes = [128, 8], strides = [1, 1]} : vector<128x96xf32> to vector<128x8xf32>
    %113 = vector.shape_cast %112 : vector<128x8xf32> to vector<16x8x8xf32>
    %114 = vector.extract_strided_slice %37 {offsets = [0, 88], sizes = [128, 8], strides = [1, 1]} : vector<128x96xf32> to vector<128x8xf32>
    %115 = vector.shape_cast %114 : vector<128x8xf32> to vector<16x8x8xf32>
    "tpu.trace_start"() <{level = 10 : i32, message = "nld,nmd->nlm"}> : () -> ()
    %cst_40 = arith.constant dense<0.000000e+00> : vector<16x8x8xf32>
    %116 = tpu.matmul %111, %113, %cst_40 {dimension_numbers = #tpu.dot_dimension_numbers<[2], [2], [1], [1], [0, 0, 0, 1, 1, 1], [0], [0]>} : vector<16x8x8xf32>, vector<16x8x8xf32>, vector<16x8x8xf32> -> vector<16x8x8xf32>
    "tpu.trace_stop"() : () -> ()
    %cst_41 = arith.constant 0.353553385 : f32
    %117 = vector.broadcast %cst_41 : f32 to vector<16x8x8xf32>
    %118 = arith.mulf %116, %117 : vector<16x8x8xf32>
    %119 = vector.broadcast %5 : vector<1x8x8xf32> to vector<16x8x8xf32>
    %120 = arith.addf %118, %119 : vector<16x8x8xf32>
    %cst_42 = arith.constant dense<0xFF800000> : vector<16x8xf32>
    %121 = vector.multi_reduction <maximumf>, %120, %cst_42 [2] : vector<16x8x8xf32> to vector<16x8xf32>
    %122 = vector.shape_cast %121 : vector<16x8xf32> to vector<16x8x1xf32>
    %123 = vector.broadcast %122 : vector<16x8x1xf32> to vector<16x8x8xf32>
    %124 = arith.subf %120, %123 : vector<16x8x8xf32>
    %125 = math.exp %124 : vector<16x8x8xf32>
    %cst_43 = arith.constant dense<0.000000e+00> : vector<16x8xf32>
    %126 = vector.multi_reduction <add>, %125, %cst_43 [2] : vector<16x8x8xf32> to vector<16x8xf32>
    %127 = vector.shape_cast %126 : vector<16x8xf32> to vector<16x8x1xf32>
    %128 = tpu.reciprocal %127 {approx = true} : vector<16x8x1xf32> -> vector<16x8x1xf32>
    %129 = vector.broadcast %128 : vector<16x8x1xf32> to vector<16x8x8xf32>
    %130 = arith.mulf %125, %129 : vector<16x8x8xf32>
    "tpu.trace_start"() <{level = 10 : i32, message = "nlm,nmd->nld"}> : () -> ()
    %cst_44 = arith.constant dense<0.000000e+00> : vector<16x8x8xf32>
    %131 = tpu.matmul %130, %115, %cst_44 {dimension_numbers = #tpu.dot_dimension_numbers<[2], [1], [1], [2], [0, 0, 0, 1, 1, 2], [0], [0]>} : vector<16x8x8xf32>, vector<16x8x8xf32>, vector<16x8x8xf32> -> vector<16x8x8xf32>
    "tpu.trace_stop"() : () -> ()
    %132 = vector.shape_cast %131 : vector<16x8x8xf32> to vector<128x8xf32>
    %c0_45 = arith.constant 0 : index
    %c24 = arith.constant 24 : index
    %133 = vector.load %arg19[%c0_45, %c24] : memref<128x32xf32, #tpu.memory_space<vmem>>, vector<128x8xf32>
    tpu.vector_store %arg19[%c0_45, %c24], %132 {strides = array<i32>} : memref<128x32xf32, #tpu.memory_space<vmem>>, vector<128x8xf32>,
    %c0_46 = arith.constant 0 : index
    %c0_47 = arith.constant 0 : index
    %134 = vector.load %arg19[%c0_46, %c0_47] : memref<128x32xf32, #tpu.memory_space<vmem>>, vector<128x32xf32>
    %135 = arith.truncf %134 : vector<128x32xf32> to vector<128x32xbf16>
    %c0_48 = arith.constant 0 : index
    %c0_49 = arith.constant 0 : index
    %c0_50 = arith.constant 0 : index
    %136 = vector.load %arg7[%c0_48, %c0_49, %c0_50] : memref<1x32x32xbf16, #tpu.memory_space<vmem>>, vector<1x32x32xbf16>
    %137 = vector.shape_cast %136 : vector<1x32x32xbf16> to vector<32x32xbf16>
    %cst_51 = arith.constant dense<0.000000e+00> : vector<128x32xf32>
    %138 = tpu.matmul %135, %137, %cst_51 {dimension_numbers = #tpu.dot_dimension_numbers<[1], [0], [0], [1], [0, 0, 1, 1], [], []>} : vector<128x32xbf16>, vector<32x32xbf16>, vector<128x32xf32> -> vector<128x32xf32>
    %c0_52 = arith.constant 0 : index
    %c0_53 = arith.constant 0 : index
    %c0_54 = arith.constant 0 : index
    %139 = vector.load %arg8[%c0_52, %c0_53, %c0_54] : memref<1x1x32xf32, #tpu.memory_space<vmem>>, vector<1x1x32xf32>
    %140 = vector.shape_cast %139 : vector<1x1x32xf32> to vector<1x32xf32>
    %141 = vector.broadcast %140 : vector<1x32xf32> to vector<128x32xf32>
    %142 = arith.addf %138, %141 : vector<128x32xf32>
    %143 = arith.addf %29, %142 : vector<128x32xf32>
    %c0_55 = arith.constant 0 : index
    %c0_56 = arith.constant 0 : index
    %c0_57 = arith.constant 0 : index
    %144 = vector.load %arg9[%c0_55, %c0_56, %c0_57] : memref<1x1x32xf32, #tpu.memory_space<vmem>>, vector<1x1x32xf32>
    %145 = vector.shape_cast %144 : vector<1x1x32xf32> to vector<1x32xf32>
    %c0_58 = arith.constant 0 : index
    %c0_59 = arith.constant 0 : index
    %c0_60 = arith.constant 0 : index
    %146 = vector.load %arg10[%c0_58, %c0_59, %c0_60] : memref<1x1x32xf32, #tpu.memory_space<vmem>>, vector<1x1x32xf32>
    %147 = vector.shape_cast %146 : vector<1x1x32xf32> to vector<1x32xf32>
    %cst_61 = arith.constant dense<0.000000e+00> : vector<128xf32>
    %148 = vector.multi_reduction <add>, %143, %cst_61 [1] : vector<128x32xf32> to vector<128xf32>
    %149 = vector.shape_cast %148 : vector<128xf32> to vector<128x1xf32>
    %cst_62 = arith.constant 3.200000e+01 : f32
    %150 = vector.broadcast %cst_62 : f32 to vector<128x1xf32>
    %151 = arith.divf %149, %150 : vector<128x1xf32>
    %152 = vector.broadcast %151 : vector<128x1xf32> to vector<128x32xf32>
    %153 = arith.subf %143, %152 : vector<128x32xf32>
    %154 = arith.mulf %153, %153 : vector<128x32xf32>
    %cst_63 = arith.constant dense<0.000000e+00> : vector<128xf32>
    %155 = vector.multi_reduction <add>, %154, %cst_63 [1] : vector<128x32xf32> to vector<128xf32>
    %156 = vector.shape_cast %155 : vector<128xf32> to vector<128x1xf32>
    %cst_64 = arith.constant 3.200000e+01 : f32
    %157 = vector.broadcast %cst_64 : f32 to vector<128x1xf32>
    %158 = arith.divf %156, %157 : vector<128x1xf32>
    %cst_65 = arith.constant 9.99999974E-6 : f32
    %159 = vector.broadcast %cst_65 : f32 to vector<128x1xf32>
    %160 = arith.addf %158, %159 : vector<128x1xf32>
    %161 = math.rsqrt %160 : vector<128x1xf32>
    %162 = vector.broadcast %161 : vector<128x1xf32> to vector<128x32xf32>
    %163 = arith.mulf %153, %162 : vector<128x32xf32>
    %164 = vector.broadcast %145 : vector<1x32xf32> to vector<128x32xf32>
    %165 = arith.mulf %163, %164 : vector<128x32xf32>
    %166 = vector.broadcast %147 : vector<1x32xf32> to vector<128x32xf32>
    %167 = arith.addf %165, %166 : vector<128x32xf32>
    %168 = arith.truncf %167 : vector<128x32xf32> to vector<128x32xbf16>
    %c0_66 = arith.constant 0 : index
    %c0_67 = arith.constant 0 : index
    %c0_68 = arith.constant 0 : index
    %169 = vector.load %arg11[%c0_66, %c0_67, %c0_68] : memref<1x32x64xbf16, #tpu.memory_space<vmem>>, vector<1x32x64xbf16>
    %170 = vector.shape_cast %169 : vector<1x32x64xbf16> to vector<32x64xbf16>
    %cst_69 = arith.constant dense<0.000000e+00> : vector<128x64xf32>
    %171 = tpu.matmul %168, %170, %cst_69 {dimension_numbers = #tpu.dot_dimension_numbers<[1], [0], [0], [1], [0, 0, 1, 1], [], []>} : vector<128x32xbf16>, vector<32x64xbf16>, vector<128x64xf32> -> vector<128x64xf32>
    %c0_70 = arith.constant 0 : index
    %c0_71 = arith.constant 0 : index
    %c0_72 = arith.constant 0 : index
    %172 = vector.load %arg12[%c0_70, %c0_71, %c0_72] : memref<1x1x64xf32, #tpu.memory_space<vmem>>, vector<1x1x64xf32>
    %173 = vector.shape_cast %172 : vector<1x1x64xf32> to vector<1x64xf32>
    %174 = vector.broadcast %173 : vector<1x64xf32> to vector<128x64xf32>
    %175 = arith.addf %171, %174 : vector<128x64xf32>
    %cst_73 = arith.constant 0.000000e+00 : f32
    %176 = vector.broadcast %cst_73 : f32 to vector<128x64xf32>
    %177 = arith.maximumf %175, %176 : vector<128x64xf32>
    %178 = arith.truncf %177 : vector<128x64xf32> to vector<128x64xbf16>
    %c0_74 = arith.constant 0 : index
    %c0_75 = arith.constant 0 : index
    %c0_76 = arith.constant 0 : index
    %179 = vector.load %arg13[%c0_74, %c0_75, %c0_76] : memref<1x64x32xbf16, #tpu.memory_space<vmem>>, vector<1x64x32xbf16>
    %180 = vector.shape_cast %179 : vector<1x64x32xbf16> to vector<64x32xbf16>
    %cst_77 = arith.constant dense<0.000000e+00> : vector<128x32xf32>
    %181 = tpu.matmul %178, %180, %cst_77 {dimension_numbers = #tpu.dot_dimension_numbers<[1], [0], [0], [1], [0, 0, 1, 1], [], []>} : vector<128x64xbf16>, vector<64x32xbf16>, vector<128x32xf32> -> vector<128x32xf32>
    %c0_78 = arith.constant 0 : index
    %c0_79 = arith.constant 0 : index
    %c0_80 = arith.constant 0 : index
    %182 = vector.load %arg14[%c0_78, %c0_79, %c0_80] : memref<1x1x32xf32, #tpu.memory_space<vmem>>, vector<1x1x32xf32>
    %183 = vector.shape_cast %182 : vector<1x1x32xf32> to vector<1x32xf32>
    %184 = vector.broadcast %183 : vector<1x32xf32> to vector<128x32xf32>
    %185 = arith.addf %181, %184 : vector<128x32xf32>
    %186 = arith.addf %167, %185 : vector<128x32xf32>
    %c0_81 = arith.constant 0 : index
    %c0_82 = arith.constant 0 : index
    %187 = vector.load %arg18[%c0_81, %c0_82] : memref<128x32xf32, #tpu.memory_space<vmem>>, vector<128x32xf32>
    tpu.vector_store %arg18[%c0_81, %c0_82], %186 {strides = array<i32>} : memref<128x32xf32, #tpu.memory_space<vmem>>, vector<128x32xf32>,
    %c1_i32 = arith.constant 1 : i32
    %188 = arith.cmpi eq, %arg1, %c1_i32 : i32
    %189 = arith.extui %188 : i1 to i32
    %c0_i32_83 = arith.constant 0 : i32
    %190 = arith.cmpi ne, %189, %c0_i32_83 : i32
    scf.if %190 {
      %191 = arith.truncf %186 : vector<128x32xf32> to vector<128x32xbf16>
      %c0_84 = arith.constant 0 : index
      %c0_85 = arith.constant 0 : index
      %192 = vector.load %arg15[%c0_84, %c0_85] : memref<32x256xbf16, #tpu.memory_space<vmem>>, vector<32x256xbf16>
      %cst_86 = arith.constant dense<0.000000e+00> : vector<128x256xf32>
      %193 = tpu.matmul %191, %192, %cst_86 {dimension_numbers = #tpu.dot_dimension_numbers<[1], [0], [0], [1], [0, 0, 1, 1], [], []>} : vector<128x32xbf16>, vector<32x256xbf16>, vector<128x256xf32> -> vector<128x256xf32>
      %c0_87 = arith.constant 0 : index
      %c0_88 = arith.constant 0 : index
      %194 = vector.load %arg16[%c0_87, %c0_88] : memref<1x256xf32, #tpu.memory_space<vmem>>, vector<1x256xf32>
      %195 = vector.broadcast %194 : vector<1x256xf32> to vector<128x256xf32>
      %196 = arith.addf %193, %195 : vector<128x256xf32>
      %c0_89 = arith.constant 0 : index
      %c0_90 = arith.constant 0 : index
      %197 = vector.load %arg17[%c0_89, %c0_90] : memref<128x256xf32, #tpu.memory_space<vmem>>, vector<128x256xf32>
      tpu.vector_store %arg17[%c0_89, %c0_90], %196 {strides = array<i32>} : memref<128x256xf32, #tpu.memory_space<vmem>>, vector<128x256xf32>,
    } else {
    }
    return
  }
  func.func @transform_0(%arg0: i32, %arg1: i32) -> (i32, i32, i32) {
    %c0_i32 = arith.constant 0 : i32
    %c0_i32_0 = arith.constant 0 : i32
    %c0_i32_1 = arith.constant 0 : i32
    return %arg0, %c0_i32, %c0_i32_0 : i32, i32, i32
  }
  func.func @transform_1(%arg0: i32, %arg1: i32) -> (i32, i32, i32) {
    %c0_i32 = arith.constant 0 : i32
    %c0_i32_0 = arith.constant 0 : i32
    %c0_i32_1 = arith.constant 0 : i32
    return %arg1, %c0_i32, %c0_i32_0 : i32, i32, i32
  }
  func.func @transform_2(%arg0: i32, %arg1: i32) -> (i32, i32, i32) {
    %c0_i32 = arith.constant 0 : i32
    %c0_i32_0 = arith.constant 0 : i32
    %c0_i32_1 = arith.constant 0 : i32
    return %arg1, %c0_i32, %c0_i32_0 : i32, i32, i32
  }
  func.func @transform_3(%arg0: i32, %arg1: i32) -> (i32, i32, i32) {
    %c0_i32 = arith.constant 0 : i32
    %c0_i32_0 = arith.constant 0 : i32
    %c0_i32_1 = arith.constant 0 : i32
    return %arg1, %c0_i32, %c0_i32_0 : i32, i32, i32
  }
  func.func @transform_4(%arg0: i32, %arg1: i32) -> (i32, i32, i32) {
    %c0_i32 = arith.constant 0 : i32
    %c0_i32_0 = arith.constant 0 : i32
    %c0_i32_1 = arith.constant 0 : i32
    return %arg1, %c0_i32, %c0_i32_0 : i32, i32, i32
  }
  func.func @transform_5(%arg0: i32, %arg1: i32) -> (i32, i32, i32) {
    %c0_i32 = arith.constant 0 : i32
    %c0_i32_0 = arith.constant 0 : i32
    %c0_i32_1 = arith.constant 0 : i32
    return %arg1, %c0_i32, %c0_i32_0 : i32, i32, i32
  }
  func.func @transform_6(%arg0: i32, %arg1: i32) -> (i32, i32, i32) {
    %c0_i32 = arith.constant 0 : i32
    %c0_i32_0 = arith.constant 0 : i32
    %c0_i32_1 = arith.constant 0 : i32
    return %arg1, %c0_i32, %c0_i32_0 : i32, i32, i32
  }
  func.func @transform_7(%arg0: i32, %arg1: i32) -> (i32, i32, i32) {
    %c0_i32 = arith.constant 0 : i32
    %c0_i32_0 = arith.constant 0 : i32
    %c0_i32_1 = arith.constant 0 : i32
    return %arg1, %c0_i32, %c0_i32_0 : i32, i32, i32
  }
  func.func @transform_8(%arg0: i32, %arg1: i32) -> (i32, i32, i32) {
    %c0_i32 = arith.constant 0 : i32
    %c0_i32_0 = arith.constant 0 : i32
    %c0_i32_1 = arith.constant 0 : i32
    return %arg1, %c0_i32, %c0_i32_0 : i32, i32, i32
  }
  func.func @transform_9(%arg0: i32, %arg1: i32) -> (i32, i32, i32) {
    %c0_i32 = arith.constant 0 : i32
    %c0_i32_0 = arith.constant 0 : i32
    %c0_i32_1 = arith.constant 0 : i32
    return %arg1, %c0_i32, %c0_i32_0 : i32, i32, i32
  }
  func.func @transform_10(%arg0: i32, %arg1: i32) -> (i32, i32, i32) {
    %c0_i32 = arith.constant 0 : i32
    %c0_i32_0 = arith.constant 0 : i32
    %c0_i32_1 = arith.constant 0 : i32
    return %arg1, %c0_i32, %c0_i32_0 : i32, i32, i32
  }
  func.func @transform_11(%arg0: i32, %arg1: i32) -> (i32, i32, i32) {
    %c0_i32 = arith.constant 0 : i32
    %c0_i32_0 = arith.constant 0 : i32
    %c0_i32_1 = arith.constant 0 : i32
    return %arg1, %c0_i32, %c0_i32_0 : i32, i32, i32
  }
  func.func @transform_12(%arg0: i32, %arg1: i32) -> (i32, i32, i32) {
    %c0_i32 = arith.constant 0 : i32
    %c0_i32_0 = arith.constant 0 : i32
    %c0_i32_1 = arith.constant 0 : i32
    return %arg1, %c0_i32, %c0_i32_0 : i32, i32, i32
  }
  func.func @transform_13(%arg0: i32, %arg1: i32) -> (i32, i32) {
    %c0_i32 = arith.constant 0 : i32
    %c0_i32_0 = arith.constant 0 : i32
    %c0_i32_1 = arith.constant 0 : i32
    return %c0_i32, %c0_i32_0 : i32, i32
  }
  func.func @transform_14(%arg0: i32, %arg1: i32) -> (i32, i32) {
    %c0_i32 = arith.constant 0 : i32
    %c0_i32_0 = arith.constant 0 : i32
    %c0_i32_1 = arith.constant 0 : i32
    return %c0_i32, %c0_i32_0 : i32, i32
  }
  func.func @transform_15(%arg0: i32, %arg1: i32) -> (i32, i32) {
    %c0_i32 = arith.constant 0 : i32
    %c0_i32_0 = arith.constant 0 : i32
    return %arg0, %c0_i32 : i32, i32
  }
}

</mosaic_0001>

<bundles_post_ra>
// kernel: _lambda_.1
= control target key start
LH: loop header
LB: loop body
LE: loop exit
PB: predicated region body
PF: predicated region fallthrough
CT: control target
= control target key end

     0   :  { %s15128_s18 = smov 0   ;;  %s15130_s19 = smov 0   ;;  %s18288_s0 = inlined_call_operand.vmem [shape: f32[16,8,32], index: 0, kind: input, shape index: {}]   ;;  %s18289_s1 = inlined_call_operand.vmem [shape: f32[2,1,32], index: 1, kind: input, shape index: {}]   ;;  %s18290_s2 = inlined_call_operand.vmem [shape: f32[2,1,32], index: 2, kind: input, shape index: {}]   ;;  %s18291_s3 = inlined_call_operand.vmem [shape: bf16[2,32,96], index: 3, kind: input, shape index: {}]   ;;  %s18292_s4 = inlined_call_operand.vmem [shape: f32[2,1,96], index: 4, kind: input, shape index: {}]   ;;  %s18293_s5 = inlined_call_operand.vmem [shape: bf16[2,32,32], index: 5, kind: input, shape index: {}]   ;;  %s18294_s6 = inlined_call_operand.vmem [shape: f32[2,1,32], index: 6, kind: input, shape index: {}]   ;;  %s18295_s7 = inlined_call_operand.vmem [shape: f32[2,1,32], index: 7, kind: input, shape index: {}]   ;;  %s18296_s8 = inlined_call_operand.vmem [shape: f32[2,1,32], index: 8, kind: input, shape index: {}]   ;;  %s18297_s9 = inlined_call_operand.vmem [shape: bf16[2,32,64], index: 9, kind: input, shape index: {}]   ;;  %s18298_s10 = inlined_call_operand.vmem [shape: f32[2,1,64], index: 10, kind: input, shape index: {}]   ;;  %s18299_s11 = inlined_call_operand.vmem [shape: bf16[2,64,32], index: 11, kind: input, shape index: {}]   ;;  %s18300_s12 = inlined_call_operand.vmem [shape: f32[2,1,32], index: 12, kind: input, shape index: {}]   ;;  %s18301_s13 = inlined_call_operand.vmem [shape: bf16[32,256], index: 13, kind: input, shape index: {}]   ;;  %s18302_s14 = inlined_call_operand.vmem [shape: f32[1,256], index: 14, kind: input, shape index: {}]   ;;  %s18303_s15 = inlined_call_operand.vmem [shape: f32[128,256], index: 15, kind: output, shape index: {}]  }
   0x1   :  { %18327 = sst [smem:[#allocation50_spill]] %s18291_s3  ;;  %s15132_s20 = smov 0  }
   0x2   :  { %18328 = sst [smem:[#allocation51_spill]] %s18293_s5 }
   0x3   :  { %18329 = sst [smem:[#allocation52_spill]] %s18301_s13 }
   0x4   :  { %18330 = sst [smem:[#allocation53_spill]] %s18302_s14 }
   0x5   :  { %18331 = sst [smem:[#allocation54_spill]] %s18303_s15 }
   0x6 LB: > { %18332 = sst [smem:[#allocation5_spill]] %s15024_s19  ;;  %s34_s21 = sadd.s32 1, %s15024_s19  ;;  %s15028_s20 = sphi %s15132_s20, %s25_s20   ;;  %s15024_s19 = sphi %s15130_s19, %s18452_s19   ;;  %s15020_s18 = sphi %s15128_s18, %s18451_s18  }
   0x7   : > { %18333 = sst [smem:[#allocation6_spill]] %s15028_s20  ;;  %p13322_p0 = scmp.ge.s32.totalorder %s15028_s20, 1 }
   0x8   : > { %p35_p1 = scmp.ge.s32.totalorder %s34_s21, 2  ;;  %p554_p2 = scmp.lt.s32.totalorder %s15028_s20, 3 }
   0xa   : > { %s18454_s21 = smov (%p35_p1, %s34_s21), 0  ;;  %p555_p3 = pnand %p13322_p0, %p554_p2 }
   0xb   : > { %18334 = sst [smem:[#allocation7_spill]] %s18454_s21 }
   0xc   : > { %558 = sbr.rel (%p555_p3) target bundleno = 4702 (0x125e), region = 80 }
  0x13   : > { %p653_p4 = scmp.lt.s32.totalorder %s15020_s18, 1  ;;  %s18335_s3 = sld [smem:[#allocation50_spill]] }
  0x14   : > { %s18336_s5 = sld [smem:[#allocation51_spill]]  ;;  %p13331_p5 = scmp.ne.s32.totalorder %s15020_s18, 0 }
  0x15   : > { %s15150_s22 = scalar_select %p653_p4, %s15020_s18, 1 }
  0x16   : > { %708 = sbr.rel (%p13331_p5) target bundleno = 32 (0x20), region = 84  ;;  %v709_v0 = vld [vmem:[%s18288_s0] sm:$0xff] (!%p13331_p5)  ;;  %vm725_vm0 = vcmask (!%p13331_p5), 261120   ;;  %v710_v1 = vld [vmem:[%s18288_s0 + $0x8] sm:$0xff] (!%p13331_p5)  ;;  %v711_v2 = vld [vmem:[%s18288_s0 + $0x10] sm:$0xff] (!%p13331_p5)  ;;  %v742_v3 = vlaneseq (!%p13331_p5)  ;;  %vm748_vm1 = vcmask (!%p13331_p5), 64512  }
  0x17   : > { %s13591_s29 = sshll.u32 %s15150_s22, 4  ;;  %s677_s13 = scalar_lea.vmem %s18295_s7, %s15150_s22  ;;  %726 = vst.msk [vmem:[#allocation2] sm:$0xff] (!%p13331_p5), %vm725_vm0, %v709_v0  ;;  %727 = vst.msk [vmem:[#allocation2 + $0x8] sm:$0xff] (!%p13331_p5), %vm725_vm0, %v710_v1  ;;  %v712_v4 = vld [vmem:[%s18288_s0 + $0x18] sm:$0xff] (!%p13331_p5)  ;;  %v713_v5 = vld [vmem:[%s18288_s0 + $0x20] sm:$0xff] (!%p13331_p5) }
  0x18   : > { %s680_s17 = scalar_lea.vmem %s18296_s8, %s15150_s22  ;;  %s696_s30 = scalar_lea.vmem %s18300_s12, %s15150_s22  ;;  %728 = vst.msk [vmem:[#allocation2 + $0x10] sm:$0xff] (!%p13331_p5), %vm725_vm0, %v711_v2  ;;  %v714_v6 = vld [vmem:[%s18288_s0 + $0x28] sm:$0xff] (!%p13331_p5)  ;;  %729 = vst.msk [vmem:[#allocation2 + $0x18] sm:$0xff] (!%p13331_p5), %vm725_vm0, %v712_v4  ;;  %v715_v7 = vld [vmem:[%s18288_s0 + $0x30] sm:$0xff] (!%p13331_p5)  ;;  %v743_v10 = vshrl.u32 (!%p13331_p5), %v742_v3, 7  ;;  %v745_v11 = vand.u32 (!%p13331_p5), 127, %v742_v3 }
  0x19   : > { %s15168_s21 = scalar_lea.vmem %s18335_s3, %s13591_s29  ;;  %s15190_s3 = scalar_lea.vmem %s18297_s9, %s13591_s29  ;;  %730 = vst.msk [vmem:[#allocation2 + $0x20] sm:$0xff] (!%p13331_p5), %vm725_vm0, %v713_v5  ;;  %731 = vst.msk [vmem:[#allocation2 + $0x28] sm:$0xff] (!%p13331_p5), %vm725_vm0, %v714_v6  ;;  %v716_v8 = vld [vmem:[%s18288_s0 + $0x38] sm:$0xff] (!%p13331_p5)  ;;  %v717_v9 = vld [vmem:[%s18288_s0 + $0x40] sm:$0xff] (!%p13331_p5)  ;;  %v15030_v19 = vmov (!%p13331_p5), -1e+30  }
  0x1a   : > { %s15173_s15 = scalar_lea.vmem %s18336_s5, %s13591_s29  ;;  %s688_s5 = scalar_lea.vmem %s18298_s10, %s15150_s22  ;;  %732 = vst.msk [vmem:[#allocation2 + $0x30] sm:$0xff] (!%p13331_p5), %vm725_vm0, %v715_v7  ;;  %733 = vst.msk [vmem:[#allocation2 + $0x38] sm:$0xff] (!%p13331_p5), %vm725_vm0, %v716_v8  ;;  %v718_v12 = vld [vmem:[%s18288_s0 + $0x48] sm:$0xff] (!%p13331_p5)  ;;  %v719_v13 = vld [vmem:[%s18288_s0 + $0x50] sm:$0xff] (!%p13331_p5)  ;;  %vm746_vm2 = vcmp.le.s32.totalorder (!%p13331_p5), %v745_v11, %v743_v10 }
  0x1b   : > { %18337 = sst [smem:[#allocation8_spill]] %s15173_s15  ;;  %s13594_s15 = sshll.u32 %s15150_s22, 5  ;;  %734 = vst.msk [vmem:[#allocation2 + $0x40] sm:$0xff] (!%p13331_p5), %vm725_vm0, %v717_v9  ;;  %v720_v14 = vld [vmem:[%s18288_s0 + $0x58] sm:$0xff] (!%p13331_p5)  ;;  %735 = vst.msk [vmem:[#allocation2 + $0x48] sm:$0xff] (!%p13331_p5), %vm725_vm0, %v718_v12  ;;  %v721_v15 = vld [vmem:[%s18288_s0 + $0x60] sm:$0xff] (!%p13331_p5) }
  0x1c   : > { %s15200_s26 = scalar_lea.vmem %s18299_s11, %s13594_s15  ;;  %736 = vst.msk [vmem:[#allocation2 + $0x50] sm:$0xff] (!%p13331_p5), %vm725_vm0, %v719_v13  ;;  %737 = vst.msk [vmem:[#allocation2 + $0x58] sm:$0xff] (!%p13331_p5), %vm725_vm0, %v720_v14  ;;  %v722_v16 = vld [vmem:[%s18288_s0 + $0x68] sm:$0xff] (!%p13331_p5)  ;;  %v723_v17 = vld [vmem:[%s18288_s0 + $0x70] sm:$0xff] (!%p13331_p5)  ;;  %v747_v20 = vsel (!%p13331_p5), %vm746_vm2, 0.0, %v15030_v19 }
  0x1d   : > { %738 = vst.msk [vmem:[#allocation2 + $0x60] sm:$0xff] %vm725_vm0, %v721_v15  ;;  %739 = vst.msk [vmem:[#allocation2 + $0x68] sm:$0xff] %vm725_vm0, %v722_v16  ;;  %v724_v18 = vld [vmem:[%s18288_s0 + $0x78] sm:$0xff] }
  0x1e   : > { %740 = vst.msk [vmem:[#allocation2 + $0x70] sm:$0xff] %vm725_vm0, %v723_v17  ;;  %741 = vst.msk [vmem:[#allocation2 + $0x78] sm:$0xff] %vm725_vm0, %v724_v18 }
  0x1f   : > { %749 = vst.msk [vmem:[#allocation4] sm:$0xff] %vm748_vm1, %v747_v20 }
  0x20 PF: > { %vm769_vm3 = vcmask 261120   ;;  %s18338_s16 = scalar_lea.vmem %s18289_s1, %s15150_s22  ;;  %s18339_s24 = scalar_lea.vmem %s18290_s2, %s15150_s22  ;;  %vm15032_vm4 = vmmov 0   ;;  %vm1178_vm5 = vcmask 64512   ;;  %vm6584_vm6 = vcmask 130112  }
  0x21   : > { %v750_v21 = vld [vmem:[#allocation2] sm:$0xff]  ;;  %v751_v23 = vld [vmem:[#allocation2 + $0x8] sm:$0xff]  ;;  %s18356_s15 = scalar_lea.vmem %s18292_s4, %s15150_s22  ;;  %s15033_s14 = smov 96   ;;  %vm9337_vm7 = vcmask 195712   ;;  %vm12090_vm8 = vcmask 261312   ;;  %vm12760_vm9 = vcmask 523264  }
  0x22   : > { %v752_v22 = vld [vmem:[#allocation2 + $0x10] sm:$0xff]  ;;  %v770_v24 = vsel %vm769_vm3, %v750_v21, 0.0  ;;  %v753_v26 = vld [vmem:[#allocation2 + $0x18] sm:$0xff]  ;;  %v773_v29 = vsel %vm769_vm3, %v751_v23, 0.0  ;;  %s15034_s25 = smov 64   ;;  %s15035_s28 = smov 88  }
  0x23   : > { %v776_v25 = vsel %vm769_vm3, %v752_v22, 0.0  ;;  %771 = vadd.xlane.f32.xlu0 %v770_v24  ;;  %v15273_v27 = vld [vmem:[#allocation2 + $0x20] sm:$0xff]  ;;  %v15275_v28 = vld [vmem:[#allocation2 + $0x28] sm:$0xff]  ;;  %v779_v30 = vsel %vm769_vm3, %v753_v26, 0.0  ;;  %s15037_s27 = smov 56   ;;  %s15039_s29 = smov 112  }
  0x24   : > { %777 = vadd.xlane.f32.xlu1 %v776_v25  ;;  %v15279_v31 = vld [vmem:[#allocation2 + $0x30] sm:$0xff]  ;;  %v15281_v32 = vld [vmem:[#allocation2 + $0x38] sm:$0xff]  ;;  %v782_v33 = vsel %vm769_vm3, %v15273_v27, 0.0  ;;  %v785_v34 = vsel %vm769_vm3, %v15275_v28, 0.0  ;;  %s15040_s23 = smov 48   ;;  %s15042_s19 = smov 104  }
  0x25   : > { %v788_v35 = vsel %vm769_vm3, %v15279_v31, 0.0  ;;  %v791_v36 = vsel %vm769_vm3, %v15281_v32, 0.0  ;;  %v15291_v37 = vld [vmem:[#allocation2 + $0x40] sm:$0xff]  ;;  %v15293_v38 = vld [vmem:[#allocation2 + $0x48] sm:$0xff]  ;;  %v15315_v49 = vld [vmem:[#allocation2 + $0x70] sm:$0xff]  ;;  %s15043_s20 = smov 40  }
  0x26   : > { %v794_v39 = vsel %vm769_vm3, %v15291_v37, 0.0  ;;  %v797_v40 = vsel %vm769_vm3, %v15293_v38, 0.0  ;;  %v15299_v41 = vld [vmem:[#allocation2 + $0x50] sm:$0xff]  ;;  %v15301_v42 = vld [vmem:[#allocation2 + $0x58] sm:$0xff]  ;;  %v812_v51 = vsel %vm769_vm3, %v15315_v49, 0.0  ;;  %p13574_p6 = scmp.ne.s32.totalorder %s15020_s18, 1 }
  0x27   : > { %774 = vadd.xlane.f32.xlu0 %v773_v29  ;;  %v800_v43 = vsel %vm769_vm3, %v15299_v41, 0.0  ;;  %v803_v44 = vsel %vm769_vm3, %v15301_v42, 0.0  ;;  %v15307_v45 = vld [vmem:[#allocation2 + $0x60] sm:$0xff]  ;;  %v15309_v46 = vld [vmem:[#allocation2 + $0x68] sm:$0xff]  ;;  %v15317_v50 = vld [vmem:[#allocation2 + $0x78] sm:$0xff] }
  0x28   : > { %780 = vadd.xlane.f32.xlu1 %v779_v30  ;;  %v806_v47 = vsel %vm769_vm3, %v15307_v45, 0.0  ;;  %v809_v48 = vsel %vm769_vm3, %v15309_v46, 0.0  ;;  %v815_v52 = vsel %vm769_vm3, %v15317_v50, 0.0 }
  0x2b   : > { %783 = vadd.xlane.f32.xlu0 %v782_v33 }
  0x2c   : > { %786 = vadd.xlane.f32.xlu1 %v785_v34 }
  0x2f   : > { %789 = vadd.xlane.f32.xlu0 %v788_v35 }
  0x30   : > { %792 = vadd.xlane.f32.xlu1 %v791_v36 }
  0x33   : > { %795 = vadd.xlane.f32.xlu0 %v794_v39 }
  0x34   : > { %798 = vadd.xlane.f32.xlu1 %v797_v40 }
  0x37   : > { %801 = vadd.xlane.f32.xlu0 %v800_v43 }
  0x38   : > { %804 = vadd.xlane.f32.xlu1 %v803_v44 }
  0x3b   : > { %807 = vadd.xlane.f32.xlu0 %v806_v47 }
  0x3c   : > { %810 = vadd.xlane.f32.xlu1 %v809_v48 }
  0x3f   : > { %813 = vadd.xlane.f32.xlu0 %v812_v51 }
  0x40   : > { %816 = vadd.xlane.f32.xlu1 %v815_v52 }
  0xb0   : > { %v772_v53 = vpop.xlane.xlu0 %771 }
  0xb1   : > { %v778_v54 = vpop.xlane.xlu1 %777  ;;  %v819_v55 = vmul.f32 0.03125, %v772_v53 }
  0xb2   : > { %v821_v56 = vmul.f32 0.03125, %v778_v54 }
  0xb3   : > { %v15323_v57 = vsub.f32 %v750_v21, %v819_v55 }
  0xb4   : > { %v15325_v58 = vsub.f32 %v752_v22, %v821_v56  ;;  %v775_v59 = vpop.xlane.xlu0 %774 }
  0xb5   : > { %v781_v60 = vpop.xlane.xlu1 %780  ;;  %v820_v61 = vmul.f32 0.03125, %v775_v59  ;;  %v851_v63 = vmul.f32 %v15323_v57, %v15323_v57 }
  0xb6   : > { %v822_v62 = vmul.f32 0.03125, %v781_v60  ;;  %v853_v0 = vmul.f32 %v15325_v58, %v15325_v58 }
  0xb7   : > { %v15331_v1 = vsub.f32 %v751_v23, %v820_v61  ;;  %v867_v3 = vsel %vm769_vm3, %v851_v63, 0.0 }
  0xb8   : > { %v15333_v2 = vsub.f32 %v753_v26, %v822_v62  ;;  %868 = vadd.xlane.f32.xlu0 %v867_v3  ;;  %v784_v4 = vpop.xlane.xlu0 %783  ;;  %v873_v6 = vsel %vm769_vm3, %v853_v0, 0.0 }
  0xb9   : > { %v787_v5 = vpop.xlane.xlu1 %786  ;;  %v823_v7 = vmul.f32 0.03125, %v784_v4  ;;  %v852_v9 = vmul.f32 %v15331_v1, %v15331_v1 }
  0xba   : > { %v824_v8 = vmul.f32 0.03125, %v787_v5  ;;  %v854_v10 = vmul.f32 %v15333_v2, %v15333_v2 }
  0xbb   : > { %v15342_v11 = vsub.f32 %v15273_v27, %v823_v7  ;;  %v870_v13 = vsel %vm769_vm3, %v852_v9, 0.0 }
  0xbc   : > { %v15345_v12 = vsub.f32 %v15275_v28, %v824_v8  ;;  %874 = vadd.xlane.f32.xlu0 %v873_v6  ;;  %871 = vadd.xlane.f32.xlu1 %v870_v13  ;;  %v790_v14 = vpop.xlane.xlu0 %789  ;;  %v876_v16 = vsel %vm769_vm3, %v854_v10, 0.0  ;;  %v14668_v10 = vld [vmem:[%s15168_s21 + $0x8] sm:$0xff]  }
  0xbd   : > { %v793_v15 = vpop.xlane.xlu1 %792  ;;  %v825_v17 = vmul.f32 0.03125, %v790_v14  ;;  %v855_v19 = vmul.f32 %v15342_v11, %v15342_v11 }
  0xbe   : > { %v826_v18 = vmul.f32 0.03125, %v793_v15  ;;  %v856_v20 = vmul.f32 %v15345_v12, %v15345_v12 }
  0xbf   : > { %v15354_v21 = vsub.f32 %v15279_v31, %v825_v17  ;;  %v879_v23 = vsel %vm769_vm3, %v855_v19, 0.0 }
  0xc0   : > { %v15357_v22 = vsub.f32 %v15281_v32, %v826_v18  ;;  %877 = vadd.xlane.f32.xlu1 %v876_v16  ;;  %880 = vadd.xlane.f32.xlu0 %v879_v23  ;;  %v796_v24 = vpop.xlane.xlu0 %795  ;;  %v882_v26 = vsel %vm769_vm3, %v856_v20, 0.0 }
  0xc1   : > { %v799_v25 = vpop.xlane.xlu1 %798  ;;  %v827_v27 = vmul.f32 0.03125, %v796_v24  ;;  %v857_v29 = vmul.f32 %v15354_v21, %v15354_v21 }
  0xc2   : > { %v828_v28 = vmul.f32 0.03125, %v799_v25  ;;  %v858_v30 = vmul.f32 %v15357_v22, %v15357_v22 }
  0xc3   : > { %v15366_v31 = vsub.f32 %v15291_v37, %v827_v27  ;;  %v885_v33 = vsel %vm769_vm3, %v857_v29, 0.0 }
  0xc4   : > { %v15369_v32 = vsub.f32 %v15293_v38, %v828_v28  ;;  %883 = vadd.xlane.f32.xlu1 %v882_v26  ;;  %886 = vadd.xlane.f32.xlu0 %v885_v33  ;;  %v802_v34 = vpop.xlane.xlu0 %801  ;;  %v888_v36 = vsel %vm769_vm3, %v858_v30, 0.0 }
  0xc5   : > { %v805_v35 = vpop.xlane.xlu1 %804  ;;  %v829_v39 = vmul.f32 0.03125, %v802_v34  ;;  %v859_v43 = vmul.f32 %v15366_v31, %v15366_v31 }
  0xc6   : > { %v830_v40 = vmul.f32 0.03125, %v805_v35  ;;  %v860_v37 = vmul.f32 %v15369_v32, %v15369_v32 }
  0xc7   : > { %v15378_v44 = vsub.f32 %v15299_v41, %v829_v39  ;;  %v891_v47 = vsel %vm769_vm3, %v859_v43, 0.0 }
  0xc8   : > { %v15381_v38 = vsub.f32 %v15301_v42, %v830_v40  ;;  %889 = vadd.xlane.f32.xlu1 %v888_v36  ;;  %892 = vadd.xlane.f32.xlu0 %v891_v47  ;;  %v808_v48 = vpop.xlane.xlu0 %807  ;;  %v894_v52 = vsel %vm769_vm3, %v860_v37, 0.0 }
  0xc9   : > { %v811_v51 = vpop.xlane.xlu1 %810  ;;  %v831_v53 = vmul.f32 0.03125, %v808_v48  ;;  %v861_v55 = vmul.f32 %v15378_v44, %v15378_v44 }
  0xca   : > { %v832_v54 = vmul.f32 0.03125, %v811_v51  ;;  %v862_v41 = vmul.f32 %v15381_v38, %v15381_v38 }
  0xcb   : > { %v15390_v56 = vsub.f32 %v15307_v45, %v831_v53  ;;  %v897_v59 = vsel %vm769_vm3, %v861_v55, 0.0 }
  0xcc   : > { %v15393_v42 = vsub.f32 %v15309_v46, %v832_v54  ;;  %895 = vadd.xlane.f32.xlu1 %v894_v52  ;;  %898 = vadd.xlane.f32.xlu0 %v897_v59  ;;  %v814_v60 = vpop.xlane.xlu0 %813  ;;  %v900_v62 = vsel %vm769_vm3, %v862_v41, 0.0  ;;  %v15423_v52 = vld [vmem:[%s18338_s16] ss:$0 sm:$0xff]  ;;  %s15038_s16 = smov 80  }
  0xcd   : > { %v817_v61 = vpop.xlane.xlu1 %816  ;;  %v833_v63 = vmul.f32 0.03125, %v814_v60  ;;  %v863_v3 = vmul.f32 %v15390_v56, %v15390_v56 }
  0xce   : > { %v834_v0 = vmul.f32 0.03125, %v817_v61  ;;  %v864_v45 = vmul.f32 %v15393_v42, %v15393_v42 }
  0xcf   : > { %v15402_v46 = vsub.f32 %v15315_v49, %v833_v63  ;;  %v903_v5 = vsel %vm769_vm3, %v863_v3, 0.0 }
  0xd0   : > { %v15405_v4 = vsub.f32 %v15317_v50, %v834_v0  ;;  %901 = vadd.xlane.f32.xlu1 %v900_v62  ;;  %904 = vadd.xlane.f32.xlu0 %v903_v5  ;;  %v906_v6 = vsel %vm769_vm3, %v864_v45, 0.0  ;;  %v14667_v50 = vld [vmem:[%s15168_s21] sm:$0xff]   ;;  %s15036_s21 = smov 120  }
  0xd1   : > { %v865_v7 = vmul.f32 %v15402_v46, %v15402_v46  ;;  %13893 = vmatprep.subr.bf16.mxu0 %v14667_v50  ;;  %v15432_v0 = vld [vmem:[%s18339_s24] ss:$0 sm:$0xff]  ;;  %s15041_s24 = smov 72  }
  0xd2   : > { %v866_v8 = vmul.f32 %v15405_v4, %v15405_v4  ;;  %13894 = vmatpush3.bf16.msra.mxu0 %v14667_v50 }
  0xd3   : > { %v909_v9 = vsel %vm769_vm3, %v865_v7, 0.0  ;;  %13895 = vmatprep.subr.bf16.mxu0 %v14668_v10 }
  0xd4   : > { %907 = vadd.xlane.f32.xlu1 %v906_v6  ;;  %910 = vadd.xlane.f32.xlu0 %v909_v9  ;;  %v912_v49 = vsel %vm769_vm3, %v866_v8, 0.0 }
  0xd6   : > { %13896 = vmatpush3.bf16.msra.mxu0 %v14668_v10 }
  0xd8   : > { %913 = vadd.xlane.f32.xlu1 %v912_v49 }
 0x145   : > { %v869_v13 = vpop.xlane.xlu0 %868 }
 0x146   : > { %v915_v14 = vmul.f32 0.03125, %v869_v13 }
 0x148   : > { %v931_v15 = vadd.f32 1e-05, %v915_v14 }
 0x149   : > { %v872_v16 = vpop.xlane.xlu1 %871  ;;  %v875_v17 = vpop.xlane.xlu0 %874 }
 0x14a   : > { %14677 = vrsqrt.f32 %v931_v15  ;;  %v916_v18 = vmul.f32 0.03125, %v872_v16  ;;  %v917_v19 = vmul.f32 0.03125, %v875_v17 }
 0x14c   : > { %v932_v20 = vadd.f32 1e-05, %v916_v18  ;;  %v933_v23 = vadd.f32 1e-05, %v917_v19 }
 0x14d   : > { %v878_v24 = vpop.xlane.xlu1 %877  ;;  %v881_v25 = vpop.xlane.xlu0 %880 }
 0x14e   : > { %14679 = vrsqrt.f32 %v932_v20  ;;  %v918_v26 = vmul.f32 0.03125, %v878_v24  ;;  %v919_v27 = vmul.f32 0.03125, %v881_v25 }
 0x14f   : > { %14681 = vrsqrt.f32 %v933_v23 }
 0x150   : > { %v934_v28 = vadd.f32 1e-05, %v918_v26  ;;  %v935_v29 = vadd.f32 1e-05, %v919_v27 }
 0x151   : > { %v884_v30 = vpop.xlane.xlu1 %883  ;;  %v887_v33 = vpop.xlane.xlu0 %886 }
 0x152   : > { %14683 = vrsqrt.f32 %v934_v28  ;;  %v920_v34 = vmul.f32 0.03125, %v884_v30  ;;  %v921_v35 = vmul.f32 0.03125, %v887_v33 }
 0x153   : > { %14685 = vrsqrt.f32 %v935_v29 }
 0x154   : > { %v14678_v36 = vpop.eup %14677  ;;  %v936_v39 = vadd.f32 1e-05, %v920_v34  ;;  %v937_v40 = vadd.f32 1e-05, %v921_v35 }
 0x155   : > { %v890_v43 = vpop.xlane.xlu1 %889  ;;  %v893_v37 = vpop.xlane.xlu0 %892  ;;  %v963_v47 = vmul.f32 %v14678_v36, %v15323_v57 }
 0x156   : > { %14687 = vrsqrt.f32 %v936_v39  ;;  %v922_v48 = vmul.f32 0.03125, %v890_v43  ;;  %v923_v51 = vmul.f32 0.03125, %v893_v37 }
 0x157   : > { %14689 = vrsqrt.f32 %v937_v40  ;;  %v985_v57 = vmul.f32 %v15423_v52, %v963_v47 }
 0x158   : > { %v14680_v53 = vpop.eup %14679  ;;  %v938_v54 = vadd.f32 1e-05, %v922_v48  ;;  %v939_v55 = vadd.f32 1e-05, %v923_v51 }
 0x159   : > { %v14682_v41 = vpop.eup %14681  ;;  %v896_v59 = vpop.xlane.xlu1 %895  ;;  %v964_v61 = vmul.f32 %v14680_v53, %v15331_v1  ;;  %v15437_v49 = vadd.f32 %v15432_v0, %v985_v57 }
 0x15a   : > { %v899_v60 = vpop.xlane.xlu0 %898  ;;  %14691 = vrsqrt.f32 %v938_v54  ;;  %v924_v62 = vmul.f32 0.03125, %v896_v59  ;;  %v965_v3 = vmul.f32 %v14682_v41, %v15325_v58 }
 0x15b   : > { %v925_v63 = vmul.f32 0.03125, %v899_v60  ;;  %14693 = vrsqrt.f32 %v939_v55  ;;  %v986_v45 = vmul.f32 %v15423_v52, %v964_v61  ;;  %18340 = vst [vmem:[#allocation9_spill] sm:$0xff] %v15437_v49 }
 0x15c   : > { %v14684_v5 = vpop.eup %14683  ;;  %v940_v6 = vadd.f32 1e-05, %v924_v62  ;;  %v987_v13 = vmul.f32 %v15423_v52, %v965_v3 }
 0x15d   : > { %v941_v7 = vadd.f32 1e-05, %v925_v63  ;;  %v14686_v1 = vpop.eup %14685  ;;  %v902_v8 = vpop.xlane.xlu1 %901  ;;  %v15440_v50 = vadd.f32 %v15432_v0, %v986_v45  ;;  %v966_v10 = vmul.f32 %v14684_v5, %v15333_v2 }
 0x15e   : > { %v905_v9 = vpop.xlane.xlu0 %904  ;;  %14695 = vrsqrt.f32 %v940_v6  ;;  %v926_v58 = vmul.f32 0.03125, %v902_v8  ;;  %v967_v17 = vmul.f32 %v14686_v1, %v15342_v11  ;;  %v15450_v25 = vadd.f32 %v15432_v0, %v987_v13 }
 0x15f   : > { %18341 = vst [vmem:[#allocation10_spill] sm:$0xff] %v15440_v50  ;;  %v927_v14 = vmul.f32 0.03125, %v905_v9  ;;  %14697 = vrsqrt.f32 %v941_v7  ;;  %v1023_v15 = vpack.c.bf16 %v15440_v50, %v15437_v49  ;;  %v988_v16 = vmul.f32 %v15423_v52, %v966_v10 }
 0x160   : > { %v14688_v18 = vpop.eup %14687  ;;  %v942_v19 = vadd.f32 1e-05, %v926_v58  ;;  %18342 = vst [vmem:[#allocation11_spill] sm:$0xff] %v15450_v25  ;;  %v989_v28 = vmul.f32 %v15423_v52, %v967_v17 }
 0x161   : > { %v943_v20 = vadd.f32 1e-05, %v927_v14  ;;  %v14690_v23 = vpop.eup %14689  ;;  %v908_v24 = vpop.xlane.xlu1 %907  ;;  %13897 = vmatprep.mubr.msk.bf16.mxu0 %vm769_vm3, %v1023_v15  ;;  %v15453_v26 = vadd.f32 %v15432_v0, %v988_v16  ;;  %v968_v27 = vmul.f32 %v14688_v18, %v15345_v12 }
 0x162   : > { %v911_v2 = vpop.xlane.xlu0 %910  ;;  %14699 = vrsqrt.f32 %v942_v19  ;;  %v928_v11 = vmul.f32 0.03125, %v908_v24  ;;  %v969_v30 = vmul.f32 %v14690_v23, %v15354_v21  ;;  %v15463_v12 = vadd.f32 %v15432_v0, %v989_v28 }
 0x163   : > { %18343 = vst [vmem:[#allocation12_spill] sm:$0xff] %v15453_v26  ;;  %v929_v29 = vmul.f32 0.03125, %v911_v2  ;;  %14701 = vrsqrt.f32 %v943_v20  ;;  %v1024_v33 = vpack.c.bf16 %v15453_v26, %v15450_v25  ;;  %v990_v34 = vmul.f32 %v15423_v52, %v968_v27 }
 0x164   : > { %v14692_v35 = vpop.eup %14691  ;;  %v944_v36 = vadd.f32 1e-05, %v928_v11  ;;  %18344 = vst [vmem:[#allocation13_spill] sm:$0xff] %v15463_v12  ;;  %v991_v47 = vmul.f32 %v15423_v52, %v969_v30 }
 0x165   : > { %v945_v39 = vadd.f32 1e-05, %v929_v29  ;;  %v14694_v40 = vpop.eup %14693  ;;  %v914_v43 = vpop.xlane.xlu1 %913  ;;  %13898 = vmatmul.mubr.msk.bf16.vlgmr.msra.gmra.mrb[0].mxu0 %vm769_vm3, %v1024_v33  ;;  %v15466_v37 = vadd.f32 %v15432_v0, %v990_v34  ;;  %v970_v21 = vmul.f32 %v14692_v35, %v15357_v22 }
 0x166   : > { %14703 = vrsqrt.f32 %v944_v36  ;;  %v930_v48 = vmul.f32 0.03125, %v914_v43  ;;  %v971_v51 = vmul.f32 %v14694_v40, %v15366_v31  ;;  %v15476_v60 = vadd.f32 %v15432_v0, %v991_v47 }
 0x167   : > { %18345 = vst [vmem:[#allocation14_spill] sm:$0xff] %v15466_v37  ;;  %14705 = vrsqrt.f32 %v945_v39  ;;  %v1025_v53 = vpack.c.bf16 %v15466_v37, %v15463_v12  ;;  %v992_v54 = vmul.f32 %v15423_v52, %v970_v21 }
 0x168   : > { %v14696_v55 = vpop.eup %14695  ;;  %v946_v41 = vadd.f32 1e-05, %v930_v48  ;;  %18346 = vst [vmem:[#allocation15_spill] sm:$0xff] %v15476_v60  ;;  %v993_v31 = vmul.f32 %v15423_v52, %v971_v51 }
 0x169   : > { %v14698_v59 = vpop.eup %14697  ;;  %13901 = vmatprep.mubr.msk.bf16.mxu0 %vm769_vm3, %v1025_v53  ;;  %v15479_v22 = vadd.f32 %v15432_v0, %v992_v54  ;;  %v972_v61 = vmul.f32 %v14696_v55, %v15369_v32 }
 0x16a   : > { %14707 = vrsqrt.f32 %v946_v41  ;;  %v973_v57 = vmul.f32 %v14698_v59, %v15378_v44  ;;  %v15489_v5 = vadd.f32 %v15432_v0, %v993_v31 }
 0x16b   : > { %18347 = vst [vmem:[#allocation16_spill] sm:$0xff] %v15479_v22  ;;  %v1026_v62 = vpack.c.bf16 %v15479_v22, %v15476_v60  ;;  %v994_v63 = vmul.f32 %v15423_v52, %v972_v61 }
 0x16c   : > { %v14700_v3 = vpop.eup %14699  ;;  %18348 = vst [vmem:[#allocation17_spill] sm:$0xff] %v15489_v5  ;;  %v995_v7 = vmul.f32 %v15423_v52, %v973_v57 }
 0x16d   : > { %v14702_v45 = vpop.eup %14701  ;;  %13902 = vmatmul.mubr.msk.bf16.gmra.mrb[4].mxu0 %vm769_vm3, %v1026_v62  ;;  %v15492_v6 = vadd.f32 %v15432_v0, %v994_v63  ;;  %v974_v32 = vmul.f32 %v14700_v3, %v15381_v38 }
 0x16e   : > { %v975_v44 = vmul.f32 %v14702_v45, %v15390_v56  ;;  %v15502_v13 = vadd.f32 %v15432_v0, %v995_v7 }
 0x16f   : > { %18349 = vst [vmem:[#allocation18_spill] sm:$0xff] %v15492_v6  ;;  %v1027_v1 = vpack.c.bf16 %v15492_v6, %v15489_v5  ;;  %v996_v8 = vmul.f32 %v15423_v52, %v974_v32 }
 0x170   : > { %v14704_v9 = vpop.eup %14703  ;;  %18350 = vst [vmem:[#allocation19_spill] sm:$0xff] %v15502_v13  ;;  %v997_v14 = vmul.f32 %v15423_v52, %v975_v44 }
 0x171   : > { %v14706_v10 = vpop.eup %14705  ;;  %13905 = vmatprep.mubr.msk.bf16.mxu0 %vm769_vm3, %v1027_v1  ;;  %v15505_v58 = vadd.f32 %v15432_v0, %v996_v8  ;;  %v976_v38 = vmul.f32 %v14704_v9, %v15393_v42 }
 0x172   : > { %v977_v56 = vmul.f32 %v14706_v10, %v15402_v46  ;;  %v15515_v18 = vadd.f32 %v15432_v0, %v997_v14 }
 0x173   : > { %18351 = vst [vmem:[#allocation20_spill] sm:$0xff] %v15505_v58  ;;  %v1028_v15 = vpack.c.bf16 %v15505_v58, %v15502_v13  ;;  %v998_v16 = vmul.f32 %v15423_v52, %v976_v38 }
 0x174   : > { %v14708_v17 = vpop.eup %14707  ;;  %18352 = vst [vmem:[#allocation21_spill] sm:$0xff] %v15515_v18  ;;  %v999_v20 = vmul.f32 %v15423_v52, %v977_v56 }
 0x175   : > { %13906 = vmatmul.mubr.msk.bf16.gmra.mrb[8].mxu0 %vm769_vm3, %v1028_v15  ;;  %v15518_v19 = vadd.f32 %v15432_v0, %v998_v16  ;;  %v978_v42 = vmul.f32 %v14708_v17, %v15405_v4  ;;  %v18309_v4 = vmov 0.0  }
 0x176   : > { %v15527_v24 = vadd.f32 %v15432_v0, %v999_v20  ;;  %13913 = vmatprep.subr.mxu1 %v18309_v4  ;;  %13958 = vmatprep.subr.mxu0 %v18309_v4 }
 0x177   : > { %18353 = vst [vmem:[#allocation22_spill] sm:$0xff] %v15518_v19  ;;  %v1029_v46 = vpack.c.bf16 %v15518_v19, %v15515_v18  ;;  %v1000_v23 = vmul.f32 %v15423_v52, %v978_v42  ;;  %13915 = vmatprep.mubr.msk.f32.mxu1 %vm15032_vm4, %v18309_v4  ;;  %v13334_v52 = vld [vmem:[%s18356_s15] ss:$0 sm:$0xff]  ;;  %s15044_s15 = smov 8  }
 0x178   : > { %18354 = vst [vmem:[#allocation23_spill] sm:$0xff] %v15527_v24 }
 0x179   : > { %13909 = vmatprep.mubr.msk.bf16.mxu0 %vm769_vm3, %v1029_v46  ;;  %v15530_v2 = vadd.f32 %v15432_v0, %v1000_v23 }
 0x17b   : > { %18355 = vst [vmem:[#allocation24_spill] sm:$0xff] %v15530_v2  ;;  %v1030_v27 = vpack.c.bf16 %v15530_v2, %v15527_v24 }
 0x17d   : > { %13910 = vmatmul.mubr.msk.bf16.gmra.mrb[12].mxu0 %vm769_vm3, %v1030_v27 }
 0x17e   : > { %13960 = vmatprep.mubr.msk.f32.mxu0 %vm15032_vm4, %v18309_v4 }
 0x238   : > { %v13899_v0 = vpop.f32.mrb[0].mxu0 }
 0x239   : > { %v1112_v28 = vpop.f32.mrb[1].mxu0  ;;  %v15554_v34 = vadd.f32 %v13899_v0, %v13334_v52 }
 0x23a   : > { %v15546_v11 = vadd.f32 %v13334_v52, %v1112_v28  ;;  %v13900_v29 = vpop.f32.mrb[2].mxu0 }
 0x23b   : > { %v1115_v30 = vpop.f32.mrb[3].mxu0  ;;  %v15560_v21 = vadd.f32 %v13900_v29, %v13334_v52 }
 0x23c   : > { %v15548_v33 = vadd.f32 %v13334_v52, %v1115_v30  ;;  %1176 = vrot.lane.b32.xlu0 %v15546_v11, %s15033_s14 }
 0x23e   : > { %1254 = vrot.lane.b32.xlu1 %v15548_v33, %s15033_s14 }
 0x240   : > { %v13903_v35 = vpop.f32.mrb[4].mxu0 }
 0x241   : > { %v1128_v36 = vpop.f32.mrb[5].mxu0  ;;  %v15564_v47 = vadd.f32 %v13903_v35, %v13334_v52  ;;  %v15740_v35 = vld [vmem:[#allocation4] sm:$0xff] }
 0x242   : > { %v15556_v39 = vadd.f32 %v13334_v52, %v1128_v36  ;;  %1331 = vrot.lane.b32.xlu1 %v15554_v34, %s15033_s14  ;;  %v13904_v40 = vpop.f32.mrb[6].mxu0 }
 0x243   : > { %v1131_v43 = vpop.f32.mrb[7].mxu0  ;;  %v15576_v59 = vadd.f32 %v13904_v40, %v13334_v52 }
 0x244   : > { %1485 = vrot.lane.b32.xlu0 %v15556_v39, %s15033_s14  ;;  %v15568_v48 = vadd.f32 %v13334_v52, %v1131_v43 }
 0x246   : > { %1408 = vrot.lane.b32.xlu1 %v15560_v21, %s15033_s14 }
 0x248   : > { %1639 = vrot.lane.b32.xlu0 %v15564_v47, %s15033_s14  ;;  %v13907_v51 = vpop.f32.mrb[8].mxu0 }
 0x249   : > { %v1144_v53 = vpop.f32.mrb[9].mxu0  ;;  %v15580_v61 = vadd.f32 %v13907_v51, %v13334_v52 }
 0x24a   : > { %v15572_v54 = vadd.f32 %v13334_v52, %v1144_v53  ;;  %1562 = vrot.lane.b32.xlu1 %v15568_v48, %s15033_s14  ;;  %v13908_v55 = vpop.f32.mrb[10].mxu0 }
 0x24b   : > { %v1147_v41 = vpop.f32.mrb[11].mxu0  ;;  %v15592_v32 = vadd.f32 %v13908_v55, %v13334_v52 }
 0x24c   : > { %1793 = vrot.lane.b32.xlu0 %v15572_v54, %s15033_s14  ;;  %v15584_v31 = vadd.f32 %v13334_v52, %v1147_v41 }
 0x24e   : > { %1716 = vrot.lane.b32.xlu1 %v15576_v59, %s15033_s14 }
 0x250   : > { %1947 = vrot.lane.b32.xlu0 %v15580_v61, %s15033_s14  ;;  %v13911_v57 = vpop.f32.mrb[12].mxu0 }
 0x251   : > { %v1160_v62 = vpop.f32.mrb[13].mxu0  ;;  %v15596_v7 = vadd.f32 %v13911_v57, %v13334_v52 }
 0x252   : > { %v15588_v63 = vadd.f32 %v13334_v52, %v1160_v62  ;;  %1870 = vrot.lane.b32.xlu1 %v15584_v31, %s15033_s14  ;;  %v13912_v3 = vpop.f32.mrb[14].mxu0 }
 0x253   : > { %v1163_v45 = vpop.f32.mrb[15].mxu0  ;;  %v15606_v1 = vadd.f32 %v13912_v3, %v13334_v52 }
 0x254   : > { %2101 = vrot.lane.b32.xlu0 %v15588_v63, %s15033_s14  ;;  %v15600_v44 = vadd.f32 %v13334_v52, %v1163_v45 }
 0x256   : > { %2024 = vrot.lane.b32.xlu1 %v15592_v32, %s15033_s14 }
 0x258   : > { %2255 = vrot.lane.b32.xlu0 %v15596_v7, %s15033_s14 }
 0x25a   : > { %2178 = vrot.lane.b32.xlu1 %v15600_v44, %s15033_s14 }
 0x25c   : > { %2616 = vrot.lane.b32.xlu0 %v15546_v11, %s15034_s25 }
 0x25e   : > { %2332 = vrot.lane.b32.xlu1 %v15606_v1, %s15033_s14  ;;  %s15045_s14 = smov 16  }
 0x260   : > { %2768 = vrot.lane.b32.xlu0 %v15554_v34, %s15034_s25 }
 0x262   : > { %2692 = vrot.lane.b32.xlu1 %v15548_v33, %s15034_s25 }
 0x264   : > { %3072 = vrot.lane.b32.xlu0 %v15564_v47, %s15034_s25 }
 0x266   : > { %2844 = vrot.lane.b32.xlu1 %v15560_v21, %s15034_s25 }
 0x268   : > { %3224 = vrot.lane.b32.xlu0 %v15572_v54, %s15034_s25 }
 0x26a   : > { %2920 = vrot.lane.b32.xlu1 %v15556_v39, %s15034_s25 }
 0x26c   : > { %3376 = vrot.lane.b32.xlu0 %v15580_v61, %s15034_s25 }
 0x26e   : > { %2996 = vrot.lane.b32.xlu1 %v15568_v48, %s15034_s25 }
 0x270   : > { %3528 = vrot.lane.b32.xlu0 %v15588_v63, %s15034_s25 }
 0x272   : > { %3148 = vrot.lane.b32.xlu1 %v15576_v59, %s15034_s25 }
 0x274   : > { %3680 = vrot.lane.b32.xlu0 %v15596_v7, %s15034_s25 }
 0x276   : > { %3300 = vrot.lane.b32.xlu1 %v15584_v31, %s15034_s25 }
 0x278   : > { %3850 = vrot.lane.b32.xlu0 %v15546_v11, %s15035_s28 }
 0x27a   : > { %3452 = vrot.lane.b32.xlu1 %v15592_v32, %s15034_s25 }
 0x27c   : > { %3848 = vrot.lane.b32.xlu0 %v15546_v11, %s15036_s21 }
 0x27e   : > { %3756 = vrot.lane.b32.xlu1 %v15606_v1, %s15034_s25 }
 0x280   : > { %4006 = vrot.lane.b32.xlu0 %v15554_v34, %s15035_s28 }
 0x282   : > { %3928 = vrot.lane.b32.xlu1 %v15548_v33, %s15035_s28 }
 0x284   : > { %4004 = vrot.lane.b32.xlu0 %v15554_v34, %s15036_s21 }
 0x286   : > { %3926 = vrot.lane.b32.xlu1 %v15548_v33, %s15036_s21 }
 0x28a   : > { %4084 = vrot.lane.b32.xlu1 %v15560_v21, %s15035_s28 }
 0x28e   : > { %4082 = vrot.lane.b32.xlu1 %v15560_v21, %s15036_s21 }
 0x292   : > { %3604 = vrot.lane.b32.xlu1 %v15600_v44, %s15034_s25  ;;  %s18428_s25 = sld [smem:[#allocation8_spill]] }
 0x2ae   : > { %v1177_v8 = vpop.permute.xlu0 %1176 }
 0x2af   : > { %13914 = vmatpush3.xpose.msk.msra.mxu1 %vm1178_vm5, %v1177_v8 }
 0x2b0   : > { %v1255_v9 = vpop.permute.xlu1 %1254  ;;  %13918 = vmatprep.subr.mxu1 %v18309_v4 }
 0x2b2   : > { %13916 = vmatmul.mubr.msk.f32.vlgmr.msra.gmra.mrb[0].mxu1 %vm1178_vm5, %v15546_v11 }
 0x2b3   : > { %13919 = vmatpush3.xpose.msk.msra.mxu1 %vm1178_vm5, %v1255_v9  ;;  %13920 = vmatprep.mubr.msk.f32.mxu1 %vm15032_vm4, %v18309_v4 }
 0x2b4   : > { %v1332_v10 = vpop.permute.xlu1 %1331  ;;  %13923 = vmatprep.subr.mxu1 %v18309_v4 }
 0x2b6   : > { %13921 = vmatmul.mubr.msk.f32.vlgmr.msra.gmra.mrb[2].mxu1 %vm1178_vm5, %v15548_v33  ;;  %v1486_v14 = vpop.permute.xlu0 %1485 }
 0x2b7   : > { %13924 = vmatpush3.xpose.msk.msra.mxu1 %vm1178_vm5, %v1332_v10  ;;  %13925 = vmatprep.mubr.msk.f32.mxu1 %vm15032_vm4, %v18309_v4 }
 0x2b8   : > { %v1409_v38 = vpop.permute.xlu1 %1408  ;;  %13928 = vmatprep.subr.mxu1 %v18309_v4 }
 0x2ba   : > { %13926 = vmatmul.mubr.msk.f32.vlgmr.msra.gmra.mrb[4].mxu1 %vm1178_vm5, %v15554_v34  ;;  %v1640_v15 = vpop.permute.xlu0 %1639 }
 0x2bb   : > { %13929 = vmatpush3.xpose.msk.msra.mxu1 %vm1178_vm5, %v1409_v38  ;;  %13930 = vmatprep.mubr.msk.f32.mxu1 %vm15032_vm4, %v18309_v4 }
 0x2bc   : > { %v1563_v56 = vpop.permute.xlu1 %1562  ;;  %13933 = vmatprep.subr.mxu1 %v18309_v4 }
 0x2be   : > { %13931 = vmatmul.mubr.msk.f32.vlgmr.msra.gmra.mrb[6].mxu1 %vm1178_vm5, %v15560_v21  ;;  %v1794_v42 = vpop.permute.xlu0 %1793 }
 0x2bf   : > { %13934 = vmatpush3.xpose.msk.msra.mxu1 %vm1178_vm5, %v1486_v14  ;;  %13935 = vmatprep.mubr.msk.f32.mxu1 %vm15032_vm4, %v18309_v4 }
 0x2c0   : > { %v1717_v16 = vpop.permute.xlu1 %1716  ;;  %13938 = vmatprep.subr.mxu1 %v18309_v4 }
 0x2c2   : > { %13936 = vmatmul.mubr.msk.f32.vlgmr.msra.gmra.mrb[8].mxu1 %vm1178_vm5, %v15556_v39  ;;  %v1948_v46 = vpop.permute.xlu0 %1947 }
 0x2c3   : > { %13939 = vmatpush3.xpose.msk.msra.mxu1 %vm1178_vm5, %v1563_v56  ;;  %13940 = vmatprep.mubr.msk.f32.mxu1 %vm15032_vm4, %v18309_v4 }
 0x2c4   : > { %v1871_v17 = vpop.permute.xlu1 %1870  ;;  %13943 = vmatprep.subr.mxu1 %v18309_v4 }
 0x2c5   : > { %13959 = vmatpush3.xpose.msk.msra.mxu0 %vm1178_vm5, %v1871_v17 }
 0x2c6   : > { %13941 = vmatmul.mubr.msk.f32.vlgmr.msra.gmra.mrb[10].mxu1 %vm1178_vm5, %v15568_v48  ;;  %13968 = vmatprep.subr.mxu0 %v18309_v4  ;;  %v2102_v52 = vpop.permute.xlu0 %2101 }
 0x2c7   : > { %13944 = vmatpush3.xpose.msk.msra.mxu1 %vm1178_vm5, %v1640_v15  ;;  %13945 = vmatprep.mubr.msk.f32.mxu1 %vm15032_vm4, %v18309_v4 }
 0x2c8   : > { %v2025_v20 = vpop.permute.xlu1 %2024  ;;  %13961 = vmatmul.mubr.msk.f32.vlgmr.msra.gmra.mrb[16].mxu0 %vm1178_vm5, %v15584_v31  ;;  %13948 = vmatprep.subr.mxu1 %v18309_v4 }
 0x2c9   : > { %13969 = vmatpush3.xpose.msk.msra.mxu0 %vm1178_vm5, %v2025_v20  ;;  %13970 = vmatprep.mubr.msk.f32.mxu0 %vm15032_vm4, %v18309_v4 }
 0x2ca   : > { %13946 = vmatmul.mubr.msk.f32.vlgmr.msra.gmra.mrb[12].mxu1 %vm1178_vm5, %v15564_v47  ;;  %13978 = vmatprep.subr.mxu0 %v18309_v4  ;;  %v2256_v28 = vpop.permute.xlu0 %2255 }
 0x2cb   : > { %13949 = vmatpush3.xpose.msk.msra.mxu1 %vm1178_vm5, %v1717_v16  ;;  %13950 = vmatprep.mubr.msk.f32.mxu1 %vm15032_vm4, %v18309_v4 }
 0x2cc   : > { %13971 = vmatmul.mubr.msk.f32.vlgmr.msra.gmra.mrb[18].mxu0 %vm1178_vm5, %v15592_v32  ;;  %v2179_v23 = vpop.permute.xlu1 %2178  ;;  %13953 = vmatprep.subr.mxu1 %v18309_v4 }
 0x2cd   : > { %13979 = vmatpush3.xpose.msk.msra.mxu0 %vm1178_vm5, %v2179_v23  ;;  %13980 = vmatprep.mubr.msk.f32.mxu0 %vm15032_vm4, %v18309_v4 }
 0x2ce   : > { %13951 = vmatmul.mubr.msk.f32.vlgmr.msra.gmra.mrb[14].mxu1 %vm1178_vm5, %v15576_v59  ;;  %13988 = vmatprep.subr.mxu0 %v18309_v4  ;;  %v2617_v29 = vpop.permute.xlu0 %2616 }
 0x2cf   : > { %13954 = vmatpush3.xpose.msk.msra.mxu1 %vm1178_vm5, %v1794_v42  ;;  %13955 = vmatprep.mubr.msk.f32.mxu1 %vm15032_vm4, %v18309_v4 }
 0x2d0   : > { %13981 = vmatmul.mubr.msk.f32.vlgmr.msra.gmra.mrb[20].mxu0 %vm1178_vm5, %v15600_v44  ;;  %v2333_v27 = vpop.permute.xlu1 %2332  ;;  %13963 = vmatprep.subr.mxu1 %v18309_v4 }
 0x2d1   : > { %13989 = vmatpush3.xpose.msk.msra.mxu0 %vm1178_vm5, %v2333_v27  ;;  %13990 = vmatprep.mubr.msk.f32.mxu0 %vm15032_vm4, %v18309_v4 }
 0x2d2   : > { %13956 = vmatmul.mubr.msk.f32.vlgmr.msra.gmra.mrb[16].mxu1 %vm1178_vm5, %v15572_v54  ;;  %13998 = vmatprep.subr.mxu0 %v18309_v4 }
 0x2d3   : > { %13964 = vmatpush3.xpose.msk.msra.mxu1 %vm1178_vm5, %v1948_v46  ;;  %13965 = vmatprep.mubr.msk.f32.mxu1 %vm15032_vm4, %v18309_v4 }
 0x2d4   : > { %13991 = vmatmul.mubr.msk.f32.vlgmr.msra.gmra.mrb[22].mxu0 %vm1178_vm5, %v15606_v1  ;;  %v2693_v0 = vpop.permute.xlu1 %2692  ;;  %13973 = vmatprep.subr.mxu1 %v18309_v4 }
 0x2d5   : > { %13999 = vmatpush3.msra.mxu0 %v2693_v0  ;;  %14000 = vmatprep.mubr.msk.f32.mxu0 %vm15032_vm4, %v18309_v4 }
 0x2d6   : > { %13966 = vmatmul.mubr.msk.f32.vlgmr.msra.gmra.mrb[18].mxu1 %vm1178_vm5, %v15580_v61  ;;  %14008 = vmatprep.subr.mxu0 %v18309_v4 }
 0x2d7   : > { %13974 = vmatpush3.xpose.msk.msra.mxu1 %vm1178_vm5, %v2102_v52  ;;  %13975 = vmatprep.mubr.msk.f32.mxu1 %vm15032_vm4, %v18309_v4 }
 0x2d8   : > { %13983 = vmatprep.subr.mxu1 %v18309_v4 }
 0x2da   : > { %13976 = vmatmul.mubr.msk.f32.vlgmr.msra.gmra.mrb[20].mxu1 %vm1178_vm5, %v15588_v63 }
 0x2db   : > { %13984 = vmatpush3.xpose.msk.msra.mxu1 %vm1178_vm5, %v2256_v28  ;;  %13985 = vmatprep.mubr.msk.f32.mxu1 %vm15032_vm4, %v18309_v4 }
 0x2dc   : > { %13993 = vmatprep.subr.mxu1 %v18309_v4 }
 0x2de   : > { %13986 = vmatmul.mubr.msk.f32.vlgmr.msra.gmra.mrb[22].mxu1 %vm1178_vm5, %v15596_v7 }
 0x2df   : > { %13994 = vmatpush3.msra.mxu1 %v2617_v29  ;;  %13995 = vmatprep.mubr.msk.f32.mxu1 %vm15032_vm4, %v18309_v4 }
 0x2e0   : > { %14003 = vmatprep.subr.mxu1 %v18309_v4 }
 0x385   : > { %v1249_v30 = vpop.f32.mrb[0].mxu1 }
 0x386   : > { %v2408_v36 = vmul.f32 0.35355338, %v1249_v30  ;;  %v13917_v40 = vpop.f32.mrb[1].mxu1 }
 0x388   : > { %v15743_v43 = vadd.f32 %v2408_v36, %v15740_v35 }
 0x389   : > { %v1326_v51 = vpop.f32.mrb[2].mxu1 }
 0x38a   : > { %v2409_v53 = vmul.f32 0.35355338, %v1326_v51  ;;  %v13922_v55 = vpop.f32.mrb[3].mxu1  ;;  %v2440_v41 = vsel %vm1178_vm5, %v15743_v43, -inf }
 0x38b   : > { %2441 = vmax.xlane.f32.xlu0 %v2440_v41 }
 0x38c   : > { %v15748_v57 = vadd.f32 %v2409_v53, %v15740_v35 }
 0x38d   : > { %v1403_v62 = vpop.f32.mrb[4].mxu1 }
 0x38e   : > { %v2410_v3 = vmul.f32 0.35355338, %v1403_v62  ;;  %v13927_v45 = vpop.f32.mrb[5].mxu1  ;;  %v2443_v8 = vsel %vm1178_vm5, %v15748_v57, -inf }
 0x38f   : > { %2444 = vmax.xlane.f32.xlu1 %v2443_v8 }
 0x390   : > { %v15753_v9 = vadd.f32 %v2410_v3, %v15740_v35 }
 0x391   : > { %v1480_v10 = vpop.f32.mrb[6].mxu1 }
 0x392   : > { %v2411_v38 = vmul.f32 0.35355338, %v1480_v10  ;;  %v13932_v14 = vpop.f32.mrb[7].mxu1  ;;  %v2446_v56 = vsel %vm1178_vm5, %v15753_v9, -inf }
 0x393   : > { %2447 = vmax.xlane.f32.xlu0 %v2446_v56 }
 0x394   : > { %v15758_v15 = vadd.f32 %v2411_v38, %v15740_v35 }
 0x395   : > { %v1557_v16 = vpop.f32.mrb[8].mxu1 }
 0x396   : > { %v2412_v17 = vmul.f32 0.35355338, %v1557_v16  ;;  %v13937_v42 = vpop.f32.mrb[9].mxu1  ;;  %v2449_v20 = vsel %vm1178_vm5, %v15758_v15, -inf }
 0x397   : > { %2450 = vmax.xlane.f32.xlu0 %v2449_v20 }
 0x398   : > { %v15763_v46 = vadd.f32 %v2412_v17, %v15740_v35 }
 0x399   : > { %v1634_v23 = vpop.f32.mrb[10].mxu1 }
 0x39a   : > { %v13942_v27 = vpop.f32.mrb[11].mxu1  ;;  %v2452_v52 = vsel %vm1178_vm5, %v15763_v46, -inf  ;;  %v2413_v28 = vmul.f32 0.35355338, %v1634_v23 }
 0x39b   : > { %v1942_v0 = vpop.f32.mrb[16].mxu0  ;;  %2453 = vmax.xlane.f32.xlu0 %v2452_v52 }
 0x39c   : > { %v2417_v29 = vmul.f32 0.35355338, %v1942_v0  ;;  %v13962_v30 = vpop.f32.mrb[17].mxu0  ;;  %v15776_v8 = vadd.f32 %v2413_v28, %v15740_v35 }
 0x39d   : > { %v1711_v36 = vpop.f32.mrb[12].mxu1 }
 0x39e   : > { %v2414_v40 = vmul.f32 0.35355338, %v1711_v36  ;;  %v13947_v51 = vpop.f32.mrb[13].mxu1  ;;  %v15768_v53 = vadd.f32 %v2417_v29, %v15740_v35  ;;  %v2455_v42 = vsel %vm1178_vm5, %v15776_v8, -inf }
 0x39f   : > { %v2096_v55 = vpop.f32.mrb[18].mxu0 }
 0x3a0   : > { %v2419_v41 = vmul.f32 0.35355338, %v2096_v55  ;;  %v13972_v62 = vpop.f32.mrb[19].mxu0  ;;  %v2467_v3 = vsel %vm1178_vm5, %v15768_v53, -inf  ;;  %v15773_v45 = vadd.f32 %v2414_v40, %v15740_v35 }
 0x3a1   : > { %2468 = vmax.xlane.f32.xlu1 %v2467_v3  ;;  %v1788_v10 = vpop.f32.mrb[14].mxu1 }
 0x3a2   : > { %v13952_v38 = vpop.f32.mrb[15].mxu1  ;;  %v2458_v14 = vsel %vm1178_vm5, %v15773_v45, -inf  ;;  %v15783_v20 = vadd.f32 %v2419_v41, %v15740_v35  ;;  %v2415_v28 = vmul.f32 0.35355338, %v1788_v10 }
 0x3a3   : > { %v2250_v56 = vpop.f32.mrb[20].mxu0  ;;  %2459 = vmax.xlane.f32.xlu0 %v2458_v14 }
 0x3a4   : > { %v2421_v16 = vmul.f32 0.35355338, %v2250_v56  ;;  %v13982_v17 = vpop.f32.mrb[21].mxu0  ;;  %v2473_v30 = vsel %vm1178_vm5, %v15783_v20, -inf  ;;  %v15801_v14 = vadd.f32 %v2415_v28, %v15740_v35 }
 0x3a5   : > { %2456 = vmax.xlane.f32.xlu1 %v2455_v42  ;;  %v1865_v23 = vpop.f32.mrb[16].mxu1 }
 0x3a6   : > { %v2416_v27 = vmul.f32 0.35355338, %v1865_v23  ;;  %v13957_v52 = vpop.f32.mrb[17].mxu1  ;;  %v15791_v40 = vadd.f32 %v2421_v16, %v15740_v35  ;;  %v2461_v23 = vsel %vm1178_vm5, %v15801_v14, -inf }
 0x3a7   : > { %v2404_v0 = vpop.f32.mrb[22].mxu0 }
 0x3a8   : > { %v13992_v29 = vpop.f32.mrb[23].mxu0  ;;  %v15788_v36 = vadd.f32 %v2416_v27, %v15740_v35  ;;  %v2423_v3 = vmul.f32 0.35355338, %v2404_v0  ;;  %v2479_v10 = vsel %vm1178_vm5, %v15791_v40, -inf }
 0x3a9   : > { %2474 = vmax.xlane.f32.xlu1 %v2473_v30  ;;  %v2019_v51 = vpop.f32.mrb[18].mxu1 }
 0x3aa   : > { %v2418_v55 = vmul.f32 0.35355338, %v2019_v51  ;;  %v13967_v41 = vpop.f32.mrb[19].mxu1  ;;  %v2464_v62 = vsel %vm1178_vm5, %v15788_v36, -inf  ;;  %v15811_v52 = vadd.f32 %v2423_v3, %v15740_v35  ;;  %v15834_v3 = vpop.permute.xlu0 %2768 }
 0x3ab   : > { %2465 = vmax.xlane.f32.xlu0 %v2464_v62  ;;  %v15830_v62 = vpop.permute.xlu1 %2844 }
 0x3ac   : > { %v15798_v38 = vadd.f32 %v2418_v55, %v15740_v35  ;;  %v2485_v51 = vsel %vm1178_vm5, %v15811_v52, -inf }
 0x3ad   : > { %2480 = vmax.xlane.f32.xlu1 %v2479_v10  ;;  %v2173_v56 = vpop.f32.mrb[20].mxu1 }
 0x3ae   : > { %v2420_v16 = vmul.f32 0.35355338, %v2173_v56  ;;  %v13977_v17 = vpop.f32.mrb[21].mxu1  ;;  %v2470_v42 = vsel %vm1178_vm5, %v15798_v38, -inf  ;;  %v15838_v56 = vpop.permute.xlu0 %3072 }
 0x3af   : > { %2471 = vmax.xlane.f32.xlu0 %v2470_v42 }
 0x3b0   : > { %v15808_v27 = vadd.f32 %v2420_v16, %v15740_v35 }
 0x3b1   : > { %2462 = vmax.xlane.f32.xlu1 %v2461_v23  ;;  %v2327_v0 = vpop.f32.mrb[22].mxu1 }
 0x3b2   : > { %v2422_v28 = vmul.f32 0.35355338, %v2327_v0  ;;  %v13987_v29 = vpop.f32.mrb[23].mxu1  ;;  %v2476_v30 = vsel %vm1178_vm5, %v15808_v27, -inf  ;;  %v15842_v17 = vpop.permute.xlu0 %3224 }
 0x3b3   : > { %2477 = vmax.xlane.f32.xlu0 %v2476_v30 }
 0x3b4   : > { %v15818_v55 = vadd.f32 %v2422_v28, %v15740_v35  ;;  %v15832_v35 = vpop.permute.xlu1 %2920 }
 0x3b5   : > { %2486 = vmax.xlane.f32.xlu1 %v2485_v51 }
 0x3b6   : > { %v2482_v41 = vsel %vm1178_vm5, %v15818_v55, -inf  ;;  %v15846_v23 = vpop.permute.xlu0 %3376 }
 0x3b7   : > { %2483 = vmax.xlane.f32.xlu0 %v2482_v41 }
 0x3b8   : > { %v15836_v10 = vpop.permute.xlu1 %2996 }
 0x3ba   : > { %v15850_v28 = vpop.permute.xlu0 %3528 }
 0x3bc   : > { %v15840_v16 = vpop.permute.xlu1 %3148 }
 0x3be   : > { %v15854_v30 = vpop.permute.xlu0 %3680 }
 0x3c0   : > { %v15844_v42 = vpop.permute.xlu1 %3300 }
 0x3c2   : > { %v15858_v41 = vpop.permute.xlu0 %3850 }
 0x3c3   : > { %18357 = vst [vmem:[#allocation25_spill] sm:$0xff] %v15858_v41 }
 0x3c4   : > { %v15848_v0 = vpop.permute.xlu1 %3452 }
 0x3c6   : > { %4240 = vrot.lane.b32.xlu1 %v15568_v48, %s15035_s28  ;;  %v15862_v2 = vpop.permute.xlu0 %3848 }
 0x3c7   : > { %18358 = vst [vmem:[#allocation26_spill] sm:$0xff] %v15862_v2 }
 0x3c8   : > { %v15852_v29 = vpop.permute.xlu1 %3756 }
 0x3ca   : > { %4238 = vrot.lane.b32.xlu1 %v15568_v48, %s15036_s21  ;;  %v15866_v24 = vpop.permute.xlu0 %4006 }
 0x3cb   : > { %18359 = vst [vmem:[#allocation27_spill] sm:$0xff] %v15866_v24 }
 0x3cc   : > { %v15856_v51 = vpop.permute.xlu1 %3928 }
 0x3cd   : > { %4162 = vrot.lane.b32.xlu0 %v15556_v39, %s15035_s28 }
 0x3ce   : > { %v15870_v13 = vpop.permute.xlu0 %4004 }
 0x3cf   : > { %18360 = vst [vmem:[#allocation28_spill] sm:$0xff] %v15870_v13 }
 0x3d0   : > { %v15860_v4 = vpop.permute.xlu1 %3926 }
 0x3d1   : > { %4160 = vrot.lane.b32.xlu0 %v15556_v39, %s15036_s21 }
 0x3d4   : > { %v15864_v19 = vpop.permute.xlu1 %4084 }
 0x3d8   : > { %v15868_v18 = vpop.permute.xlu1 %4082 }
 0x3dc   : > { %v15872_v58 = vpop.permute.xlu1 %3604 }
 0x418   : > { %v2442_v6 = vpop.xlane.xlu0 %2441 }
 0x419   : > { %v2488_v5 = vsub.f32 %v15743_v43, %v2442_v6 }
 0x41b   : > { %v2504_v60 = vmul.f32 1.442695, %v2488_v5 }
 0x41c   : > { %v2445_v22 = vpop.xlane.xlu1 %2444 }
 0x41d   : > { %14709 = vpow2.f32 %v2504_v60  ;;  %v2489_v37 = vsub.f32 %v15748_v57, %v2445_v22 }
 0x41f   : > { %v2506_v12 = vmul.f32 1.442695, %v2489_v37 }
 0x420   : > { %v2448_v26 = vpop.xlane.xlu0 %2447 }
 0x421   : > { %14711 = vpow2.f32 %v2506_v12  ;;  %v2490_v50 = vsub.f32 %v15753_v9, %v2448_v26 }
 0x423   : > { %v2508_v25 = vmul.f32 1.442695, %v2490_v50 }
 0x424   : > { %v2451_v49 = vpop.xlane.xlu0 %2450 }
 0x425   : > { %14713 = vpow2.f32 %v2508_v25  ;;  %v2491_v13 = vsub.f32 %v15758_v15, %v2451_v49 }
 0x427   : > { %v15878_v24 = vpop.eup %14709  ;;  %v2510_v2 = vmul.f32 1.442695, %v2491_v13 }
 0x428   : > { %v2454_v41 = vpop.xlane.xlu0 %2453  ;;  %v2536_v5 = vsel %vm1178_vm5, %v15878_v24, 0.0 }
 0x429   : > { %14715 = vpow2.f32 %v2510_v2  ;;  %v2492_v60 = vsub.f32 %v15763_v46, %v2454_v41  ;;  %2537 = vadd.xlane.f32.xlu0 %v2536_v5 }
 0x42b   : > { %v15883_v37 = vpop.eup %14711  ;;  %v2512_v12 = vmul.f32 1.442695, %v2492_v60 }
 0x42c   : > { %v2539_v50 = vsel %vm1178_vm5, %v15883_v37, 0.0 }
 0x42d   : > { %14717 = vpow2.f32 %v2512_v12  ;;  %2540 = vadd.xlane.f32.xlu1 %v2539_v50 }
 0x42e   : > { %v2469_v49 = vpop.xlane.xlu1 %2468 }
 0x42f   : > { %v15887_v25 = vpop.eup %14713  ;;  %v2497_v26 = vsub.f32 %v15768_v53, %v2469_v49 }
 0x430   : > { %v2460_v22 = vpop.xlane.xlu0 %2459  ;;  %v2542_v6 = vsel %vm1178_vm5, %v15887_v25, 0.0 }
 0x431   : > { %v2522_v13 = vmul.f32 1.442695, %v2497_v26  ;;  %v2494_v2 = vsub.f32 %v15773_v45, %v2460_v22  ;;  %2543 = vadd.xlane.f32.xlu0 %v2542_v6 }
 0x432   : > { %v2457_v43 = vpop.xlane.xlu1 %2456 }
 0x433   : > { %v15893_v57 = vpop.eup %14715  ;;  %14719 = vpow2.f32 %v2522_v13  ;;  %v2516_v9 = vmul.f32 1.442695, %v2494_v2  ;;  %v2493_v15 = vsub.f32 %v15776_v8, %v2457_v43 }
 0x434   : > { %v2545_v46 = vsel %vm1178_vm5, %v15893_v57, 0.0 }
 0x435   : > { %14721 = vpow2.f32 %v2516_v9  ;;  %v2514_v53 = vmul.f32 1.442695, %v2493_v15  ;;  %2546 = vadd.xlane.f32.xlu1 %v2545_v46 }
 0x436   : > { %v2475_v41 = vpop.xlane.xlu1 %2474 }
 0x437   : > { %v15898_v5 = vpop.eup %14717  ;;  %14723 = vpow2.f32 %v2514_v53  ;;  %v2499_v45 = vsub.f32 %v15783_v20, %v2475_v41 }
 0x438   : > { %v2548_v60 = vsel %vm1178_vm5, %v15898_v5, 0.0  ;;  %v2466_v50 = vpop.xlane.xlu0 %2465 }
 0x439   : > { %v2526_v12 = vmul.f32 1.442695, %v2499_v45  ;;  %2549 = vadd.xlane.f32.xlu0 %v2548_v60 }
 0x43a   : > { %v2481_v49 = vpop.xlane.xlu1 %2480 }
 0x43b   : > { %14725 = vpow2.f32 %v2526_v12  ;;  %v2501_v8 = vsub.f32 %v15791_v40, %v2481_v49  ;;  %v2496_v40 = vsub.f32 %v15788_v36, %v2466_v50 }
 0x43c   : > { %v2472_v43 = vpop.xlane.xlu0 %2471 }
 0x43d   : > { %v15904_v26 = vpop.eup %14719  ;;  %v2530_v22 = vmul.f32 1.442695, %v2501_v8  ;;  %v2520_v60 = vmul.f32 1.442695, %v2496_v40  ;;  %v2498_v12 = vsub.f32 %v15798_v38, %v2472_v43 }
 0x43e   : > { %v2463_v6 = vpop.xlane.xlu1 %2462  ;;  %v2563_v13 = vsel %vm1178_vm5, %v15904_v26, 0.0 }
 0x43f   : > { %v15908_v2 = vpop.eup %14721  ;;  %14727 = vpow2.f32 %v2530_v22  ;;  %v2495_v20 = vsub.f32 %v15801_v14, %v2463_v6  ;;  %2564 = vadd.xlane.f32.xlu1 %v2563_v13  ;;  %v2524_v22 = vmul.f32 1.442695, %v2498_v12 }
 0x440   : > { %v2554_v9 = vsel %vm1178_vm5, %v15908_v2, 0.0  ;;  %v2478_v8 = vpop.xlane.xlu0 %2477 }
 0x441   : > { %v15913_v15 = vpop.eup %14723  ;;  %v2518_v46 = vmul.f32 1.442695, %v2495_v20  ;;  %2555 = vadd.xlane.f32.xlu0 %v2554_v9  ;;  %v2500_v6 = vsub.f32 %v15808_v27, %v2478_v8 }
 0x442   : > { %v2487_v53 = vpop.xlane.xlu1 %2486  ;;  %v2551_v41 = vsel %vm1178_vm5, %v15913_v15, 0.0 }
 0x443   : > { %14729 = vpow2.f32 %v2518_v46  ;;  %v2503_v45 = vsub.f32 %v15811_v52, %v2487_v53  ;;  %2552 = vadd.xlane.f32.xlu1 %v2551_v41  ;;  %v2528_v38 = vmul.f32 1.442695, %v2500_v6 }
 0x445   : > { %v15919_v14 = vpop.eup %14725  ;;  %v2534_v49 = vmul.f32 1.442695, %v2503_v45 }
 0x446   : > { %v2569_v36 = vsel %vm1178_vm5, %v15919_v14, 0.0 }
 0x447   : > { %14731 = vpow2.f32 %v2534_v49  ;;  %2570 = vadd.xlane.f32.xlu1 %v2569_v36 }
 0x448   : > { %14733 = vpow2.f32 %v2520_v60  ;;  %v2484_v60 = vpop.xlane.xlu0 %2483 }
 0x449   : > { %v15924_v50 = vpop.eup %14727  ;;  %14735 = vpow2.f32 %v2524_v22  ;;  %v2502_v12 = vsub.f32 %v15818_v55, %v2484_v60  ;;  %v16002_v22 = vpop.permute.xlu1 %4240 }
 0x44a   : > { %v2575_v52 = vsel %vm1178_vm5, %v15924_v50, 0.0  ;;  %14737 = vpow2.f32 %v2528_v38 }
 0x44b   : > { %2576 = vadd.xlane.f32.xlu1 %v2575_v52  ;;  %v2532_v49 = vmul.f32 1.442695, %v2502_v12 }
 0x44c   : > { %v15996_v36 = vpop.permute.xlu0 %4162 }
 0x44d   : > { %v15929_v13 = vpop.eup %14729  ;;  %14739 = vpow2.f32 %v2532_v49  ;;  %v16014_v52 = vpop.permute.xlu1 %4238 }
 0x44e   : > { %v2557_v20 = vsel %vm1178_vm5, %v15929_v13, 0.0 }
 0x44f   : > { %2558 = vadd.xlane.f32.xlu1 %v2557_v20 }
 0x450   : > { %v16008_v6 = vpop.permute.xlu0 %4160 }
 0x451   : > { %v15933_v43 = vpop.eup %14731 }
 0x452   : > { %v2581_v9 = vsel %vm1178_vm5, %v15933_v43, 0.0  ;;  %v15937_v40 = vpop.eup %14733 }
 0x453   : > { %2582 = vadd.xlane.f32.xlu0 %v2581_v9  ;;  %v2560_v27 = vsel %vm1178_vm5, %v15937_v40, 0.0  ;;  %v15941_v46 = vpop.eup %14735 }
 0x454   : > { %v2566_v53 = vsel %vm1178_vm5, %v15941_v46, 0.0  ;;  %v15945_v41 = vpop.eup %14737 }
 0x455   : > { %v2572_v45 = vsel %vm1178_vm5, %v15945_v41, 0.0 }
 0x457   : > { %2561 = vadd.xlane.f32.xlu0 %v2560_v27  ;;  %v15962_v8 = vpop.eup %14739 }
 0x458   : > { %v2578_v55 = vsel %vm1178_vm5, %v15962_v8, 0.0 }
 0x45b   : > { %2567 = vadd.xlane.f32.xlu0 %v2566_v53 }
 0x45f   : > { %2573 = vadd.xlane.f32.xlu0 %v2572_v45 }
 0x460   : > { %4396 = vrot.lane.b32.xlu1 %v15576_v59, %s15035_s28 }
 0x464   : > { %4394 = vrot.lane.b32.xlu1 %v15576_v59, %s15036_s21 }
 0x475   : > { %4318 = vrot.lane.b32.xlu0 %v15564_v47, %s15035_s28 }
 0x479   : > { %4316 = vrot.lane.b32.xlu0 %v15564_v47, %s15036_s21 }
 0x47d   : > { %4474 = vrot.lane.b32.xlu0 %v15572_v54, %s15035_s28 }
 0x481   : > { %4472 = vrot.lane.b32.xlu0 %v15572_v54, %s15036_s21 }
 0x485   : > { %4630 = vrot.lane.b32.xlu0 %v15580_v61, %s15035_s28 }
 0x488   : > { %2579 = vadd.xlane.f32.xlu1 %v2578_v55  ;;  %v18361_v55 = vmov 0.0  }
 0x489   : > { %4628 = vrot.lane.b32.xlu0 %v15580_v61, %s15036_s21 }
 0x48d   : > { %4786 = vrot.lane.b32.xlu0 %v15588_v63, %s15035_s28 }
 0x491   : > { %4784 = vrot.lane.b32.xlu0 %v15588_v63, %s15036_s21 }
 0x495   : > { %4942 = vrot.lane.b32.xlu0 %v15596_v7, %s15035_s28 }
 0x499   : > { %4940 = vrot.lane.b32.xlu0 %v15596_v7, %s15036_s21  ;;  %4552 = vrot.lane.b32.xlu1 %v15584_v31, %s15035_s28 }
 0x49d   : > { %5304 = vrot.lane.b32.xlu0 %v15546_v11, %s15037_s27  ;;  %4550 = vrot.lane.b32.xlu1 %v15584_v31, %s15036_s21 }
 0x4a1   : > { %5456 = vrot.lane.b32.xlu0 %v15554_v34, %s15037_s27  ;;  %4708 = vrot.lane.b32.xlu1 %v15592_v32, %s15035_s28 }
 0x4a5   : > { %5760 = vrot.lane.b32.xlu0 %v15564_v47, %s15037_s27  ;;  %4706 = vrot.lane.b32.xlu1 %v15592_v32, %s15036_s21 }
 0x4a9   : > { %5912 = vrot.lane.b32.xlu0 %v15572_v54, %s15037_s27  ;;  %4864 = vrot.lane.b32.xlu1 %v15600_v44, %s15035_s28 }
 0x4ad   : > { %6064 = vrot.lane.b32.xlu0 %v15580_v61, %s15037_s27  ;;  %4862 = vrot.lane.b32.xlu1 %v15600_v44, %s15036_s21 }
 0x4b1   : > { %6216 = vrot.lane.b32.xlu0 %v15588_v63, %s15037_s27  ;;  %5020 = vrot.lane.b32.xlu1 %v15606_v1, %s15035_s28  ;;  %s15046_s28 = smov 24  }
 0x4b5   : > { %6368 = vrot.lane.b32.xlu0 %v15596_v7, %s15037_s27  ;;  %5018 = vrot.lane.b32.xlu1 %v15606_v1, %s15036_s21 }
 0x4b6   : > { %v2538_v38 = vpop.xlane.xlu0 %2537 }
 0x4b7   : > { %14741 = vrcp.f32 %v2538_v38 }
 0x4b9   : > { %6603 = vrot.lane.b32.xlu0 %v15546_v11, %s15038_s16  ;;  %5380 = vrot.lane.b32.xlu1 %v15548_v33, %s15037_s27 }
 0x4ba   : > { %v2541_v20 = vpop.xlane.xlu1 %2540 }
 0x4bb   : > { %14743 = vrcp.f32 %v2541_v20 }
 0x4bd   : > { %6601 = vrot.lane.b32.xlu0 %v15546_v11, %s15039_s29  ;;  %5532 = vrot.lane.b32.xlu1 %v15560_v21, %s15037_s27 }
 0x4be   : > { %v2544_v9 = vpop.xlane.xlu0 %2543 }
 0x4bf   : > { %14745 = vrcp.f32 %v2544_v9 }
 0x4c1   : > { %v14742_v27 = vpop.eup %14741  ;;  %6759 = vrot.lane.b32.xlu0 %v15554_v34, %s15038_s16  ;;  %5608 = vrot.lane.b32.xlu1 %v15556_v39, %s15037_s27 }
 0x4c2   : > { %v2547_v53 = vpop.xlane.xlu1 %2546  ;;  %v2600_v45 = vmul.f32 %v14742_v27, %v15878_v24 }
 0x4c3   : > { %14747 = vrcp.f32 %v2547_v53 }
 0x4c4   : > { %13996 = vmatmul.mubr.msk.f32.vlgmr.msra.gmra.mrb[24].mxu1 %vm1178_vm5, %v2600_v45 }
 0x4c5   : > { %v14744_v60 = vpop.eup %14743  ;;  %14004 = vmatpush3.msra.mxu1 %v15834_v3  ;;  %6757 = vrot.lane.b32.xlu0 %v15554_v34, %s15039_s29 }
 0x4c6   : > { %5684 = vrot.lane.b32.xlu1 %v15568_v48, %s15037_s27  ;;  %v2550_v12 = vpop.xlane.xlu0 %2549  ;;  %v2601_v49 = vmul.f32 %v14744_v60, %v15883_v37  ;;  %14005 = vmatprep.mubr.msk.f32.mxu1 %vm15032_vm4, %v18361_v55 }
 0x4c7   : > { %14749 = vrcp.f32 %v2550_v12  ;;  %14013 = vmatprep.subr.mxu1 %v18361_v55 }
 0x4c8   : > { %14001 = vmatmul.mubr.msk.f32.vlgmr.msra.gmra.mrb[24].mxu0 %vm1178_vm5, %v2601_v49 }
 0x4c9   : > { %v14746_v24 = vpop.eup %14745  ;;  %14009 = vmatpush3.msra.mxu0 %v15830_v62  ;;  %14010 = vmatprep.mubr.msk.f32.mxu0 %vm15032_vm4, %v18361_v55 }
 0x4ca   : > { %5836 = vrot.lane.b32.xlu1 %v15576_v59, %s15037_s27  ;;  %v2602_v3 = vmul.f32 %v14746_v24, %v15887_v25  ;;  %14018 = vmatprep.subr.mxu0 %v18361_v55 }
 0x4cc   : > { %v2565_v37 = vpop.xlane.xlu1 %2564  ;;  %14006 = vmatmul.mubr.msk.f32.vlgmr.msra.gmra.mrb[26].mxu1 %vm1178_vm5, %v2602_v3 }
 0x4cd   : > { %v14748_v38 = vpop.eup %14747  ;;  %14014 = vmatpush3.msra.mxu1 %v15832_v35  ;;  %14015 = vmatprep.mubr.msk.f32.mxu1 %vm15032_vm4, %v18361_v55 }
 0x4ce   : > { %5988 = vrot.lane.b32.xlu1 %v15584_v31, %s15037_s27  ;;  %v2556_v62 = vpop.xlane.xlu0 %2555  ;;  %v2603_v20 = vmul.f32 %v14748_v38, %v15893_v57  ;;  %14023 = vmatprep.subr.mxu1 %v18361_v55 }
 0x4cf   : > { %14751 = vrcp.f32 %v2556_v62 }
 0x4d0   : > { %14011 = vmatmul.mubr.msk.f32.vlgmr.msra.gmra.mrb[26].mxu0 %vm1178_vm5, %v2603_v20  ;;  %v2553_v25 = vpop.xlane.xlu1 %2552  ;;  %v18362_v20 = vld [vmem:[#allocation25_spill] sm:$0xff] }
 0x4d1   : > { %v14750_v9 = vpop.eup %14749  ;;  %14019 = vmatpush3.msra.mxu0 %v15836_v10  ;;  %14753 = vrcp.f32 %v2553_v25  ;;  %14020 = vmatprep.mubr.msk.f32.mxu0 %vm15032_vm4, %v18361_v55 }
 0x4d2   : > { %6140 = vrot.lane.b32.xlu1 %v15592_v32, %s15037_s27  ;;  %v2604_v35 = vmul.f32 %v14750_v9, %v15898_v5  ;;  %14028 = vmatprep.subr.mxu0 %v18361_v55 }
 0x4d4   : > { %v2571_v57 = vpop.xlane.xlu1 %2570  ;;  %14016 = vmatmul.mubr.msk.f32.vlgmr.msra.gmra.mrb[28].mxu1 %vm1178_vm5, %v2604_v35  ;;  %v18363_v35 = vld [vmem:[#allocation26_spill] sm:$0xff] }
 0x4d5   : > { %14024 = vmatpush3.msra.mxu1 %v15838_v56  ;;  %14025 = vmatprep.mubr.msk.f32.mxu1 %vm15032_vm4, %v18361_v55 }
 0x4d6   : > { %6292 = vrot.lane.b32.xlu1 %v15600_v44, %s15037_s27  ;;  %14033 = vmatprep.subr.mxu1 %v18361_v55 }
 0x4d8   : > { %v2577_v10 = vpop.xlane.xlu1 %2576 }
 0x4d9   : > { %v14752_v27 = vpop.eup %14751 }
 0x4da   : > { %6444 = vrot.lane.b32.xlu1 %v15606_v1, %s15037_s27  ;;  %v2606_v5 = vmul.f32 %v14752_v27, %v15908_v2  ;;  %v18365_v27 = vld [vmem:[#allocation28_spill] sm:$0xff] }
 0x4db   : > { %v14754_v53 = vpop.eup %14753 }
 0x4dc   : > { %v2559_v45 = vpop.xlane.xlu1 %2558  ;;  %14026 = vmatmul.mubr.msk.f32.vlgmr.msra.gmra.mrb[30].mxu1 %vm1178_vm5, %v2606_v5  ;;  %v2605_v56 = vmul.f32 %v14754_v53, %v15913_v15 }
 0x4dd   : > { %14755 = vrcp.f32 %v2559_v45  ;;  %14034 = vmatpush3.msra.mxu1 %v15842_v17  ;;  %14035 = vmatprep.mubr.msk.f32.mxu1 %vm15032_vm4, %v18361_v55 }
 0x4de   : > { %6681 = vrot.lane.b32.xlu1 %v15548_v33, %s15038_s16  ;;  %14021 = vmatmul.mubr.msk.f32.vlgmr.msra.gmra.mrb[28].mxu0 %vm1178_vm5, %v2605_v56  ;;  %14757 = vrcp.f32 %v2565_v37 }
 0x4df   : > { %14029 = vmatpush3.msra.mxu0 %v15840_v16  ;;  %14030 = vmatprep.mubr.msk.f32.mxu0 %vm15032_vm4, %v18361_v55  ;;  %14759 = vrcp.f32 %v2571_v57 }
 0x4e0   : > { %v2583_v2 = vpop.xlane.xlu0 %2582  ;;  %14038 = vmatprep.subr.mxu0 %v18361_v55  ;;  %14043 = vmatprep.subr.mxu1 %v18361_v55 }
 0x4e2   : > { %6679 = vrot.lane.b32.xlu1 %v15548_v33, %s15039_s29 }
 0x4e4   : > { %v2562_v17 = vpop.xlane.xlu0 %2561 }
 0x4e5   : > { %14761 = vrcp.f32 %v2562_v17 }
 0x4e6   : > { %6837 = vrot.lane.b32.xlu1 %v15560_v21, %s15038_s16  ;;  %14763 = vrcp.f32 %v2577_v10 }
 0x4e7   : > { %v14756_v15 = vpop.eup %14755 }
 0x4e8   : > { %v2568_v16 = vpop.xlane.xlu0 %2567  ;;  %v2607_v60 = vmul.f32 %v14756_v15, %v15929_v13  ;;  %v14758_v12 = vpop.eup %14757 }
 0x4e9   : > { %14765 = vrcp.f32 %v2568_v16  ;;  %v2609_v24 = vmul.f32 %v14758_v12, %v15904_v26  ;;  %v14760_v3 = vpop.eup %14759 }
 0x4ea   : > { %6835 = vrot.lane.b32.xlu1 %v15560_v21, %s15039_s29  ;;  %14031 = vmatmul.mubr.msk.f32.vlgmr.msra.gmra.mrb[30].mxu0 %vm1178_vm5, %v2607_v60  ;;  %14767 = vrcp.f32 %v2583_v2  ;;  %v2611_v37 = vmul.f32 %v14760_v3, %v15919_v14 }
 0x4eb   : > { %14039 = vmatpush3.msra.mxu0 %v15844_v42  ;;  %14040 = vmatprep.mubr.msk.f32.mxu0 %vm15032_vm4, %v18361_v55 }
 0x4ec   : > { %v2574_v49 = vpop.xlane.xlu0 %2573  ;;  %14048 = vmatprep.subr.mxu0 %v18361_v55 }
 0x4ed   : > { %14769 = vrcp.f32 %v2574_v49 }
 0x4ee   : > { %14041 = vmatmul.mubr.msk.f32.vlgmr.msra.gmra.mrb[32].mxu0 %vm1178_vm5, %v2609_v24 }
 0x4ef   : > { %v14762_v13 = vpop.eup %14761  ;;  %14049 = vmatpush3.msra.mxu0 %v15848_v0  ;;  %14050 = vmatprep.mubr.msk.f32.mxu0 %vm15032_vm4, %v18361_v55 }
 0x4f0   : > { %14058 = vmatprep.subr.mxu0 %v18361_v55  ;;  %v2608_v42 = vmul.f32 %v14762_v13, %v15937_v40  ;;  %v14764_v38 = vpop.eup %14763 }
 0x4f1   : > { %v2613_v40 = vmul.f32 %v14764_v38, %v15924_v50 }
 0x4f2   : > { %14036 = vmatmul.mubr.msk.f32.vlgmr.msra.gmra.mrb[32].mxu1 %vm1178_vm5, %v2608_v42  ;;  %14051 = vmatmul.mubr.msk.f32.vlgmr.msra.gmra.mrb[34].mxu0 %vm1178_vm5, %v2611_v37 }
 0x4f3   : > { %v14766_v26 = vpop.eup %14765  ;;  %14044 = vmatpush3.msra.mxu1 %v15846_v23  ;;  %14059 = vmatpush3.msra.mxu0 %v15872_v58 }
 0x4f4   : > { %14045 = vmatprep.mubr.msk.f32.mxu1 %vm15032_vm4, %v18361_v55  ;;  %14053 = vmatprep.subr.mxu1 %v18361_v55  ;;  %v2610_v0 = vmul.f32 %v14766_v26, %v15941_v46  ;;  %v14768_v14 = vpop.eup %14767 }
 0x4f5   : > { %14060 = vmatprep.mubr.msk.f32.mxu0 %vm15032_vm4, %v18361_v55  ;;  %14068 = vmatprep.subr.mxu0 %v18361_v55  ;;  %v2615_v50 = vmul.f32 %v14768_v14, %v15933_v43 }
 0x4f6   : > { %14046 = vmatmul.mubr.msk.f32.vlgmr.msra.gmra.mrb[34].mxu1 %vm1178_vm5, %v2610_v0  ;;  %14061 = vmatmul.mubr.msk.f32.vlgmr.msra.gmra.mrb[36].mxu0 %vm1178_vm5, %v2613_v40 }
 0x4f7   : > { %v14770_v58 = vpop.eup %14769  ;;  %14054 = vmatpush3.msra.mxu1 %v15850_v28  ;;  %14069 = vmatpush3.msra.mxu0 %v15852_v29  ;;  %v4397_v28 = vpop.permute.xlu1 %4396 }
 0x4f8   : > { %14055 = vmatprep.mubr.msk.f32.mxu1 %vm15032_vm4, %v18361_v55  ;;  %14063 = vmatprep.subr.mxu1 %v18361_v55  ;;  %v2612_v23 = vmul.f32 %v14770_v58, %v15945_v41  ;;  %v4319_v29 = vpop.permute.xlu0 %4318 }
 0x4f9   : > { %14070 = vmatprep.mubr.msk.f32.mxu0 %vm15032_vm4, %v18361_v55  ;;  %14078 = vmatprep.subr.mxu0 %v18361_v55 }
 0x4fa   : > { %14056 = vmatmul.mubr.msk.f32.vlgmr.msra.gmra.mrb[36].mxu1 %vm1178_vm5, %v2612_v23  ;;  %14071 = vmatmul.mubr.msk.f32.vlgmr.msra.gmra.mrb[38].mxu0 %vm1178_vm5, %v2615_v50 }
 0x4fb   : > { %14064 = vmatpush3.msra.mxu1 %v15854_v30  ;;  %14080 = vmatprep.mubr.msk.f32.mxu0 %vm15032_vm4, %v18361_v55 }
 0x4fc   : > { %14065 = vmatprep.mubr.msk.f32.mxu1 %vm15032_vm4, %v18361_v55  ;;  %14073 = vmatprep.subr.mxu1 %v18361_v55 }
 0x4fe   : > { %14079 = vmatpush3.xpose.msk.msra.mxu0 %vm1178_vm5, %v15856_v51 }
 0x4ff   : > { %14088 = vmatprep.subr.mxu0 %v18361_v55 }
 0x501   : > { %14081 = vmatmul.mubr.msk.f32.vlgmr.msra.gmra.mrb[40].mxu0 %vm1178_vm5, %v15860_v4 }
 0x502   : > { %14089 = vmatpush3.xpose.msk.msra.mxu0 %vm1178_vm5, %v15864_v19  ;;  %14090 = vmatprep.mubr.msk.f32.mxu0 %vm15032_vm4, %v18361_v55  ;;  %v4317_v19 = vpop.permute.xlu0 %4316 }
 0x503   : > { %14098 = vmatprep.subr.mxu0 %v18361_v55 }
 0x505   : > { %14091 = vmatmul.mubr.msk.f32.vlgmr.msra.gmra.mrb[42].mxu0 %vm1178_vm5, %v15868_v18  ;;  %v4395_v18 = vpop.permute.xlu1 %4394 }
 0x506   : > { %14099 = vmatpush3.xpose.msk.msra.mxu0 %vm1178_vm5, %v16002_v22  ;;  %14100 = vmatprep.mubr.msk.f32.mxu0 %vm15032_vm4, %v18361_v55  ;;  %v4475_v4 = vpop.permute.xlu0 %4474 }
 0x507   : > { %14108 = vmatprep.subr.mxu0 %v18361_v55 }
 0x509   : > { %14101 = vmatmul.mubr.msk.f32.vlgmr.msra.gmra.mrb[44].mxu0 %vm1178_vm5, %v16014_v52 }
 0x50a   : > { %14109 = vmatpush3.xpose.msk.msra.mxu0 %vm1178_vm5, %v4397_v28  ;;  %14110 = vmatprep.mubr.msk.f32.mxu0 %vm15032_vm4, %v18361_v55  ;;  %v4473_v51 = vpop.permute.xlu0 %4472 }
 0x50b   : > { %14118 = vmatprep.subr.mxu0 %v18361_v55 }
 0x50d   : > { %14111 = vmatmul.mubr.msk.f32.vlgmr.msra.gmra.mrb[46].mxu0 %vm1178_vm5, %v4395_v18 }
 0x50e   : > { %14120 = vmatprep.mubr.msk.f32.mxu0 %vm15032_vm4, %v18361_v55  ;;  %v4631_v41 = vpop.permute.xlu0 %4630 }
 0x512   : > { %v4629_v25 = vpop.permute.xlu0 %4628 }
 0x515   : > { %v2580_v30 = vpop.xlane.xlu1 %2579 }
 0x516   : > { %14771 = vrcp.f32 %v2580_v30  ;;  %v4787_v10 = vpop.permute.xlu0 %4786 }
 0x519   : > { %v4553_v43 = vpop.permute.xlu1 %4552 }
 0x51a   : > { %14119 = vmatpush3.xpose.msk.msra.mxu0 %vm1178_vm5, %v4553_v43 }
 0x51b   : > { %14128 = vmatprep.subr.mxu0 %v18361_v55 }
 0x51d   : > { %v4551_v46 = vpop.permute.xlu1 %4550 }
 0x51e   : > { %14121 = vmatmul.mubr.msk.f32.vlgmr.msra.gmra.mrb[48].mxu0 %vm1178_vm5, %v4551_v46 }
 0x51f   : > { %14130 = vmatprep.mubr.msk.f32.mxu0 %vm15032_vm4, %v18361_v55 }
 0x520   : > { %v14772_v22 = vpop.eup %14771 }
 0x521   : > { %v4709_v52 = vpop.permute.xlu1 %4708  ;;  %v2614_v62 = vmul.f32 %v14772_v22, %v15962_v8  ;;  %v18364_v8 = vld [vmem:[#allocation27_spill] sm:$0xff] }
 0x522   : > { %14129 = vmatpush3.xpose.msk.msra.mxu0 %vm1178_vm5, %v4709_v52 }
 0x523   : > { %14066 = vmatmul.mubr.msk.f32.vlgmr.msra.gmra.mrb[38].mxu1 %vm1178_vm5, %v2614_v62  ;;  %14138 = vmatprep.subr.mxu0 %v18361_v55 }
 0x524   : > { %14074 = vmatpush3.xpose.msk.msra.mxu1 %vm1178_vm5, %v18362_v20  ;;  %14075 = vmatprep.mubr.msk.f32.mxu1 %vm15032_vm4, %v18361_v55 }
 0x525   : > { %v4707_v9 = vpop.permute.xlu1 %4706  ;;  %14083 = vmatprep.subr.mxu1 %v18361_v55 }
 0x526   : > { %14131 = vmatmul.mubr.msk.f32.vlgmr.msra.gmra.mrb[50].mxu0 %vm1178_vm5, %v4707_v9  ;;  %v16251_v9 = vld [vmem:[#allocation4] sm:$0xff] }
 0x527   : > { %14076 = vmatmul.mubr.msk.f32.vlgmr.msra.gmra.mrb[40].mxu1 %vm1178_vm5, %v18363_v35  ;;  %14140 = vmatprep.mubr.msk.f32.mxu0 %vm15032_vm4, %v18361_v55 }
 0x528   : > { %14084 = vmatpush3.xpose.msk.msra.mxu1 %vm1178_vm5, %v18364_v8  ;;  %14085 = vmatprep.mubr.msk.f32.mxu1 %vm15032_vm4, %v18361_v55 }
 0x529   : > { %v4865_v57 = vpop.permute.xlu1 %4864  ;;  %14093 = vmatprep.subr.mxu1 %v18361_v55 }
 0x52a   : > { %14139 = vmatpush3.xpose.msk.msra.mxu0 %vm1178_vm5, %v4865_v57 }
 0x52b   : > { %14086 = vmatmul.mubr.msk.f32.vlgmr.msra.gmra.mrb[42].mxu1 %vm1178_vm5, %v18365_v27  ;;  %14148 = vmatprep.subr.mxu0 %v18361_v55 }
 0x52c   : > { %14094 = vmatpush3.xpose.msk.msra.mxu1 %vm1178_vm5, %v15996_v36  ;;  %14095 = vmatprep.mubr.msk.f32.mxu1 %vm15032_vm4, %v18361_v55  ;;  %v4785_v36 = vpop.permute.xlu0 %4784 }
 0x52d   : > { %v4863_v5 = vpop.permute.xlu1 %4862  ;;  %14103 = vmatprep.subr.mxu1 %v18361_v55 }
 0x52e   : > { %14141 = vmatmul.mubr.msk.f32.vlgmr.msra.gmra.mrb[52].mxu0 %vm1178_vm5, %v4863_v5 }
 0x52f   : > { %14096 = vmatmul.mubr.msk.f32.vlgmr.msra.gmra.mrb[44].mxu1 %vm1178_vm5, %v16008_v6  ;;  %14150 = vmatprep.mubr.msk.f32.mxu0 %vm15032_vm4, %v18361_v55 }
 0x530   : > { %14104 = vmatpush3.xpose.msk.msra.mxu1 %vm1178_vm5, %v4319_v29  ;;  %14105 = vmatprep.mubr.msk.f32.mxu1 %vm15032_vm4, %v18361_v55  ;;  %v4943_v45 = vpop.permute.xlu0 %4942 }
 0x531   : > { %v5021_v53 = vpop.permute.xlu1 %5020  ;;  %14113 = vmatprep.subr.mxu1 %v18361_v55 }
 0x532   : > { %14149 = vmatpush3.xpose.msk.msra.mxu0 %vm1178_vm5, %v5021_v53 }
 0x533   : > { %14106 = vmatmul.mubr.msk.f32.vlgmr.msra.gmra.mrb[46].mxu1 %vm1178_vm5, %v4317_v19  ;;  %14158 = vmatprep.subr.mxu0 %v18361_v55 }
 0x534   : > { %14114 = vmatpush3.xpose.msk.msra.mxu1 %vm1178_vm5, %v4475_v4  ;;  %14115 = vmatprep.mubr.msk.f32.mxu1 %vm15032_vm4, %v18361_v55  ;;  %v4941_v2 = vpop.permute.xlu0 %4940 }
 0x535   : > { %v5019_v6 = vpop.permute.xlu1 %5018  ;;  %14123 = vmatprep.subr.mxu1 %v18361_v55 }
 0x536   : > { %14151 = vmatmul.mubr.msk.f32.vlgmr.msra.gmra.mrb[54].mxu0 %vm1178_vm5, %v5019_v6 }
 0x537   : > { %14116 = vmatmul.mubr.msk.f32.vlgmr.msra.gmra.mrb[48].mxu1 %vm1178_vm5, %v4473_v51  ;;  %14160 = vmatprep.mubr.msk.f32.mxu0 %vm15032_vm4, %v18361_v55 }
 0x538   : > { %14124 = vmatpush3.xpose.msk.msra.mxu1 %vm1178_vm5, %v4631_v41  ;;  %14125 = vmatprep.mubr.msk.f32.mxu1 %vm15032_vm4, %v18361_v55  ;;  %v5305_v17 = vpop.permute.xlu0 %5304 }
 0x539   : > { %v5381_v56 = vpop.permute.xlu1 %5380  ;;  %14133 = vmatprep.subr.mxu1 %v18361_v55 }
 0x53a   : > { %14159 = vmatpush3.msra.mxu0 %v5381_v56 }
 0x53b   : > { %14126 = vmatmul.mubr.msk.f32.vlgmr.msra.gmra.mrb[50].mxu1 %vm1178_vm5, %v4629_v25  ;;  %14168 = vmatprep.subr.mxu0 %v18361_v55 }
 0x53c   : > { %14134 = vmatpush3.xpose.msk.msra.mxu1 %vm1178_vm5, %v4787_v10  ;;  %14135 = vmatprep.mubr.msk.f32.mxu1 %vm15032_vm4, %v18361_v55 }
 0x53d   : > { %14143 = vmatprep.subr.mxu1 %v18361_v55 }
 0x53f   : > { %14136 = vmatmul.mubr.msk.f32.vlgmr.msra.gmra.mrb[52].mxu1 %vm1178_vm5, %v4785_v36 }
 0x540   : > { %14144 = vmatpush3.xpose.msk.msra.mxu1 %vm1178_vm5, %v4943_v45  ;;  %14145 = vmatprep.mubr.msk.f32.mxu1 %vm15032_vm4, %v18361_v55 }
 0x541   : > { %14153 = vmatprep.subr.mxu1 %v18361_v55 }
 0x543   : > { %14146 = vmatmul.mubr.msk.f32.vlgmr.msra.gmra.mrb[54].mxu1 %vm1178_vm5, %v4941_v2 }
 0x544   : > { %14154 = vmatpush3.msra.mxu1 %v5305_v17  ;;  %14155 = vmatprep.mubr.msk.f32.mxu1 %vm15032_vm4, %v18361_v55 }
 0x545   : > { %14163 = vmatprep.subr.mxu1 %v18361_v55 }
 0x597   : > { %v2688_v15 = vpop.f32.mrb[24].mxu1 }
 0x598   : > { %3832 = vst.msk [vmem:[#allocation3] sm:$0xff] %vm1178_vm5, %v2688_v15  ;;  %v13997_v16 = vpop.f32.mrb[25].mxu1 }
 0x59b   : > { %v2764_v60 = vpop.f32.mrb[24].mxu0 }
 0x59c   : > { %3833 = vst.msk [vmem:[#allocation3 + $0x8] sm:$0xff] %vm1178_vm5, %v2764_v60  ;;  %v14002_v12 = vpop.f32.mrb[25].mxu0 }
 0x59f   : > { %v2840_v49 = vpop.f32.mrb[26].mxu1 }
 0x5a0   : > { %3834 = vst.msk [vmem:[#allocation3 + $0x10] sm:$0xff] %vm1178_vm5, %v2840_v49  ;;  %v14007_v24 = vpop.f32.mrb[27].mxu1 }
 0x5a3   : > { %v2916_v3 = vpop.f32.mrb[26].mxu0 }
 0x5a4   : > { %3835 = vst.msk [vmem:[#allocation3 + $0x18] sm:$0xff] %vm1178_vm5, %v2916_v3  ;;  %v14012_v13 = vpop.f32.mrb[27].mxu0 }
 0x5a7   : > { %v2992_v42 = vpop.f32.mrb[28].mxu1 }
 0x5a8   : > { %3836 = vst.msk [vmem:[#allocation3 + $0x20] sm:$0xff] %vm1178_vm5, %v2992_v42  ;;  %v14017_v37 = vpop.f32.mrb[29].mxu1 }
 0x5af   : > { %v3144_v38 = vpop.f32.mrb[30].mxu1 }
 0x5b0   : > { %3838 = vst.msk [vmem:[#allocation3 + $0x30] sm:$0xff] %vm1178_vm5, %v3144_v38  ;;  %v14027_v26 = vpop.f32.mrb[31].mxu1 }
 0x5b1   : > { %v3068_v0 = vpop.f32.mrb[28].mxu0 }
 0x5b2   : > { %3837 = vst.msk [vmem:[#allocation3 + $0x28] sm:$0xff] %vm1178_vm5, %v3068_v0  ;;  %v14022_v40 = vpop.f32.mrb[29].mxu0 }
 0x5bd   : > { %v3220_v14 = vpop.f32.mrb[30].mxu0 }
 0x5be   : > { %3839 = vst.msk [vmem:[#allocation3 + $0x38] sm:$0xff] %vm1178_vm5, %v3220_v14  ;;  %v14032_v58 = vpop.f32.mrb[31].mxu0 }
 0x5c1   : > { %v3372_v23 = vpop.f32.mrb[32].mxu0 }
 0x5c2   : > { %3841 = vst.msk [vmem:[#allocation3 + $0x48] sm:$0xff] %vm1178_vm5, %v3372_v23  ;;  %v14042_v50 = vpop.f32.mrb[33].mxu0 }
 0x5c5   : > { %v3296_v28 = vpop.f32.mrb[32].mxu1  ;;  %v3524_v29 = vpop.f32.mrb[34].mxu0 }
 0x5c6   : > { %3840 = vst.msk [vmem:[#allocation3 + $0x40] sm:$0xff] %vm1178_vm5, %v3296_v28  ;;  %3843 = vst.msk [vmem:[#allocation3 + $0x58] sm:$0xff] %vm1178_vm5, %v3524_v29  ;;  %v14037_v18 = vpop.f32.mrb[33].mxu1  ;;  %v14052_v19 = vpop.f32.mrb[35].mxu0 }
 0x5c9   : > { %v3448_v4 = vpop.f32.mrb[34].mxu1  ;;  %v3676_v30 = vpop.f32.mrb[36].mxu0 }
 0x5ca   : > { %3842 = vst.msk [vmem:[#allocation3 + $0x50] sm:$0xff] %vm1178_vm5, %v3448_v4  ;;  %3845 = vst.msk [vmem:[#allocation3 + $0x68] sm:$0xff] %vm1178_vm5, %v3676_v30  ;;  %v14047_v51 = vpop.f32.mrb[35].mxu1  ;;  %v14062_v43 = vpop.f32.mrb[37].mxu0 }
 0x5cd   : > { %v3600_v46 = vpop.f32.mrb[36].mxu1  ;;  %v3828_v41 = vpop.f32.mrb[38].mxu0 }
 0x5ce   : > { %3844 = vst.msk [vmem:[#allocation3 + $0x60] sm:$0xff] %vm1178_vm5, %v3600_v46  ;;  %3847 = vst.msk [vmem:[#allocation3 + $0x78] sm:$0xff] %vm1178_vm5, %v3828_v41  ;;  %v14057_v22 = vpop.f32.mrb[37].mxu1  ;;  %v14072_v52 = vpop.f32.mrb[39].mxu0 }
 0x5d4   : > { %v4000_v62 = vpop.f32.mrb[40].mxu0 }
 0x5d5   : > { %v5097_v20 = vmul.f32 0.35355338, %v4000_v62  ;;  %v14082_v25 = vpop.f32.mrb[41].mxu0 }
 0x5d7   : > { %v16254_v35 = vadd.f32 %v16251_v9, %v5097_v20 }
 0x5d8   : > { %v4156_v8 = vpop.f32.mrb[42].mxu0 }
 0x5d9   : > { %v14092_v57 = vpop.f32.mrb[43].mxu0  ;;  %v5131_v10 = vsel %vm1178_vm5, %v16254_v35, -inf  ;;  %v5099_v28 = vmul.f32 0.35355338, %v4156_v8 }
 0x5da   : > { %5132 = vmax.xlane.f32.xlu1 %v5131_v10 }
 0x5db   : > { %v16288_v41 = vadd.f32 %v16251_v9, %v5099_v28 }
 0x5dc   : > { %v4312_v27 = vpop.f32.mrb[44].mxu0 }
 0x5dd   : > { %v5101_v5 = vmul.f32 0.35355338, %v4312_v27  ;;  %v14102_v36 = vpop.f32.mrb[45].mxu0 }
 0x5df   : > { %v16259_v53 = vadd.f32 %v16251_v9, %v5101_v5  ;;  %v5137_v5 = vsel %vm1178_vm5, %v16288_v41, -inf }
 0x5e0   : > { %v4468_v6 = vpop.f32.mrb[46].mxu0 }
 0x5e1   : > { %v5103_v45 = vmul.f32 0.35355338, %v4468_v6  ;;  %v14112_v56 = vpop.f32.mrb[47].mxu0  ;;  %v5143_v2 = vsel %vm1178_vm5, %v16259_v53, -inf }
 0x5e2   : > { %5144 = vmax.xlane.f32.xlu1 %v5143_v2 }
 0x5e3   : > { %v16264_v17 = vadd.f32 %v16251_v9, %v5103_v45 }
 0x5e5   : > { %v5149_v15 = vsel %vm1178_vm5, %v16264_v17, -inf }
 0x5e6   : > { %5150 = vmax.xlane.f32.xlu1 %v5149_v15 }
 0x5f1   : > { %v4624_v16 = vpop.f32.mrb[48].mxu0 }
 0x5f2   : > { %v5105_v60 = vmul.f32 0.35355338, %v4624_v16  ;;  %v14122_v12 = vpop.f32.mrb[49].mxu0 }
 0x5f4   : > { %v16269_v49 = vadd.f32 %v16251_v9, %v5105_v60 }
 0x5f6   : > { %v3752_v24 = vpop.f32.mrb[38].mxu1  ;;  %v5155_v3 = vsel %vm1178_vm5, %v16269_v49, -inf }
 0x5f7   : > { %3846 = vst.msk [vmem:[#allocation3 + $0x70] sm:$0xff] %vm1178_vm5, %v3752_v24  ;;  %5156 = vmax.xlane.f32.xlu1 %v5155_v3  ;;  %v14067_v13 = vpop.f32.mrb[39].mxu1 }
 0x5f9   : > { %v4780_v42 = vpop.f32.mrb[50].mxu0 }
 0x5fa   : > { %v5107_v37 = vmul.f32 0.35355338, %v4780_v42  ;;  %v3922_v38 = vpop.f32.mrb[40].mxu1  ;;  %v14132_v26 = vpop.f32.mrb[51].mxu0 }
 0x5fb   : > { %v5096_v0 = vmul.f32 0.35355338, %v3922_v38  ;;  %v14077_v40 = vpop.f32.mrb[41].mxu1 }
 0x5fc   : > { %v16275_v14 = vadd.f32 %v16251_v9, %v5107_v37 }
 0x5fd   : > { %v16278_v58 = vadd.f32 %v16251_v9, %v5096_v0 }
 0x5fe   : > { %v4078_v23 = vpop.f32.mrb[42].mxu1  ;;  %v5161_v50 = vsel %vm1178_vm5, %v16275_v14, -inf }
 0x5ff   : > { %v5098_v29 = vmul.f32 0.35355338, %v4078_v23  ;;  %5162 = vmax.xlane.f32.xlu1 %v5161_v50  ;;  %v14087_v18 = vpop.f32.mrb[43].mxu1  ;;  %v5128_v19 = vsel %vm1178_vm5, %v16278_v58, -inf }
 0x600   : > { %5129 = vmax.xlane.f32.xlu0 %v5128_v19 }
 0x601   : > { %v16285_v4 = vadd.f32 %v16251_v9, %v5098_v29  ;;  %v4936_v30 = vpop.f32.mrb[52].mxu0 }
 0x602   : > { %v5109_v51 = vmul.f32 0.35355338, %v4936_v30  ;;  %v4234_v43 = vpop.f32.mrb[44].mxu1  ;;  %v14142_v46 = vpop.f32.mrb[53].mxu0 }
 0x603   : > { %v5100_v22 = vmul.f32 0.35355338, %v4234_v43  ;;  %v14097_v52 = vpop.f32.mrb[45].mxu1  ;;  %v5134_v62 = vsel %vm1178_vm5, %v16285_v4, -inf }
 0x604   : > { %v16293_v20 = vadd.f32 %v16251_v9, %v5109_v51  ;;  %5135 = vmax.xlane.f32.xlu0 %v5134_v62  ;;  %v16333_v51 = vpop.permute.xlu1 %5532 }
 0x605   : > { %v16298_v57 = vadd.f32 %v16251_v9, %v5100_v22 }
 0x606   : > { %v4390_v25 = vpop.f32.mrb[46].mxu1  ;;  %v5167_v8 = vsel %vm1178_vm5, %v16293_v20, -inf }
 0x607   : > { %v5102_v10 = vmul.f32 0.35355338, %v4390_v25  ;;  %5168 = vmax.xlane.f32.xlu1 %v5167_v8  ;;  %v14107_v27 = vpop.f32.mrb[47].mxu1  ;;  %v5140_v16 = vsel %vm1178_vm5, %v16298_v57, -inf }
 0x608   : > { %5138 = vmax.xlane.f32.xlu0 %v5137_v5  ;;  %v16335_v43 = vpop.permute.xlu1 %5608 }
 0x609   : > { %v5092_v36 = vpop.f32.mrb[54].mxu0  ;;  %v16303_v56 = vadd.f32 %v16251_v9, %v5102_v10 }
 0x60a   : > { %v4546_v6 = vpop.f32.mrb[48].mxu1  ;;  %v14152_v45 = vpop.f32.mrb[55].mxu0  ;;  %v5111_v52 = vmul.f32 0.35355338, %v5092_v36 }
 0x60b   : > { %v5104_v2 = vmul.f32 0.35355338, %v4546_v6  ;;  %v14117_v15 = vpop.f32.mrb[49].mxu1  ;;  %v5146_v13 = vsel %vm1178_vm5, %v16303_v56, -inf }
 0x60c   : > { %5141 = vmax.xlane.f32.xlu0 %v5140_v16  ;;  %v16337_v46 = vpop.permute.xlu1 %5684  ;;  %v16348_v25 = vadd.f32 %v16251_v9, %v5111_v52 }
 0x60d   : > { %v16308_v12 = vadd.f32 %v16251_v9, %v5104_v2 }
 0x60e   : > { %v4702_v60 = vpop.f32.mrb[50].mxu1  ;;  %v5173_v10 = vsel %vm1178_vm5, %v16348_v25, -inf }
 0x60f   : > { %v5106_v24 = vmul.f32 0.35355338, %v4702_v60  ;;  %v14127_v3 = vpop.f32.mrb[51].mxu1  ;;  %v5152_v0 = vsel %vm1178_vm5, %v16308_v12, -inf }
 0x610   : > { %5147 = vmax.xlane.f32.xlu0 %v5146_v13  ;;  %v16339_v22 = vpop.permute.xlu1 %5836 }
 0x611   : > { %v16313_v37 = vadd.f32 %v16251_v9, %v5106_v24 }
 0x612   : > { %v4858_v42 = vpop.f32.mrb[52].mxu1 }
 0x613   : > { %v5108_v38 = vmul.f32 0.35355338, %v4858_v42  ;;  %v14137_v26 = vpop.f32.mrb[53].mxu1  ;;  %v5158_v29 = vsel %vm1178_vm5, %v16313_v37, -inf }
 0x614   : > { %5153 = vmax.xlane.f32.xlu0 %v5152_v0  ;;  %v16343_v62 = vpop.permute.xlu1 %5988 }
 0x615   : > { %v16318_v23 = vadd.f32 %v16251_v9, %v5108_v38 }
 0x616   : > { %v5014_v40 = vpop.f32.mrb[54].mxu1 }
 0x617   : > { %v5110_v50 = vmul.f32 0.35355338, %v5014_v40  ;;  %v14147_v28 = vpop.f32.mrb[55].mxu1  ;;  %v5164_v19 = vsel %vm1178_vm5, %v16318_v23, -inf }
 0x618   : > { %6993 = vrot.lane.b32.xlu1 %v15568_v48, %s15038_s16  ;;  %5159 = vmax.xlane.f32.xlu0 %v5158_v29  ;;  %v16352_v8 = vpop.permute.xlu1 %6140 }
 0x619   : > { %v16325_v18 = vadd.f32 %v16251_v9, %v5110_v50  ;;  %v16364_v9 = vpop.permute.xlu0 %5456 }
 0x61b   : > { %v5170_v30 = vsel %vm1178_vm5, %v16325_v18, -inf }
 0x61c   : > { %6991 = vrot.lane.b32.xlu1 %v15568_v48, %s15039_s29  ;;  %5165 = vmax.xlane.f32.xlu0 %v5164_v19  ;;  %v16356_v27 = vpop.permute.xlu1 %6292 }
 0x61d   : > { %v16368_v45 = vpop.permute.xlu0 %5760 }
 0x620   : > { %5171 = vmax.xlane.f32.xlu0 %v5170_v30  ;;  %v16358_v5 = vpop.permute.xlu1 %6444 }
 0x621   : > { %v16372_v15 = vpop.permute.xlu0 %5912 }
 0x624   : > { %v16360_v36 = vpop.permute.xlu1 %6681 }
 0x625   : > { %18366 = vst [vmem:[#allocation25_spill] sm:$0xff] %v16360_v36  ;;  %v16376_v60 = vpop.permute.xlu0 %6064 }
 0x628   : > { %v16366_v6 = vpop.permute.xlu1 %6679 }
 0x629   : > { %18367 = vst [vmem:[#allocation26_spill] sm:$0xff] %v16366_v6  ;;  %v16379_v42 = vpop.permute.xlu0 %6216 }
 0x62c   : > { %v16370_v2 = vpop.permute.xlu1 %6837 }
 0x62d   : > { %18368 = vst [vmem:[#allocation27_spill] sm:$0xff] %v16370_v2  ;;  %v16381_v38 = vpop.permute.xlu0 %6368 }
 0x630   : > { %v16374_v16 = vpop.permute.xlu1 %6835 }
 0x631   : > { %18369 = vst [vmem:[#allocation28_spill] sm:$0xff] %v16374_v16  ;;  %v16385_v0 = vpop.permute.xlu0 %6603 }
 0x635   : > { %v16389_v50 = vpop.permute.xlu0 %6601 }
 0x636   : > { %6915 = vrot.lane.b32.xlu0 %v15556_v39, %s15038_s16 }
 0x639   : > { %v16391_v28 = vpop.permute.xlu0 %6759 }
 0x63a   : > { %6913 = vrot.lane.b32.xlu0 %v15556_v39, %s15039_s29  ;;  %18370 = vst [vmem:[#allocation29_spill] sm:$0xff] %v16391_v28 }
 0x63d   : > { %v16393_v29 = vpop.permute.xlu0 %6757 }
 0x63e   : > { %7071 = vrot.lane.b32.xlu0 %v15564_v47, %s15038_s16  ;;  %18371 = vst [vmem:[#allocation30_spill] sm:$0xff] %v16393_v29 }
 0x640   : > { %5174 = vmax.xlane.f32.xlu1 %v5173_v10 }
 0x651   : > { %7149 = vrot.lane.b32.xlu1 %v15576_v59, %s15038_s16 }
 0x667   : > { %v5133_v24 = vpop.xlane.xlu1 %5132 }
 0x668   : > { %v5177_v3 = vsub.f32 %v16254_v35, %v5133_v24 }
 0x66a   : > { %v5194_v13 = vmul.f32 1.442695, %v5177_v3 }
 0x66c   : > { %14773 = vpow2.f32 %v5194_v13 }
 0x66f   : > { %v5145_v30 = vpop.xlane.xlu1 %5144 }
 0x670   : > { %v5181_v3 = vsub.f32 %v16259_v53, %v5145_v30 }
 0x672   : > { %v5202_v6 = vmul.f32 1.442695, %v5181_v3 }
 0x673   : > { %v5151_v16 = vpop.xlane.xlu1 %5150 }
 0x674   : > { %v5183_v36 = vsub.f32 %v16264_v17, %v5151_v16 }
 0x676   : > { %v16383_v26 = vpop.eup %14773 }
 0x677   : > { %v5227_v40 = vsel %vm1178_vm5, %v16383_v26, 0.0 }
 0x678   : > { %5228 = vadd.xlane.f32.xlu1 %v5227_v40 }
 0x684   : > { %v5157_v28 = vpop.xlane.xlu1 %5156 }
 0x685   : > { %v5185_v53 = vsub.f32 %v16269_v49, %v5157_v28 }
 0x68d   : > { %v5130_v35 = vpop.xlane.xlu0 %5129 }
 0x68e   : > { %v5176_v19 = vsub.f32 %v16278_v58, %v5130_v35 }
 0x690   : > { %v5192_v52 = vmul.f32 1.442695, %v5176_v19 }
 0x691   : > { %v5136_v10 = vpop.xlane.xlu0 %5135 }
 0x692   : > { %14775 = vpow2.f32 %v5192_v52  ;;  %v5178_v24 = vsub.f32 %v16285_v4, %v5136_v10  ;;  %v5206_v4 = vmul.f32 1.442695, %v5183_v36  ;;  %v5163_v52 = vpop.xlane.xlu1 %5162 }
 0x693   : > { %v5187_v16 = vsub.f32 %v16275_v14, %v5163_v52 }
 0x694   : > { %v5196_v13 = vmul.f32 1.442695, %v5178_v24 }
 0x695   : > { %v5139_v40 = vpop.xlane.xlu0 %5138 }
 0x696   : > { %14777 = vpow2.f32 %v5196_v13  ;;  %v5179_v2 = vsub.f32 %v16288_v41, %v5139_v40  ;;  %v5169_v36 = vpop.xlane.xlu1 %5168 }
 0x697   : > { %v5189_v3 = vsub.f32 %v16293_v20, %v5169_v36 }
 0x698   : > { %v5198_v29 = vmul.f32 1.442695, %v5179_v2 }
 0x699   : > { %v5142_v58 = vpop.xlane.xlu0 %5141 }
 0x69a   : > { %14779 = vpow2.f32 %v5198_v29  ;;  %v5180_v35 = vsub.f32 %v16298_v57, %v5142_v58  ;;  %v5210_v57 = vmul.f32 1.442695, %v5185_v53 }
 0x69b   : > { %14781 = vpow2.f32 %v5202_v6 }
 0x69c   : > { %v16401_v19 = vpop.eup %14775  ;;  %v5200_v30 = vmul.f32 1.442695, %v5180_v35 }
 0x69d   : > { %v5148_v10 = vpop.xlane.xlu0 %5147  ;;  %v5224_v41 = vsel %vm1178_vm5, %v16401_v19, 0.0 }
 0x69e   : > { %14783 = vpow2.f32 %v5200_v30  ;;  %v5182_v17 = vsub.f32 %v16303_v56, %v5148_v10  ;;  %5225 = vadd.xlane.f32.xlu0 %v5224_v41  ;;  %v5214_v56 = vmul.f32 1.442695, %v5187_v16 }
 0x69f   : > { %14785 = vpow2.f32 %v5206_v4 }
 0x6a0   : > { %v16407_v2 = vpop.eup %14777  ;;  %v5204_v6 = vmul.f32 1.442695, %v5182_v17 }
 0x6a1   : > { %v5154_v29 = vpop.xlane.xlu0 %5153  ;;  %v5230_v49 = vsel %vm1178_vm5, %v16407_v2, 0.0 }
 0x6a2   : > { %14787 = vpow2.f32 %v5204_v6  ;;  %v5184_v28 = vsub.f32 %v16308_v12, %v5154_v29  ;;  %5231 = vadd.xlane.f32.xlu0 %v5230_v49  ;;  %v5218_v12 = vmul.f32 1.442695, %v5189_v3 }
 0x6a3   : > { %14789 = vpow2.f32 %v5210_v57 }
 0x6a4   : > { %v16413_v24 = vpop.eup %14779  ;;  %v5208_v13 = vmul.f32 1.442695, %v5184_v28 }
 0x6a5   : > { %v5160_v40 = vpop.xlane.xlu0 %5159  ;;  %v5233_v14 = vsel %vm1178_vm5, %v16413_v24, 0.0  ;;  %v16418_v58 = vpop.eup %14781 }
 0x6a6   : > { %14791 = vpow2.f32 %v5208_v13  ;;  %v5186_v35 = vsub.f32 %v16313_v37, %v5160_v40  ;;  %5234 = vadd.xlane.f32.xlu1 %v5233_v14  ;;  %v5239_v20 = vsel %vm1178_vm5, %v16418_v58, 0.0 }
 0x6a7   : > { %14793 = vpow2.f32 %v5214_v56 }
 0x6a8   : > { %v16421_v4 = vpop.eup %14783  ;;  %v5212_v53 = vmul.f32 1.442695, %v5186_v35 }
 0x6a9   : > { %v5166_v30 = vpop.xlane.xlu0 %5165  ;;  %v5236_v52 = vsel %vm1178_vm5, %v16421_v4, 0.0  ;;  %v16427_v10 = vpop.eup %14785 }
 0x6aa   : > { %14795 = vpow2.f32 %v5212_v53  ;;  %v5188_v41 = vsub.f32 %v16318_v23, %v5166_v30  ;;  %5240 = vadd.xlane.f32.xlu1 %v5239_v20  ;;  %5237 = vadd.xlane.f32.xlu0 %v5236_v52  ;;  %v5245_v16 = vsel %vm1178_vm5, %v16427_v10, 0.0  ;;  %v16465_v52 = vpop.permute.xlu1 %6993 }
 0x6ab   : > { %14797 = vpow2.f32 %v5218_v12 }
 0x6ac   : > { %v16430_v37 = vpop.eup %14787  ;;  %v5216_v17 = vmul.f32 1.442695, %v5188_v41 }
 0x6ad   : > { %v5172_v57 = vpop.xlane.xlu0 %5171  ;;  %v5242_v6 = vsel %vm1178_vm5, %v16430_v37, 0.0  ;;  %v16436_v36 = vpop.eup %14789 }
 0x6ae   : > { %14799 = vpow2.f32 %v5216_v17  ;;  %v5190_v29 = vsub.f32 %v16325_v18, %v5172_v57  ;;  %5246 = vadd.xlane.f32.xlu1 %v5245_v16  ;;  %5243 = vadd.xlane.f32.xlu0 %v5242_v6  ;;  %v5251_v28 = vsel %vm1178_vm5, %v16436_v36, 0.0  ;;  %v16467_v41 = vpop.permute.xlu1 %6991 }
 0x6b0   : > { %v16439_v23 = vpop.eup %14791  ;;  %v5220_v49 = vmul.f32 1.442695, %v5190_v29 }
 0x6b1   : > { %v5248_v56 = vsel %vm1178_vm5, %v16439_v23, 0.0  ;;  %v16445_v3 = vpop.eup %14793 }
 0x6b2   : > { %14801 = vpow2.f32 %v5220_v49  ;;  %5252 = vadd.xlane.f32.xlu1 %v5251_v28  ;;  %5249 = vadd.xlane.f32.xlu0 %v5248_v56  ;;  %v5257_v18 = vsel %vm1178_vm5, %v16445_v3, 0.0 }
 0x6b4   : > { %v16447_v13 = vpop.eup %14795 }
 0x6b5   : > { %v5254_v40 = vsel %vm1178_vm5, %v16447_v13, 0.0  ;;  %v16453_v14 = vpop.eup %14797 }
 0x6b6   : > { %5258 = vadd.xlane.f32.xlu1 %v5257_v18  ;;  %5255 = vadd.xlane.f32.xlu0 %v5254_v40  ;;  %v5263_v12 = vsel %vm1178_vm5, %v16453_v14, 0.0 }
 0x6b8   : > { %v16455_v35 = vpop.eup %14799 }
 0x6b9   : > { %v5260_v53 = vsel %vm1178_vm5, %v16455_v35, 0.0 }
 0x6ba   : > { %5264 = vadd.xlane.f32.xlu1 %v5263_v12  ;;  %5261 = vadd.xlane.f32.xlu0 %v5260_v53 }
 0x6bc   : > { %v16461_v30 = vpop.eup %14801 }
 0x6bd   : > { %v5266_v20 = vsel %vm1178_vm5, %v16461_v30, 0.0 }
 0x6be   : > { %5267 = vadd.xlane.f32.xlu1 %v5266_v20 }
 0x6cd   : > { %v5175_v17 = vpop.xlane.xlu1 %5174 }
 0x6ce   : > { %v5191_v57 = vsub.f32 %v16348_v25, %v5175_v17 }
 0x6cf   : > { %7147 = vrot.lane.b32.xlu1 %v15576_v59, %s15039_s29 }
 0x6d0   : > { %v5222_v16 = vmul.f32 1.442695, %v5191_v57 }
 0x6d1   : > { %v16508_v25 = vpop.permute.xlu1 %7149 }
 0x6d2   : > { %14803 = vpow2.f32 %v5222_v16 }
 0x6d3   : > { %7305 = vrot.lane.b32.xlu1 %v15584_v31, %s15038_s16 }
 0x6d7   : > { %7303 = vrot.lane.b32.xlu1 %v15584_v31, %s15039_s29 }
 0x6db   : > { %7461 = vrot.lane.b32.xlu1 %v15592_v32, %s15038_s16 }
 0x6dc   : > { %v16478_v6 = vpop.eup %14803 }
 0x6dd   : > { %v5269_v29 = vsel %vm1178_vm5, %v16478_v6, 0.0 }
 0x6de   : > { %5270 = vadd.xlane.f32.xlu0 %v5269_v29 }
 0x6df   : > { %7459 = vrot.lane.b32.xlu1 %v15592_v32, %s15039_s29 }
 0x6e3   : > { %7617 = vrot.lane.b32.xlu1 %v15600_v44, %s15038_s16 }
 0x6e7   : > { %7615 = vrot.lane.b32.xlu1 %v15600_v44, %s15039_s29 }
 0x6eb   : > { %7773 = vrot.lane.b32.xlu1 %v15606_v1, %s15038_s16 }
 0x6ef   : > { %7771 = vrot.lane.b32.xlu1 %v15606_v1, %s15039_s29 }
 0x6f3   : > { %8133 = vrot.lane.b32.xlu1 %v15548_v33, %s15040_s23 }
 0x6f4   : > { %7069 = vrot.lane.b32.xlu0 %v15564_v47, %s15039_s29 }
 0x6f7   : > { %8285 = vrot.lane.b32.xlu1 %v15560_v21, %s15040_s23 }
 0x6f8   : > { %7227 = vrot.lane.b32.xlu0 %v15572_v54, %s15038_s16 }
 0x6fb   : > { %8361 = vrot.lane.b32.xlu1 %v15556_v39, %s15040_s23 }
 0x6fc   : > { %7225 = vrot.lane.b32.xlu0 %v15572_v54, %s15039_s29 }
 0x6ff   : > { %8437 = vrot.lane.b32.xlu1 %v15568_v48, %s15040_s23 }
 0x700   : > { %7383 = vrot.lane.b32.xlu0 %v15580_v61, %s15038_s16 }
 0x703   : > { %8589 = vrot.lane.b32.xlu1 %v15576_v59, %s15040_s23 }
 0x704   : > { %7381 = vrot.lane.b32.xlu0 %v15580_v61, %s15039_s29 }
 0x705   : > { %v5229_v49 = vpop.xlane.xlu1 %5228 }
 0x706   : > { %14805 = vrcp.f32 %v5229_v49 }
 0x707   : > { %8741 = vrot.lane.b32.xlu1 %v15584_v31, %s15040_s23 }
 0x708   : > { %7539 = vrot.lane.b32.xlu0 %v15588_v63, %s15038_s16 }
 0x70b   : > { %8893 = vrot.lane.b32.xlu1 %v15592_v32, %s15040_s23 }
 0x70c   : > { %7537 = vrot.lane.b32.xlu0 %v15588_v63, %s15039_s29 }
 0x70f   : > { %9045 = vrot.lane.b32.xlu1 %v15600_v44, %s15040_s23 }
 0x710   : > { %v14806_v28 = vpop.eup %14805  ;;  %7695 = vrot.lane.b32.xlu0 %v15596_v7, %s15038_s16  ;;  %s18429_s16 = scalar_lea.vmem %s18294_s6, %s15150_s22 }
 0x711   : > { %v5289_v56 = vmul.f32 %v14806_v28, %v16383_v26  ;;  %v16540_v26 = vpop.permute.xlu0 %6915 }
 0x713   : > { %14161 = vmatmul.mubr.msk.f32.vlgmr.msra.gmra.mrb[56].mxu0 %vm1178_vm5, %v5289_v56  ;;  %9197 = vrot.lane.b32.xlu1 %v15606_v1, %s15040_s23 }
 0x714   : > { %14169 = vmatpush3.msra.mxu0 %v16333_v51  ;;  %7693 = vrot.lane.b32.xlu0 %v15596_v7, %s15039_s29 }
 0x715   : > { %14170 = vmatprep.mubr.msk.f32.mxu0 %vm15032_vm4, %v18361_v55  ;;  %14178 = vmatprep.subr.mxu0 %v18361_v55  ;;  %v16550_v51 = vpop.permute.xlu0 %6913 }
 0x717   : > { %9434 = vrot.lane.b32.xlu1 %v15548_v33, %s15041_s24 }
 0x718   : > { %8057 = vrot.lane.b32.xlu0 %v15546_v11, %s15040_s23 }
 0x719   : > { %v16556_v18 = vpop.permute.xlu0 %7071 }
 0x71b   : > { %9432 = vrot.lane.b32.xlu1 %v15548_v33, %s15042_s19 }
 0x71c   : > { %8209 = vrot.lane.b32.xlu0 %v15554_v34, %s15040_s23 }
 0x71f   : > { %9590 = vrot.lane.b32.xlu1 %v15560_v21, %s15041_s24 }
 0x720   : > { %8513 = vrot.lane.b32.xlu0 %v15564_v47, %s15040_s23 }
 0x723   : > { %9588 = vrot.lane.b32.xlu1 %v15560_v21, %s15042_s19 }
 0x724   : > { %8665 = vrot.lane.b32.xlu0 %v15572_v54, %s15040_s23 }
 0x727   : > { %9746 = vrot.lane.b32.xlu1 %v15568_v48, %s15041_s24 }
 0x728   : > { %8817 = vrot.lane.b32.xlu0 %v15580_v61, %s15040_s23 }
 0x72b   : > { %9744 = vrot.lane.b32.xlu1 %v15568_v48, %s15042_s19  ;;  %v5226_v40 = vpop.xlane.xlu0 %5225 }
 0x72c   : > { %14807 = vrcp.f32 %v5226_v40  ;;  %8969 = vrot.lane.b32.xlu0 %v15588_v63, %s15040_s23 }
 0x72f   : > { %v5232_v12 = vpop.xlane.xlu0 %5231 }
 0x730   : > { %14809 = vrcp.f32 %v5232_v12  ;;  %9121 = vrot.lane.b32.xlu0 %v15596_v7, %s15040_s23 }
 0x733   : > { %v5235_v53 = vpop.xlane.xlu1 %5234 }
 0x734   : > { %14811 = vrcp.f32 %v5235_v53  ;;  %9356 = vrot.lane.b32.xlu0 %v15546_v11, %s15041_s24 }
 0x736   : > { %v14808_v20 = vpop.eup %14807 }
 0x737   : > { %v5241_v17 = vpop.xlane.xlu1 %5240  ;;  %v5238_v57 = vpop.xlane.xlu0 %5237  ;;  %v5288_v16 = vmul.f32 %v14808_v20, %v16401_v19 }
 0x738   : > { %14813 = vrcp.f32 %v5241_v17  ;;  %9354 = vrot.lane.b32.xlu0 %v15546_v11, %s15042_s19 }
 0x739   : > { %14815 = vrcp.f32 %v5238_v57  ;;  %14156 = vmatmul.mubr.msk.f32.vlgmr.msra.gmra.mrb[56].mxu1 %vm1178_vm5, %v5288_v16 }
 0x73a   : > { %v14810_v29 = vpop.eup %14809  ;;  %14164 = vmatpush3.msra.mxu1 %v16364_v9  ;;  %14165 = vmatprep.mubr.msk.f32.mxu1 %vm15032_vm4, %v18361_v55 }
 0x73b   : > { %v5247_v49 = vpop.xlane.xlu1 %5246  ;;  %v5244_v28 = vpop.xlane.xlu0 %5243  ;;  %14173 = vmatprep.subr.mxu1 %v18361_v55  ;;  %v5290_v56 = vmul.f32 %v14810_v29, %v16407_v2 }
 0x73c   : > { %14817 = vrcp.f32 %v5247_v49  ;;  %9512 = vrot.lane.b32.xlu0 %v15554_v34, %s15041_s24 }
 0x73d   : > { %14819 = vrcp.f32 %v5244_v28  ;;  %14166 = vmatmul.mubr.msk.f32.vlgmr.msra.gmra.mrb[58].mxu1 %vm1178_vm5, %v5290_v56 }
 0x73e   : > { %v14812_v19 = vpop.eup %14811  ;;  %14174 = vmatpush3.msra.mxu1 %v16335_v43  ;;  %14175 = vmatprep.mubr.msk.f32.mxu1 %vm15032_vm4, %v18361_v55 }
 0x73f   : > { %v5253_v9 = vpop.xlane.xlu1 %5252  ;;  %v5250_v40 = vpop.xlane.xlu0 %5249  ;;  %v5291_v12 = vmul.f32 %v14812_v19, %v16413_v24  ;;  %14183 = vmatprep.subr.mxu1 %v18361_v55  ;;  %v18374_v19 = vld [vmem:[#allocation25_spill] sm:$0xff] }
 0x740   : > { %14821 = vrcp.f32 %v5253_v9  ;;  %9510 = vrot.lane.b32.xlu0 %v15554_v34, %s15042_s19 }
 0x741   : > { %14823 = vrcp.f32 %v5250_v40  ;;  %14171 = vmatmul.mubr.msk.f32.vlgmr.msra.gmra.mrb[58].mxu0 %vm1178_vm5, %v5291_v12  ;;  %v18376_v12 = vld [vmem:[#allocation27_spill] sm:$0xff] }
 0x742   : > { %v14814_v2 = vpop.eup %14813  ;;  %14179 = vmatpush3.msra.mxu0 %v16337_v46  ;;  %14180 = vmatprep.mubr.msk.f32.mxu0 %vm15032_vm4, %v18361_v55 }
 0x743   : > { %v14816_v43 = vpop.eup %14815  ;;  %v5259_v53 = vpop.xlane.xlu1 %5258  ;;  %14188 = vmatprep.subr.mxu0 %v18361_v55  ;;  %v5293_v24 = vmul.f32 %v14814_v2, %v16418_v58 }
 0x744   : > { %v5256_v20 = vpop.xlane.xlu0 %5255  ;;  %14825 = vrcp.f32 %v5259_v53  ;;  %9668 = vrot.lane.b32.xlu0 %v15556_v39, %s15041_s24  ;;  %v5292_v17 = vmul.f32 %v14816_v43, %v16421_v4  ;;  %v18377_v53 = vld [vmem:[#allocation28_spill] sm:$0xff] }
 0x745   : > { %14827 = vrcp.f32 %v5256_v20  ;;  %14181 = vmatmul.mubr.msk.f32.vlgmr.msra.gmra.mrb[60].mxu0 %vm1178_vm5, %v5293_v24 }
 0x746   : > { %v14818_v46 = vpop.eup %14817  ;;  %14176 = vmatmul.mubr.msk.f32.vlgmr.msra.gmra.mrb[60].mxu1 %vm1178_vm5, %v5292_v17  ;;  %14189 = vmatpush3.msra.mxu0 %v16339_v22 }
 0x747   : > { %v14820_v57 = vpop.eup %14819  ;;  %14184 = vmatpush3.msra.mxu1 %v16368_v45  ;;  %v5265_v16 = vpop.xlane.xlu1 %5264  ;;  %14190 = vmatprep.mubr.msk.f32.mxu0 %vm15032_vm4, %v18361_v55  ;;  %v5295_v58 = vmul.f32 %v14818_v46, %v16427_v10 }
 0x748   : > { %v5262_v29 = vpop.xlane.xlu0 %5261  ;;  %14829 = vrcp.f32 %v5265_v16  ;;  %14198 = vmatprep.subr.mxu0 %v18361_v55  ;;  %9666 = vrot.lane.b32.xlu0 %v15556_v39, %s15042_s19  ;;  %v5294_v4 = vmul.f32 %v14820_v57, %v16430_v37 }
 0x749   : > { %14831 = vrcp.f32 %v5262_v29  ;;  %14185 = vmatprep.mubr.msk.f32.mxu1 %vm15032_vm4, %v18361_v55  ;;  %14193 = vmatprep.subr.mxu1 %v18361_v55 }
 0x74a   : > { %v14822_v22 = vpop.eup %14821  ;;  %14186 = vmatmul.mubr.msk.f32.vlgmr.msra.gmra.mrb[62].mxu1 %vm1178_vm5, %v5294_v4  ;;  %14191 = vmatmul.mubr.msk.f32.vlgmr.msra.gmra.mrb[62].mxu0 %vm1178_vm5, %v5295_v58 }
 0x74b   : > { %v14824_v45 = vpop.eup %14823  ;;  %14194 = vmatpush3.msra.mxu1 %v16372_v15  ;;  %14199 = vmatpush3.msra.mxu0 %v16343_v62  ;;  %v5268_v10 = vpop.xlane.xlu1 %5267  ;;  %v5297_v49 = vmul.f32 %v14822_v22, %v16436_v36 }
 0x74c   : > { %14833 = vrcp.f32 %v5268_v10  ;;  %14195 = vmatprep.mubr.msk.f32.mxu1 %vm15032_vm4, %v18361_v55  ;;  %14200 = vmatprep.mubr.msk.f32.mxu0 %vm15032_vm4, %v18361_v55  ;;  %v5296_v37 = vmul.f32 %v14824_v45, %v16439_v23 }
 0x74d   : > { %14203 = vmatprep.subr.mxu1 %v18361_v55  ;;  %14208 = vmatprep.subr.mxu0 %v18361_v55 }
 0x74e   : > { %v14826_v28 = vpop.eup %14825  ;;  %14196 = vmatmul.mubr.msk.f32.vlgmr.msra.gmra.mrb[64].mxu1 %vm1178_vm5, %v5296_v37  ;;  %14201 = vmatmul.mubr.msk.f32.vlgmr.msra.gmra.mrb[64].mxu0 %vm1178_vm5, %v5297_v49 }
 0x74f   : > { %v14828_v62 = vpop.eup %14827  ;;  %14204 = vmatpush3.msra.mxu1 %v16376_v60  ;;  %14209 = vmatpush3.msra.mxu0 %v16352_v8  ;;  %v5299_v15 = vmul.f32 %v14826_v28, %v16445_v3 }
 0x750   : > { %14205 = vmatprep.mubr.msk.f32.mxu1 %vm15032_vm4, %v18361_v55  ;;  %14210 = vmatprep.mubr.msk.f32.mxu0 %vm15032_vm4, %v18361_v55  ;;  %v5298_v36 = vmul.f32 %v14828_v62, %v16447_v13 }
 0x751   : > { %14213 = vmatprep.subr.mxu1 %v18361_v55  ;;  %14218 = vmatprep.subr.mxu0 %v18361_v55 }
 0x752   : > { %v14830_v23 = vpop.eup %14829  ;;  %14206 = vmatmul.mubr.msk.f32.vlgmr.msra.gmra.mrb[66].mxu1 %vm1178_vm5, %v5298_v36  ;;  %14211 = vmatmul.mubr.msk.f32.vlgmr.msra.gmra.mrb[66].mxu0 %vm1178_vm5, %v5299_v15 }
 0x753   : > { %v14832_v8 = vpop.eup %14831  ;;  %14214 = vmatpush3.msra.mxu1 %v16379_v42  ;;  %14219 = vmatpush3.msra.mxu0 %v16356_v27  ;;  %v5301_v60 = vmul.f32 %v14830_v23, %v16453_v14  ;;  %v7148_v42 = vpop.permute.xlu1 %7147 }
 0x754   : > { %14215 = vmatprep.mubr.msk.f32.mxu1 %vm15032_vm4, %v18361_v55  ;;  %14220 = vmatprep.mubr.msk.f32.mxu0 %vm15032_vm4, %v18361_v55  ;;  %v5300_v3 = vmul.f32 %v14832_v8, %v16455_v35 }
 0x755   : > { %14223 = vmatprep.subr.mxu1 %v18361_v55  ;;  %14228 = vmatprep.subr.mxu0 %v18361_v55 }
 0x756   : > { %v14834_v13 = vpop.eup %14833  ;;  %14216 = vmatmul.mubr.msk.f32.vlgmr.msra.gmra.mrb[68].mxu1 %vm1178_vm5, %v5300_v3  ;;  %14221 = vmatmul.mubr.msk.f32.vlgmr.msra.gmra.mrb[68].mxu0 %vm1178_vm5, %v5301_v60 }
 0x757   : > { %14224 = vmatpush3.msra.mxu1 %v16381_v38  ;;  %14229 = vmatpush3.msra.mxu0 %v16358_v5  ;;  %v5302_v27 = vmul.f32 %v14834_v13, %v16461_v30  ;;  %v18372_v5 = vld [vmem:[#allocation29_spill] sm:$0xff]  ;;  %v18373_v38 = vld [vmem:[#allocation30_spill] sm:$0xff] }
 0x758   : > { %14225 = vmatprep.mubr.msk.f32.mxu1 %vm15032_vm4, %v18361_v55  ;;  %14233 = vmatprep.subr.mxu1 %v18361_v55 }
 0x759   : > { %14230 = vmatprep.mubr.msk.f32.mxu0 %vm15032_vm4, %v18361_v55  ;;  %14238 = vmatprep.subr.mxu0 %v18361_v55 }
 0x75a   : > { %14226 = vmatmul.mubr.msk.f32.vlgmr.msra.gmra.mrb[70].mxu1 %vm1178_vm5, %v5302_v27 }
 0x75b   : > { %14235 = vmatprep.mubr.msk.f32.mxu1 %vm15032_vm4, %v18361_v55 }
 0x75e   : > { %14234 = vmatpush3.xpose.msk.msra.mxu1 %vm1178_vm5, %v16385_v0  ;;  %v7306_v0 = vpop.permute.xlu1 %7305 }
 0x75f   : > { %14243 = vmatprep.subr.mxu1 %v18361_v55 }
 0x761   : > { %14236 = vmatmul.mubr.msk.f32.vlgmr.msra.gmra.mrb[72].mxu1 %vm1178_vm5, %v16389_v50 }
 0x762   : > { %14244 = vmatpush3.xpose.msk.msra.mxu1 %vm1178_vm5, %v18372_v5  ;;  %14245 = vmatprep.mubr.msk.f32.mxu1 %vm15032_vm4, %v18361_v55  ;;  %v7304_v14 = vpop.permute.xlu1 %7303 }
 0x763   : > { %14253 = vmatprep.subr.mxu1 %v18361_v55 }
 0x765   : > { %14246 = vmatmul.mubr.msk.f32.vlgmr.msra.gmra.mrb[74].mxu1 %vm1178_vm5, %v18373_v38 }
 0x766   : > { %14254 = vmatpush3.xpose.msk.msra.mxu1 %vm1178_vm5, %v16540_v26  ;;  %14255 = vmatprep.mubr.msk.f32.mxu1 %vm15032_vm4, %v18361_v55  ;;  %v7462_v26 = vpop.permute.xlu1 %7461 }
 0x767   : > { %14263 = vmatprep.subr.mxu1 %v18361_v55 }
 0x769   : > { %14256 = vmatmul.mubr.msk.f32.vlgmr.msra.gmra.mrb[76].mxu1 %vm1178_vm5, %v16550_v51 }
 0x76a   : > { %14264 = vmatpush3.xpose.msk.msra.mxu1 %vm1178_vm5, %v16556_v18  ;;  %14265 = vmatprep.mubr.msk.f32.mxu1 %vm15032_vm4, %v18361_v55  ;;  %v7460_v9 = vpop.permute.xlu1 %7459 }
 0x76b   : > { %v5271_v50 = vpop.xlane.xlu0 %5270  ;;  %14273 = vmatprep.subr.mxu1 %v18361_v55 }
 0x76c   : > { %14835 = vrcp.f32 %v5271_v50 }
 0x76e   : > { %v7618_v43 = vpop.permute.xlu1 %7617 }
 0x76f   : > { %v7070_v35 = vpop.permute.xlu0 %7069 }
 0x770   : > { %14266 = vmatmul.mubr.msk.f32.vlgmr.msra.gmra.mrb[78].mxu1 %vm1178_vm5, %v7070_v35 }
 0x771   : > { %14275 = vmatprep.mubr.msk.f32.mxu1 %vm15032_vm4, %v18361_v55 }
 0x773   : > { %v7228_v30 = vpop.permute.xlu0 %7227 }
 0x774   : > { %14274 = vmatpush3.xpose.msk.msra.mxu1 %vm1178_vm5, %v7228_v30 }
 0x775   : > { %14283 = vmatprep.subr.mxu1 %v18361_v55 }
 0x776   : > { %v14836_v51 = vpop.eup %14835 }
 0x777   : > { %v7226_v18 = vpop.permute.xlu0 %7225  ;;  %v5303_v56 = vmul.f32 %v14836_v51, %v16478_v6  ;;  %v18375_v6 = vld [vmem:[#allocation26_spill] sm:$0xff] }
 0x778   : > { %14276 = vmatmul.mubr.msk.f32.vlgmr.msra.gmra.mrb[80].mxu1 %vm1178_vm5, %v7226_v18 }
 0x779   : > { %14231 = vmatmul.mubr.msk.f32.vlgmr.msra.gmra.mrb[70].mxu0 %vm1178_vm5, %v5303_v56  ;;  %14285 = vmatprep.mubr.msk.f32.mxu1 %vm15032_vm4, %v18361_v55 }
 0x77a   : > { %14239 = vmatpush3.xpose.msk.msra.mxu0 %vm1178_vm5, %v18374_v19  ;;  %14240 = vmatprep.mubr.msk.f32.mxu0 %vm15032_vm4, %v18361_v55 }
 0x77b   : > { %v7384_v40 = vpop.permute.xlu0 %7383  ;;  %14248 = vmatprep.subr.mxu0 %v18361_v55 }
 0x77c   : > { %14284 = vmatpush3.xpose.msk.msra.mxu1 %vm1178_vm5, %v7384_v40 }
 0x77d   : > { %14241 = vmatmul.mubr.msk.f32.vlgmr.msra.gmra.mrb[72].mxu0 %vm1178_vm5, %v18375_v6  ;;  %14293 = vmatprep.subr.mxu1 %v18361_v55  ;;  %v16792_v6 = vld [vmem:[#allocation4] sm:$0xff] }
 0x77e   : > { %14249 = vmatpush3.xpose.msk.msra.mxu0 %vm1178_vm5, %v18376_v12  ;;  %14250 = vmatprep.mubr.msk.f32.mxu0 %vm15032_vm4, %v18361_v55 }
 0x77f   : > { %v7382_v2 = vpop.permute.xlu0 %7381  ;;  %14258 = vmatprep.subr.mxu0 %v18361_v55 }
 0x780   : > { %14286 = vmatmul.mubr.msk.f32.vlgmr.msra.gmra.mrb[82].mxu1 %vm1178_vm5, %v7382_v2 }
 0x781   : > { %14251 = vmatmul.mubr.msk.f32.vlgmr.msra.gmra.mrb[74].mxu0 %vm1178_vm5, %v18377_v53  ;;  %14295 = vmatprep.mubr.msk.f32.mxu1 %vm15032_vm4, %v18361_v55 }
 0x782   : > { %14259 = vmatpush3.xpose.msk.msra.mxu0 %vm1178_vm5, %v16465_v52  ;;  %14260 = vmatprep.mubr.msk.f32.mxu0 %vm15032_vm4, %v18361_v55  ;;  %v7616_v52 = vpop.permute.xlu1 %7615 }
 0x783   : > { %v7540_v20 = vpop.permute.xlu0 %7539  ;;  %14268 = vmatprep.subr.mxu0 %v18361_v55 }
 0x784   : > { %14294 = vmatpush3.xpose.msk.msra.mxu1 %vm1178_vm5, %v7540_v20 }
 0x785   : > { %14261 = vmatmul.mubr.msk.f32.vlgmr.msra.gmra.mrb[76].mxu0 %vm1178_vm5, %v16467_v41  ;;  %14303 = vmatprep.subr.mxu1 %v18361_v55 }
 0x786   : > { %14269 = vmatpush3.xpose.msk.msra.mxu0 %vm1178_vm5, %v16508_v25  ;;  %14270 = vmatprep.mubr.msk.f32.mxu0 %vm15032_vm4, %v18361_v55  ;;  %v7774_v25 = vpop.permute.xlu1 %7773 }
 0x787   : > { %v7538_v24 = vpop.permute.xlu0 %7537  ;;  %14278 = vmatprep.subr.mxu0 %v18361_v55 }
 0x788   : > { %14296 = vmatmul.mubr.msk.f32.vlgmr.msra.gmra.mrb[84].mxu1 %vm1178_vm5, %v7538_v24 }
 0x789   : > { %14271 = vmatmul.mubr.msk.f32.vlgmr.msra.gmra.mrb[78].mxu0 %vm1178_vm5, %v7148_v42  ;;  %14305 = vmatprep.mubr.msk.f32.mxu1 %vm15032_vm4, %v18361_v55 }
 0x78a   : > { %14279 = vmatpush3.xpose.msk.msra.mxu0 %vm1178_vm5, %v7306_v0  ;;  %14280 = vmatprep.mubr.msk.f32.mxu0 %vm15032_vm4, %v18361_v55  ;;  %v7772_v46 = vpop.permute.xlu1 %7771 }
 0x78b   : > { %v7696_v41 = vpop.permute.xlu0 %7695  ;;  %14288 = vmatprep.subr.mxu0 %v18361_v55 }
 0x78c   : > { %14304 = vmatpush3.xpose.msk.msra.mxu1 %vm1178_vm5, %v7696_v41 }
 0x78d   : > { %14281 = vmatmul.mubr.msk.f32.vlgmr.msra.gmra.mrb[80].mxu0 %vm1178_vm5, %v7304_v14  ;;  %14313 = vmatprep.subr.mxu1 %v18361_v55 }
 0x78e   : > { %14289 = vmatpush3.xpose.msk.msra.mxu0 %vm1178_vm5, %v7462_v26  ;;  %14290 = vmatprep.mubr.msk.f32.mxu0 %vm15032_vm4, %v18361_v55  ;;  %v8134_v16 = vpop.permute.xlu1 %8133 }
 0x78f   : > { %v7694_v17 = vpop.permute.xlu0 %7693  ;;  %14298 = vmatprep.subr.mxu0 %v18361_v55 }
 0x790   : > { %14306 = vmatmul.mubr.msk.f32.vlgmr.msra.gmra.mrb[86].mxu1 %vm1178_vm5, %v7694_v17 }
 0x791   : > { %14291 = vmatmul.mubr.msk.f32.vlgmr.msra.gmra.mrb[82].mxu0 %vm1178_vm5, %v7460_v9  ;;  %14315 = vmatprep.mubr.msk.f32.mxu1 %vm15032_vm4, %v18361_v55 }
 0x792   : > { %14299 = vmatpush3.xpose.msk.msra.mxu0 %vm1178_vm5, %v7618_v43  ;;  %14300 = vmatprep.mubr.msk.f32.mxu0 %vm15032_vm4, %v18361_v55 }
 0x793   : > { %v8058_v57 = vpop.permute.xlu0 %8057  ;;  %14308 = vmatprep.subr.mxu0 %v18361_v55 }
 0x794   : > { %14314 = vmatpush3.msra.mxu1 %v8058_v57 }
 0x795   : > { %14301 = vmatmul.mubr.msk.f32.vlgmr.msra.gmra.mrb[84].mxu0 %vm1178_vm5, %v7616_v52  ;;  %14323 = vmatprep.subr.mxu1 %v18361_v55 }
 0x796   : > { %14309 = vmatpush3.xpose.msk.msra.mxu0 %vm1178_vm5, %v7774_v25  ;;  %14310 = vmatprep.mubr.msk.f32.mxu0 %vm15032_vm4, %v18361_v55 }
 0x797   : > { %14318 = vmatprep.subr.mxu0 %v18361_v55 }
 0x799   : > { %14311 = vmatmul.mubr.msk.f32.vlgmr.msra.gmra.mrb[86].mxu0 %vm1178_vm5, %v7772_v46 }
 0x79a   : > { %14319 = vmatpush3.msra.mxu0 %v8134_v16  ;;  %14320 = vmatprep.mubr.msk.f32.mxu0 %vm15032_vm4, %v18361_v55 }
 0x79b   : > { %14328 = vmatprep.subr.mxu0 %v18361_v55 }
 0x7e6   : > { %v16762_v29 = vpop.f32.mrb[56].mxu0 }
 0x7e7   : > { %18378 = vst [vmem:[#allocation29_spill] sm:$0xff] %v16762_v29  ;;  %v14162_v58 = vpop.f32.mrb[57].mxu0 }
 0x80c   : > { %v16764_v4 = vpop.f32.mrb[56].mxu1 }
 0x80d   : > { %18379 = vst [vmem:[#allocation30_spill] sm:$0xff] %v16764_v4  ;;  %v14157_v22 = vpop.f32.mrb[57].mxu1 }
 0x810   : > { %v16766_v45 = vpop.f32.mrb[58].mxu1 }
 0x811   : > { %18380 = vst [vmem:[#allocation25_spill] sm:$0xff] %v16766_v45  ;;  %v14167_v10 = vpop.f32.mrb[59].mxu1 }
 0x814   : > { %v16768_v49 = vpop.f32.mrb[58].mxu0 }
 0x815   : > { %18381 = vst [vmem:[#allocation26_spill] sm:$0xff] %v16768_v49  ;;  %v14172_v37 = vpop.f32.mrb[59].mxu0 }
 0x818   : > { %v16770_v28 = vpop.f32.mrb[60].mxu0 }
 0x819   : > { %18382 = vst [vmem:[#allocation27_spill] sm:$0xff] %v16770_v28  ;;  %v16772_v62 = vpop.f32.mrb[60].mxu1  ;;  %v14182_v15 = vpop.f32.mrb[61].mxu0 }
 0x81a   : > { %18383 = vst [vmem:[#allocation28_spill] sm:$0xff] %v16772_v62  ;;  %v14177_v36 = vpop.f32.mrb[61].mxu1 }
 0x81d   : > { %v16774_v23 = vpop.f32.mrb[62].mxu1  ;;  %v16776_v8 = vpop.f32.mrb[62].mxu0 }
 0x81e   : > { %18384 = vst [vmem:[#allocation31_spill] sm:$0xff] %v16774_v23  ;;  %18385 = vst [vmem:[#allocation32_spill] sm:$0xff] %v16776_v8  ;;  %v14187_v60 = vpop.f32.mrb[63].mxu1  ;;  %v14192_v3 = vpop.f32.mrb[63].mxu0 }
 0x821   : > { %v16778_v13 = vpop.f32.mrb[64].mxu1  ;;  %v16780_v27 = vpop.f32.mrb[64].mxu0 }
 0x822   : > { %18386 = vst [vmem:[#allocation33_spill] sm:$0xff] %v16778_v13  ;;  %18387 = vst [vmem:[#allocation34_spill] sm:$0xff] %v16780_v27  ;;  %v14197_v5 = vpop.f32.mrb[65].mxu1  ;;  %v14202_v42 = vpop.f32.mrb[65].mxu0 }
 0x825   : > { %v16782_v38 = vpop.f32.mrb[66].mxu1  ;;  %v16784_v0 = vpop.f32.mrb[66].mxu0 }
 0x826   : > { %18388 = vst [vmem:[#allocation35_spill] sm:$0xff] %v16782_v38  ;;  %18389 = vst [vmem:[#allocation36_spill] sm:$0xff] %v16784_v0  ;;  %v14207_v50 = vpop.f32.mrb[67].mxu1  ;;  %v14212_v14 = vpop.f32.mrb[67].mxu0 }
 0x829   : > { %v16786_v35 = vpop.f32.mrb[68].mxu1  ;;  %v16788_v30 = vpop.f32.mrb[68].mxu0 }
 0x82a   : > { %18390 = vst [vmem:[#allocation37_spill] sm:$0xff] %v16786_v35  ;;  %18391 = vst [vmem:[#allocation38_spill] sm:$0xff] %v16788_v30  ;;  %v14217_v26 = vpop.f32.mrb[69].mxu1  ;;  %v14222_v51 = vpop.f32.mrb[69].mxu0 }
 0x82d   : > { %v16790_v18 = vpop.f32.mrb[70].mxu1 }
 0x82e   : > { %18392 = vst [vmem:[#allocation39_spill] sm:$0xff] %v16790_v18  ;;  %v14227_v56 = vpop.f32.mrb[71].mxu1 }
 0x834   : > { %v6675_v19 = vpop.f32.mrb[72].mxu1 }
 0x835   : > { %v7849_v9 = vmul.f32 0.35355338, %v6675_v19  ;;  %v14237_v40 = vpop.f32.mrb[73].mxu1 }
 0x837   : > { %v16795_v12 = vadd.f32 %v16792_v6, %v7849_v9 }
 0x838   : > { %v6831_v2 = vpop.f32.mrb[74].mxu1 }
 0x839   : > { %v7851_v43 = vmul.f32 0.35355338, %v6831_v2  ;;  %v14247_v53 = vpop.f32.mrb[75].mxu1  ;;  %v7881_v20 = vsel %vm1178_vm5, %v16795_v12, -inf }
 0x83a   : > { %7882 = vmax.xlane.f32.xlu0 %v7881_v20 }
 0x83b   : > { %v16800_v52 = vadd.f32 %v16792_v6, %v7851_v43 }
 0x83c   : > { %v6987_v24 = vpop.f32.mrb[76].mxu1 }
 0x83d   : > { %v14257_v41 = vpop.f32.mrb[77].mxu1  ;;  %v7887_v25 = vsel %vm1178_vm5, %v16800_v52, -inf  ;;  %v7853_v42 = vmul.f32 0.35355338, %v6987_v24 }
 0x83e   : > { %7888 = vmax.xlane.f32.xlu0 %v7887_v25 }
 0x83f   : > { %v16815_v19 = vadd.f32 %v16792_v6, %v7853_v42 }
 0x843   : > { %v7143_v17 = vpop.f32.mrb[78].mxu1 }
 0x844   : > { %v14267_v46 = vpop.f32.mrb[79].mxu1  ;;  %v7855_v9 = vmul.f32 0.35355338, %v7143_v17  ;;  %v7893_v17 = vsel %vm1178_vm5, %v16815_v19, -inf }
 0x846   : > { %v16823_v46 = vadd.f32 %v16792_v6, %v7855_v9 }
 0x84b   : > { %v7299_v57 = vpop.f32.mrb[80].mxu1 }
 0x84c   : > { %v16804_v16 = vpop.f32.mrb[70].mxu0  ;;  %v14277_v58 = vpop.f32.mrb[81].mxu1  ;;  %v7857_v24 = vmul.f32 0.35355338, %v7299_v57 }
 0x84d   : > { %18393 = vst [vmem:[#allocation40_spill] sm:$0xff] %v16804_v16  ;;  %v14232_v22 = vpop.f32.mrb[71].mxu0 }
 0x84e   : > { %v16833_v57 = vadd.f32 %v16792_v6, %v7857_v24 }
 0x850   : > { %v6753_v10 = vpop.f32.mrb[72].mxu0 }
 0x851   : > { %v7850_v37 = vmul.f32 0.35355338, %v6753_v10  ;;  %v14242_v15 = vpop.f32.mrb[73].mxu0 }
 0x853   : > { %v16807_v36 = vadd.f32 %v16792_v6, %v7850_v37  ;;  %v7455_v60 = vpop.f32.mrb[82].mxu1 }
 0x854   : > { %v6909_v3 = vpop.f32.mrb[74].mxu0  ;;  %v14287_v5 = vpop.f32.mrb[83].mxu1  ;;  %v7859_v15 = vmul.f32 0.35355338, %v7455_v60 }
 0x855   : > { %v7852_v50 = vmul.f32 0.35355338, %v6909_v3  ;;  %v14252_v14 = vpop.f32.mrb[75].mxu0  ;;  %v7884_v26 = vsel %vm1178_vm5, %v16807_v36, -inf }
 0x856   : > { %7885 = vmax.xlane.f32.xlu1 %v7884_v26  ;;  %v7899_v14 = vsel %vm1178_vm5, %v16823_v46, -inf  ;;  %v16843_v9 = vadd.f32 %v16792_v6, %v7859_v15 }
 0x857   : > { %v16812_v51 = vadd.f32 %v16792_v6, %v7852_v50 }
 0x858   : > { %v7065_v56 = vpop.f32.mrb[76].mxu0 }
 0x859   : > { %v7854_v40 = vmul.f32 0.35355338, %v7065_v56  ;;  %v14262_v2 = vpop.f32.mrb[77].mxu0  ;;  %v7890_v43 = vsel %vm1178_vm5, %v16812_v51, -inf }
 0x85a   : > { %7891 = vmax.xlane.f32.xlu0 %v7890_v43  ;;  %v7905_v2 = vsel %vm1178_vm5, %v16833_v57, -inf }
 0x85b   : > { %v16820_v53 = vadd.f32 %v16792_v6, %v7854_v40  ;;  %v7611_v20 = vpop.f32.mrb[84].mxu1 }
 0x85c   : > { %v7221_v41 = vpop.f32.mrb[78].mxu0  ;;  %v14297_v25 = vpop.f32.mrb[85].mxu1  ;;  %v7861_v43 = vmul.f32 0.35355338, %v7611_v20 }
 0x85d   : > { %v7856_v58 = vmul.f32 0.35355338, %v7221_v41  ;;  %v14272_v22 = vpop.f32.mrb[79].mxu0  ;;  %v7896_v10 = vsel %vm1178_vm5, %v16820_v53, -inf }
 0x85e   : > { %7894 = vmax.xlane.f32.xlu0 %v7893_v17  ;;  %7897 = vmax.xlane.f32.xlu1 %v7896_v10  ;;  %v7911_v17 = vsel %vm1178_vm5, %v16843_v9, -inf  ;;  %v16855_v10 = vadd.f32 %v16792_v6, %v7861_v43 }
 0x85f   : > { %v16830_v37 = vadd.f32 %v16792_v6, %v7856_v58 }
 0x860   : > { %v7377_v3 = vpop.f32.mrb[80].mxu0 }
 0x861   : > { %v7858_v5 = vmul.f32 0.35355338, %v7377_v3  ;;  %v14282_v42 = vpop.f32.mrb[81].mxu0  ;;  %v7902_v50 = vsel %vm1178_vm5, %v16830_v37, -inf }
 0x862   : > { %7903 = vmax.xlane.f32.xlu1 %v7902_v50  ;;  %7900 = vmax.xlane.f32.xlu0 %v7899_v14 }
 0x863   : > { %v16840_v26 = vadd.f32 %v16792_v6, %v7858_v5  ;;  %v7767_v56 = vpop.f32.mrb[86].mxu1 }
 0x864   : > { %v7533_v40 = vpop.f32.mrb[82].mxu0  ;;  %v14307_v60 = vpop.f32.mrb[87].mxu1  ;;  %v7863_v15 = vmul.f32 0.35355338, %v7767_v56  ;;  %v7917_v56 = vsel %vm1178_vm5, %v16855_v10, -inf }
 0x865   : > { %v7860_v24 = vmul.f32 0.35355338, %v7533_v40  ;;  %v14292_v41 = vpop.f32.mrb[83].mxu0  ;;  %v7908_v25 = vsel %vm1178_vm5, %v16840_v26, -inf }
 0x866   : > { %7909 = vmax.xlane.f32.xlu1 %v7908_v25  ;;  %7906 = vmax.xlane.f32.xlu0 %v7905_v2  ;;  %v16863_v14 = vadd.f32 %v16792_v6, %v7863_v15  ;;  %v16876_v25 = vpop.permute.xlu0 %8209 }
 0x867   : > { %v16850_v58 = vadd.f32 %v16792_v6, %v7860_v24 }
 0x868   : > { %v7689_v22 = vpop.f32.mrb[84].mxu0  ;;  %v7923_v41 = vsel %vm1178_vm5, %v16863_v14, -inf }
 0x869   : > { %v7862_v3 = vmul.f32 0.35355338, %v7689_v22  ;;  %v14302_v20 = vpop.f32.mrb[85].mxu0  ;;  %v7914_v5 = vsel %vm1178_vm5, %v16850_v58, -inf }
 0x86a   : > { %7915 = vmax.xlane.f32.xlu1 %v7914_v5  ;;  %7912 = vmax.xlane.f32.xlu0 %v7911_v17  ;;  %v16880_v22 = vpop.permute.xlu0 %8513  ;;  %v16886_v17 = vpop.permute.xlu1 %8285 }
 0x86b   : > { %v16860_v42 = vadd.f32 %v16792_v6, %v7862_v3 }
 0x86c   : > { %v7845_v50 = vpop.f32.mrb[86].mxu0 }
 0x86d   : > { %v7864_v40 = vmul.f32 0.35355338, %v7845_v50  ;;  %v14312_v60 = vpop.f32.mrb[87].mxu0  ;;  %v7920_v2 = vsel %vm1178_vm5, %v16860_v42, -inf }
 0x86e   : > { %7921 = vmax.xlane.f32.xlu1 %v7920_v2  ;;  %7918 = vmax.xlane.f32.xlu0 %v7917_v56  ;;  %v16890_v3 = vpop.permute.xlu1 %8361 }
 0x86f   : > { %v16870_v43 = vadd.f32 %v16792_v6, %v7864_v40  ;;  %v16884_v6 = vpop.permute.xlu0 %8665 }
 0x871   : > { %v7926_v24 = vsel %vm1178_vm5, %v16870_v43, -inf }
 0x872   : > { %7927 = vmax.xlane.f32.xlu1 %v7926_v24  ;;  %7924 = vmax.xlane.f32.xlu0 %v7923_v41  ;;  %v16894_v5 = vpop.permute.xlu1 %8437 }
 0x873   : > { %v16888_v15 = vpop.permute.xlu0 %8817 }
 0x876   : > { %v16898_v40 = vpop.permute.xlu1 %8589 }
 0x877   : > { %v16892_v20 = vpop.permute.xlu0 %8969 }
 0x87a   : > { %v16902_v2 = vpop.permute.xlu1 %8741 }
 0x87b   : > { %v16896_v50 = vpop.permute.xlu0 %9121 }
 0x87e   : > { %v16906_v24 = vpop.permute.xlu1 %8893 }
 0x87f   : > { %v16900_v60 = vpop.permute.xlu0 %9356 }
 0x882   : > { %v16910_v18 = vpop.permute.xlu1 %9045 }
 0x883   : > { %9902 = vrot.lane.b32.xlu1 %v15576_v59, %s15041_s24  ;;  %v16904_v56 = vpop.permute.xlu0 %9354 }
 0x886   : > { %v16914_v38 = vpop.permute.xlu1 %9197 }
 0x887   : > { %v16908_v41 = vpop.permute.xlu0 %9512 }
 0x888   : > { %9824 = vrot.lane.b32.xlu0 %v15564_v47, %s15041_s24  ;;  %18394 = vst [vmem:[#allocation41_spill] sm:$0xff] %v16908_v41 }
 0x88a   : > { %v16918_v23 = vpop.permute.xlu1 %9434 }
 0x88b   : > { %v16912_v35 = vpop.permute.xlu0 %9510 }
 0x88c   : > { %18395 = vst [vmem:[#allocation42_spill] sm:$0xff] %v16912_v35 }
 0x88e   : > { %v16922_v45 = vpop.permute.xlu1 %9432 }
 0x88f   : > { %v16916_v13 = vpop.permute.xlu0 %9668  ;;  %18398 = vst [vmem:[#allocation45_spill] sm:$0xff] %v16922_v45 }
 0x890   : > { %18396 = vst [vmem:[#allocation43_spill] sm:$0xff] %v16916_v13 }
 0x892   : > { %v16926_v8 = vpop.permute.xlu1 %9590 }
 0x893   : > { %v16920_v62 = vpop.permute.xlu0 %9666  ;;  %18399 = vst [vmem:[#allocation46_spill] sm:$0xff] %v16926_v8 }
 0x894   : > { %18397 = vst [vmem:[#allocation44_spill] sm:$0xff] %v16920_v62 }
 0x896   : > { %v16928_v49 = vpop.permute.xlu1 %9588 }
 0x897   : > { %18400 = vst [vmem:[#allocation47_spill] sm:$0xff] %v16928_v49 }
 0x89a   : > { %v16934_v13 = vpop.permute.xlu1 %9746 }
 0x89b   : > { %18401 = vst [vmem:[#allocation48_spill] sm:$0xff] %v16934_v13 }
 0x8c7   : > { %v7883_v4 = vpop.xlane.xlu0 %7882 }
 0x8c8   : > { %v7929_v16 = vsub.f32 %v16795_v12, %v7883_v4 }
 0x8ca   : > { %v7945_v30 = vmul.f32 1.442695, %v7929_v16 }
 0x8cb   : > { %v7889_v0 = vpop.xlane.xlu0 %7888 }
 0x8cc   : > { %14837 = vpow2.f32 %v7945_v30  ;;  %v7931_v27 = vsub.f32 %v16800_v52, %v7889_v0  ;;  %v16940_v0 = vpop.permute.xlu1 %9744 }
 0x8cd   : > { %18402 = vst [vmem:[#allocation49_spill] sm:$0xff] %v16940_v0 }
 0x8ce   : > { %v7949_v28 = vmul.f32 1.442695, %v7931_v27 }
 0x8d0   : > { %14839 = vpow2.f32 %v7949_v28 }
 0x8d6   : > { %v16930_v29 = vpop.eup %14837 }
 0x8d7   : > { %v7977_v62 = vsel %vm1178_vm5, %v16930_v29, 0.0 }
 0x8d8   : > { %7978 = vadd.xlane.f32.xlu0 %v7977_v62 }
 0x8da   : > { %v16936_v4 = vpop.eup %14839 }
 0x8db   : > { %v7983_v30 = vsel %vm1178_vm5, %v16936_v4, 0.0 }
 0x8dc   : > { %7984 = vadd.xlane.f32.xlu0 %v7983_v30 }
 0x8e3   : > { %v7886_v27 = vpop.xlane.xlu1 %7885 }
 0x8e4   : > { %v7930_v28 = vsub.f32 %v16807_v36, %v7886_v27 }
 0x8e6   : > { %v7947_v12 = vmul.f32 1.442695, %v7930_v28 }
 0x8e7   : > { %v7892_v52 = vpop.xlane.xlu0 %7891 }
 0x8e8   : > { %14841 = vpow2.f32 %v7947_v12  ;;  %v7932_v16 = vsub.f32 %v16812_v51, %v7892_v52 }
 0x8ea   : > { %v7951_v49 = vmul.f32 1.442695, %v7932_v16 }
 0x8eb   : > { %v7898_v62 = vpop.xlane.xlu1 %7897  ;;  %v7895_v35 = vpop.xlane.xlu0 %7894 }
 0x8ec   : > { %14843 = vpow2.f32 %v7951_v49  ;;  %v7934_v13 = vsub.f32 %v16820_v53, %v7898_v62  ;;  %v7933_v8 = vsub.f32 %v16815_v19, %v7895_v35 }
 0x8ee   : > { %v7955_v45 = vmul.f32 1.442695, %v7934_v13  ;;  %v7953_v30 = vmul.f32 1.442695, %v7933_v8 }
 0x8ef   : > { %v7904_v41 = vpop.xlane.xlu1 %7903  ;;  %v7901_v0 = vpop.xlane.xlu0 %7900 }
 0x8f0   : > { %14845 = vpow2.f32 %v7955_v45  ;;  %v7936_v36 = vsub.f32 %v16830_v37, %v7904_v41  ;;  %v7935_v27 = vsub.f32 %v16823_v46, %v7901_v0 }
 0x8f1   : > { %14847 = vpow2.f32 %v7953_v30 }
 0x8f2   : > { %v16948_v28 = vpop.eup %14841  ;;  %v7959_v51 = vmul.f32 1.442695, %v7936_v36  ;;  %v7957_v12 = vmul.f32 1.442695, %v7935_v27 }
 0x8f3   : > { %v7910_v52 = vpop.xlane.xlu1 %7909  ;;  %v7907_v49 = vpop.xlane.xlu0 %7906  ;;  %v7980_v53 = vsel %vm1178_vm5, %v16948_v28, 0.0 }
 0x8f4   : > { %14849 = vpow2.f32 %v7959_v51  ;;  %v7938_v8 = vsub.f32 %v16840_v26, %v7910_v52  ;;  %v7937_v13 = vsub.f32 %v16833_v57, %v7907_v49  ;;  %7981 = vadd.xlane.f32.xlu1 %v7980_v53 }
 0x8f5   : > { %14851 = vpow2.f32 %v7957_v12 }
 0x8f6   : > { %v16954_v45 = vpop.eup %14843  ;;  %v7963_v35 = vmul.f32 1.442695, %v7938_v8  ;;  %v7961_v19 = vmul.f32 1.442695, %v7937_v13 }
 0x8f7   : > { %v7916_v46 = vpop.xlane.xlu1 %7915  ;;  %v7913_v37 = vpop.xlane.xlu0 %7912  ;;  %v7986_v41 = vsel %vm1178_vm5, %v16954_v45, 0.0 }
 0x8f8   : > { %14853 = vpow2.f32 %v7963_v35  ;;  %v7940_v0 = vsub.f32 %v16850_v58, %v7916_v46  ;;  %v7939_v16 = vsub.f32 %v16843_v9, %v7913_v37  ;;  %7987 = vadd.xlane.f32.xlu1 %v7986_v41 }
 0x8f9   : > { %14855 = vpow2.f32 %v7961_v19 }
 0x8fa   : > { %v16960_v26 = vpop.eup %14845  ;;  %v7967_v57 = vmul.f32 1.442695, %v7940_v0  ;;  %v7965_v62 = vmul.f32 1.442695, %v7939_v16 }
 0x8fb   : > { %v16962_v30 = vpop.eup %14847  ;;  %v7919_v36 = vpop.xlane.xlu0 %7918  ;;  %v7992_v27 = vsel %vm1178_vm5, %v16960_v26, 0.0 }
 0x8fc   : > { %14857 = vpow2.f32 %v7967_v57  ;;  %v7941_v51 = vsub.f32 %v16855_v10, %v7919_v36  ;;  %7993 = vadd.xlane.f32.xlu1 %v7992_v27  ;;  %v7989_v58 = vsel %vm1178_vm5, %v16962_v30, 0.0  ;;  %v7922_v57 = vpop.xlane.xlu1 %7921 }
 0x8fd   : > { %14859 = vpow2.f32 %v7965_v62  ;;  %7990 = vadd.xlane.f32.xlu0 %v7989_v58  ;;  %v7942_v62 = vsub.f32 %v16860_v42, %v7922_v57 }
 0x8fe   : > { %v16969_v9 = vpop.eup %14849  ;;  %v7969_v12 = vmul.f32 1.442695, %v7941_v51 }
 0x8ff   : > { %v16971_v52 = vpop.eup %14851  ;;  %v7998_v49 = vsel %vm1178_vm5, %v16969_v9, 0.0  ;;  %v7925_v36 = vpop.xlane.xlu0 %7924  ;;  %v7971_v51 = vmul.f32 1.442695, %v7942_v62 }
 0x900   : > { %7999 = vadd.xlane.f32.xlu1 %v7998_v49  ;;  %v7995_v53 = vsel %vm1178_vm5, %v16971_v52, 0.0  ;;  %14861 = vpow2.f32 %v7969_v12  ;;  %v7928_v27 = vpop.xlane.xlu1 %7927  ;;  %v7943_v58 = vsub.f32 %v16863_v14, %v7925_v36 }
 0x901   : > { %7996 = vadd.xlane.f32.xlu0 %v7995_v53  ;;  %v7944_v12 = vsub.f32 %v16870_v43, %v7928_v27  ;;  %14863 = vpow2.f32 %v7971_v51 }
 0x902   : > { %v16977_v10 = vpop.eup %14853  ;;  %v7973_v49 = vmul.f32 1.442695, %v7943_v58 }
 0x903   : > { %v16979_v8 = vpop.eup %14855  ;;  %v8004_v13 = vsel %vm1178_vm5, %v16977_v10, 0.0  ;;  %v7975_v53 = vmul.f32 1.442695, %v7944_v12 }
 0x904   : > { %8005 = vadd.xlane.f32.xlu1 %v8004_v13  ;;  %v8001_v35 = vsel %vm1178_vm5, %v16979_v8, 0.0  ;;  %14865 = vpow2.f32 %v7973_v49 }
 0x905   : > { %8002 = vadd.xlane.f32.xlu0 %v8001_v35  ;;  %14867 = vpow2.f32 %v7975_v53 }
 0x906   : > { %v16985_v19 = vpop.eup %14857 }
 0x907   : > { %v16987_v46 = vpop.eup %14859  ;;  %v8010_v37 = vsel %vm1178_vm5, %v16985_v19, 0.0 }
 0x908   : > { %8011 = vadd.xlane.f32.xlu1 %v8010_v37  ;;  %v8007_v41 = vsel %vm1178_vm5, %v16987_v46, 0.0 }
 0x909   : > { %8008 = vadd.xlane.f32.xlu0 %v8007_v41  ;;  %v17030_v41 = vpop.permute.xlu0 %9824 }
 0x90a   : > { %v16993_v0 = vpop.eup %14861 }
 0x90b   : > { %v8013_v16 = vsel %vm1178_vm5, %v16993_v0, 0.0  ;;  %v17004_v13 = vpop.eup %14863 }
 0x90c   : > { %v8016_v35 = vsel %vm1178_vm5, %v17004_v13, 0.0 }
 0x90d   : > { %8014 = vadd.xlane.f32.xlu0 %v8013_v16 }
 0x90e   : > { %v17008_v37 = vpop.eup %14865 }
 0x90f   : > { %v17010_v42 = vpop.eup %14867  ;;  %v8019_v14 = vsel %vm1178_vm5, %v17008_v37, 0.0 }
 0x910   : > { %v8022_v43 = vsel %vm1178_vm5, %v17010_v42, 0.0 }
 0x919   : > { %9900 = vrot.lane.b32.xlu1 %v15576_v59, %s15042_s19 }
 0x923   : > { %9822 = vrot.lane.b32.xlu0 %v15564_v47, %s15042_s19 }
 0x93d   : > { %8017 = vadd.xlane.f32.xlu1 %v8016_v35 }
 0x941   : > { %8020 = vadd.xlane.f32.xlu1 %v8019_v14 }
 0x942   : > { %8023 = vadd.xlane.f32.xlu0 %v8022_v43 }
 0x952   : > { %10058 = vrot.lane.b32.xlu1 %v15584_v31, %s15041_s24 }
 0x956   : > { %10056 = vrot.lane.b32.xlu1 %v15584_v31, %s15042_s19 }
 0x958   : > { %9980 = vrot.lane.b32.xlu0 %v15572_v54, %s15041_s24 }
 0x95a   : > { %10214 = vrot.lane.b32.xlu1 %v15592_v32, %s15041_s24 }
 0x95c   : > { %9978 = vrot.lane.b32.xlu0 %v15572_v54, %s15042_s19 }
 0x95e   : > { %10212 = vrot.lane.b32.xlu1 %v15592_v32, %s15042_s19 }
 0x960   : > { %10136 = vrot.lane.b32.xlu0 %v15580_v61, %s15041_s24 }
 0x962   : > { %10370 = vrot.lane.b32.xlu1 %v15600_v44, %s15041_s24 }
 0x964   : > { %10134 = vrot.lane.b32.xlu0 %v15580_v61, %s15042_s19 }
 0x965   : > { %v7979_v16 = vpop.xlane.xlu0 %7978 }
 0x966   : > { %14869 = vrcp.f32 %v7979_v16  ;;  %10368 = vrot.lane.b32.xlu1 %v15600_v44, %s15042_s19 }
 0x968   : > { %10292 = vrot.lane.b32.xlu0 %v15588_v63, %s15041_s24 }
 0x969   : > { %v7985_v57 = vpop.xlane.xlu0 %7984 }
 0x96a   : > { %14871 = vrcp.f32 %v7985_v57  ;;  %10526 = vrot.lane.b32.xlu1 %v15606_v1, %s15041_s24 }
 0x96c   : > { %10290 = vrot.lane.b32.xlu0 %v15588_v63, %s15042_s19 }
 0x96e   : > { %10524 = vrot.lane.b32.xlu1 %v15606_v1, %s15042_s19 }
 0x970   : > { %v14870_v62 = vpop.eup %14869  ;;  %10448 = vrot.lane.b32.xlu0 %v15596_v7, %s15041_s24  ;;  %s18449_s24 = sld [smem:[#allocation54_spill]] (!%p13574_p6) }
 0x971   : > { %v8041_v36 = vmul.f32 %v14870_v62, %v16930_v29 }
 0x972   : > { %10886 = vrot.lane.b32.xlu1 %v15548_v33, %s15043_s20  ;;  %v17072_v33 = vpop.permute.xlu1 %9902 }
 0x973   : > { %14316 = vmatmul.mubr.msk.f32.vlgmr.msra.gmra.mrb[88].mxu1 %vm1178_vm5, %v8041_v36 }
 0x974   : > { %v14872_v27 = vpop.eup %14871  ;;  %14324 = vmatpush3.msra.mxu1 %v16876_v25  ;;  %10446 = vrot.lane.b32.xlu0 %v15596_v7, %s15042_s19  ;;  %s18446_s19 = sld [smem:[#allocation52_spill]] (!%p13574_p6) }
 0x975   : > { %14325 = vmatprep.mubr.msk.f32.mxu1 %vm15032_vm4, %v18361_v55  ;;  %14333 = vmatprep.subr.mxu1 %v18361_v55  ;;  %v8043_v51 = vmul.f32 %v14872_v27, %v16936_v4 }
 0x976   : > { %11038 = vrot.lane.b32.xlu1 %v15560_v21, %s15043_s20 }
 0x977   : > { %14326 = vmatmul.mubr.msk.f32.vlgmr.msra.gmra.mrb[90].mxu1 %vm1178_vm5, %v8043_v51 }
 0x978   : > { %14334 = vmatpush3.msra.mxu1 %v16890_v3  ;;  %10810 = vrot.lane.b32.xlu0 %v15546_v11, %s15043_s20 }
 0x979   : > { %14335 = vmatprep.mubr.msk.f32.mxu1 %vm15032_vm4, %v18361_v55  ;;  %14343 = vmatprep.subr.mxu1 %v18361_v55 }
 0x97a   : > { %11114 = vrot.lane.b32.xlu1 %v15556_v39, %s15043_s20 }
 0x97c   : > { %10962 = vrot.lane.b32.xlu0 %v15554_v34, %s15043_s20 }
 0x97e   : > { %11190 = vrot.lane.b32.xlu1 %v15568_v48, %s15043_s20 }
 0x980   : > { %11266 = vrot.lane.b32.xlu0 %v15564_v47, %s15043_s20 }
 0x981   : > { %v7982_v11 = vpop.xlane.xlu1 %7981 }
 0x982   : > { %14873 = vrcp.f32 %v7982_v11  ;;  %11342 = vrot.lane.b32.xlu1 %v15576_v59, %s15043_s20 }
 0x984   : > { %11418 = vrot.lane.b32.xlu0 %v15572_v54, %s15043_s20 }
 0x985   : > { %v7988_v39 = vpop.xlane.xlu1 %7987 }
 0x986   : > { %14875 = vrcp.f32 %v7988_v39  ;;  %11494 = vrot.lane.b32.xlu1 %v15584_v31, %s15043_s20 }
 0x989   : > { %v7994_v34 = vpop.xlane.xlu1 %7993 }
 0x98a   : > { %14877 = vrcp.f32 %v7994_v34  ;;  %v7991_v21 = vpop.xlane.xlu0 %7990  ;;  %v18405_v34 = vld [vmem:[#allocation46_spill] sm:$0xff] }
 0x98b   : > { %14879 = vrcp.f32 %v7991_v21 }
 0x98c   : > { %v14874_v48 = vpop.eup %14873 }
 0x98d   : > { %v8000_v29 = vpop.xlane.xlu1 %7999  ;;  %v8042_v47 = vmul.f32 %v14874_v48, %v16948_v28  ;;  %v18408_v48 = vld [vmem:[#allocation47_spill] sm:$0xff] }
 0x98e   : > { %14881 = vrcp.f32 %v8000_v29  ;;  %v7997_v25 = vpop.xlane.xlu0 %7996  ;;  %v18409_v29 = vld [vmem:[#allocation48_spill] sm:$0xff] }
 0x98f   : > { %14883 = vrcp.f32 %v7997_v25  ;;  %14321 = vmatmul.mubr.msk.f32.vlgmr.msra.gmra.mrb[88].mxu0 %vm1178_vm5, %v8042_v47  ;;  %v18410_v47 = vld [vmem:[#allocation44_spill] sm:$0xff] }
 0x990   : > { %v14876_v59 = vpop.eup %14875  ;;  %14329 = vmatpush3.msra.mxu0 %v16886_v17  ;;  %14330 = vmatprep.mubr.msk.f32.mxu0 %vm15032_vm4, %v18361_v55 }
 0x991   : > { %v8006_v54 = vpop.xlane.xlu1 %8005  ;;  %14338 = vmatprep.subr.mxu0 %v18361_v55  ;;  %v8044_v31 = vmul.f32 %v14876_v59, %v16954_v45  ;;  %v18411_v59 = vld [vmem:[#allocation49_spill] sm:$0xff] }
 0x992   : > { %14885 = vrcp.f32 %v8006_v54  ;;  %v8003_v3 = vpop.xlane.xlu0 %8002 }
 0x993   : > { %14887 = vrcp.f32 %v8003_v3  ;;  %14331 = vmatmul.mubr.msk.f32.vlgmr.msra.gmra.mrb[90].mxu0 %vm1178_vm5, %v8044_v31 }
 0x994   : > { %v14878_v4 = vpop.eup %14877  ;;  %14339 = vmatpush3.msra.mxu0 %v16894_v5  ;;  %14340 = vmatprep.mubr.msk.f32.mxu0 %vm15032_vm4, %v18361_v55 }
 0x995   : > { %v14880_v17 = vpop.eup %14879  ;;  %v8012_v28 = vpop.xlane.xlu1 %8011  ;;  %14348 = vmatprep.subr.mxu0 %v18361_v55  ;;  %v8046_v58 = vmul.f32 %v14878_v4, %v16960_v26 }
 0x996   : > { %14889 = vrcp.f32 %v8012_v28  ;;  %v8009_v12 = vpop.xlane.xlu0 %8008  ;;  %v8045_v45 = vmul.f32 %v14880_v17, %v16962_v30 }
 0x997   : > { %14891 = vrcp.f32 %v8009_v12  ;;  %14341 = vmatmul.mubr.msk.f32.vlgmr.msra.gmra.mrb[92].mxu0 %vm1178_vm5, %v8046_v58 }
 0x998   : > { %v14882_v49 = vpop.eup %14881  ;;  %14336 = vmatmul.mubr.msk.f32.vlgmr.msra.gmra.mrb[92].mxu1 %vm1178_vm5, %v8045_v45  ;;  %14349 = vmatpush3.msra.mxu0 %v16898_v40 }
 0x999   : > { %v14884_v5 = vpop.eup %14883  ;;  %14344 = vmatpush3.msra.mxu1 %v16880_v22  ;;  %14345 = vmatprep.mubr.msk.f32.mxu1 %vm15032_vm4, %v18361_v55  ;;  %v8048_v26 = vmul.f32 %v14882_v49, %v16969_v9 }
 0x99a   : > { %v8015_v53 = vpop.xlane.xlu0 %8014  ;;  %14350 = vmatprep.mubr.msk.f32.mxu0 %vm15032_vm4, %v18361_v55  ;;  %14353 = vmatprep.subr.mxu1 %v18361_v55  ;;  %v8047_v30 = vmul.f32 %v14884_v5, %v16971_v52 }
 0x99b   : > { %14893 = vrcp.f32 %v8015_v53  ;;  %14358 = vmatprep.subr.mxu0 %v18361_v55  ;;  %14351 = vmatmul.mubr.msk.f32.vlgmr.msra.gmra.mrb[94].mxu0 %vm1178_vm5, %v8048_v26 }
 0x99c   : > { %v14886_v40 = vpop.eup %14885  ;;  %14346 = vmatmul.mubr.msk.f32.vlgmr.msra.gmra.mrb[94].mxu1 %vm1178_vm5, %v8047_v30  ;;  %14359 = vmatpush3.msra.mxu0 %v16902_v2 }
 0x99d   : > { %v14888_v22 = vpop.eup %14887  ;;  %14354 = vmatpush3.msra.mxu1 %v16884_v6  ;;  %14355 = vmatprep.mubr.msk.f32.mxu1 %vm15032_vm4, %v18361_v55  ;;  %v8050_v9 = vmul.f32 %v14886_v40, %v16977_v10 }
 0x99e   : > { %14360 = vmatprep.mubr.msk.f32.mxu0 %vm15032_vm4, %v18361_v55  ;;  %14363 = vmatprep.subr.mxu1 %v18361_v55  ;;  %v8049_v52 = vmul.f32 %v14888_v22, %v16979_v8 }
 0x99f   : > { %14368 = vmatprep.subr.mxu0 %v18361_v55  ;;  %14361 = vmatmul.mubr.msk.f32.vlgmr.msra.gmra.mrb[96].mxu0 %vm1178_vm5, %v8050_v9 }
 0x9a0   : > { %v14890_v2 = vpop.eup %14889  ;;  %14356 = vmatmul.mubr.msk.f32.vlgmr.msra.gmra.mrb[96].mxu1 %vm1178_vm5, %v8049_v52  ;;  %14369 = vmatpush3.msra.mxu0 %v16906_v24 }
 0x9a1   : > { %v14892_v6 = vpop.eup %14891  ;;  %14364 = vmatpush3.msra.mxu1 %v16888_v15  ;;  %14365 = vmatprep.mubr.msk.f32.mxu1 %vm15032_vm4, %v18361_v55  ;;  %v8052_v10 = vmul.f32 %v14890_v2, %v16985_v19  ;;  %v9823_v19 = vpop.permute.xlu0 %9822 }
 0x9a2   : > { %14370 = vmatprep.mubr.msk.f32.mxu0 %vm15032_vm4, %v18361_v55  ;;  %14373 = vmatprep.subr.mxu1 %v18361_v55  ;;  %v8051_v8 = vmul.f32 %v14892_v6, %v16987_v46 }
 0x9a3   : > { %14378 = vmatprep.subr.mxu0 %v18361_v55  ;;  %14371 = vmatmul.mubr.msk.f32.vlgmr.msra.gmra.mrb[98].mxu0 %vm1178_vm5, %v8052_v10 }
 0x9a4   : > { %14366 = vmatmul.mubr.msk.f32.vlgmr.msra.gmra.mrb[98].mxu1 %vm1178_vm5, %v8051_v8  ;;  %14379 = vmatpush3.msra.mxu0 %v16910_v18  ;;  %v17150_v18 = vpop.permute.xlu1 %9900 }
 0x9a5   : > { %v14894_v15 = vpop.eup %14893  ;;  %14374 = vmatpush3.msra.mxu1 %v16892_v20  ;;  %14375 = vmatprep.mubr.msk.f32.mxu1 %vm15032_vm4, %v18361_v55 }
 0x9a6   : > { %14383 = vmatprep.subr.mxu1 %v18361_v55  ;;  %v8053_v24 = vmul.f32 %v14894_v15, %v16993_v0  ;;  %14380 = vmatprep.mubr.msk.f32.mxu0 %vm15032_vm4, %v18361_v55 }
 0x9a7   : > { %14388 = vmatprep.subr.mxu0 %v18361_v55 }
 0x9a8   : > { %14376 = vmatmul.mubr.msk.f32.vlgmr.msra.gmra.mrb[100].mxu1 %vm1178_vm5, %v8053_v24 }
 0x9a9   : > { %14384 = vmatpush3.msra.mxu1 %v16896_v50  ;;  %14385 = vmatprep.mubr.msk.f32.mxu1 %vm15032_vm4, %v18361_v55 }
 0x9aa   : > { %14393 = vmatprep.subr.mxu1 %v18361_v55 }
 0x9ca   : > { %v8018_v20 = vpop.xlane.xlu1 %8017 }
 0x9cb   : > { %14895 = vrcp.f32 %v8018_v20 }
 0x9ce   : > { %v8021_v46 = vpop.xlane.xlu1 %8020 }
 0x9cf   : > { %14897 = vrcp.f32 %v8021_v46  ;;  %v8024_v0 = vpop.xlane.xlu0 %8023 }
 0x9d0   : > { %14899 = vrcp.f32 %v8024_v0 }
 0x9d2   : > { %v10059_v35 = vpop.permute.xlu1 %10058 }
 0x9d3   : > { %v9981_v14 = vpop.permute.xlu0 %9980 }
 0x9d5   : > { %v14896_v43 = vpop.eup %14895 }
 0x9d6   : > { %v17152_v16 = vpop.permute.xlu1 %10056  ;;  %v8054_v50 = vmul.f32 %v14896_v43, %v17004_v13 }
 0x9d7   : > { %v9979_v57 = vpop.permute.xlu0 %9978 }
 0x9d8   : > { %14381 = vmatmul.mubr.msk.f32.vlgmr.msra.gmra.mrb[100].mxu0 %vm1178_vm5, %v8054_v50 }
 0x9d9   : > { %v14898_v62 = vpop.eup %14897  ;;  %14389 = vmatpush3.msra.mxu0 %v16914_v38  ;;  %14390 = vmatprep.mubr.msk.f32.mxu0 %vm15032_vm4, %v18361_v55 }
 0x9da   : > { %v14900_v36 = vpop.eup %14899  ;;  %v8055_v27 = vmul.f32 %v14898_v62, %v17008_v37  ;;  %14398 = vmatprep.subr.mxu0 %v18361_v55  ;;  %v10215_v51 = vpop.permute.xlu1 %10214  ;;  %v18403_v37 = vld [vmem:[#allocation41_spill] sm:$0xff] }
 0x9db   : > { %v10137_v11 = vpop.permute.xlu0 %10136  ;;  %v8056_v39 = vmul.f32 %v14900_v36, %v17010_v42 }
 0x9dc   : > { %14386 = vmatmul.mubr.msk.f32.vlgmr.msra.gmra.mrb[102].mxu1 %vm1178_vm5, %v8055_v27 }
 0x9dd   : > { %14391 = vmatmul.mubr.msk.f32.vlgmr.msra.gmra.mrb[102].mxu0 %vm1178_vm5, %v8056_v39  ;;  %14394 = vmatpush3.xpose.msk.msra.mxu1 %vm1178_vm5, %v16900_v60  ;;  %v18404_v60 = vld [vmem:[#allocation45_spill] sm:$0xff]  ;;  %v17298_v39 = vld [vmem:[#allocation4] sm:$0xff] }
 0x9de   : > { %14395 = vmatprep.mubr.msk.f32.mxu1 %vm15032_vm4, %v18361_v55  ;;  %14403 = vmatprep.subr.mxu1 %v18361_v55  ;;  %v10213_v13 = vpop.permute.xlu1 %10212 }
 0x9df   : > { %v10135_v38 = vpop.permute.xlu0 %10134  ;;  %14400 = vmatprep.mubr.msk.f32.mxu0 %vm15032_vm4, %v18361_v55 }
 0x9e0   : > { %14399 = vmatpush3.xpose.msk.msra.mxu0 %vm1178_vm5, %v16918_v23  ;;  %14396 = vmatmul.mubr.msk.f32.vlgmr.msra.gmra.mrb[104].mxu1 %vm1178_vm5, %v16904_v56  ;;  %v18406_v23 = vld [vmem:[#allocation42_spill] sm:$0xff]  ;;  %v18407_v56 = vld [vmem:[#allocation43_spill] sm:$0xff] }
 0x9e1   : > { %14404 = vmatpush3.xpose.msk.msra.mxu1 %vm1178_vm5, %v18403_v37  ;;  %14408 = vmatprep.subr.mxu0 %v18361_v55 }
 0x9e2   : > { %14405 = vmatprep.mubr.msk.f32.mxu1 %vm15032_vm4, %v18361_v55  ;;  %14413 = vmatprep.subr.mxu1 %v18361_v55  ;;  %v10371_v21 = vpop.permute.xlu1 %10370 }
 0x9e3   : > { %14401 = vmatmul.mubr.msk.f32.vlgmr.msra.gmra.mrb[104].mxu0 %vm1178_vm5, %v18404_v60  ;;  %v10293_v42 = vpop.permute.xlu0 %10292 }
 0x9e4   : > { %14409 = vmatpush3.xpose.msk.msra.mxu0 %vm1178_vm5, %v18405_v34  ;;  %14406 = vmatmul.mubr.msk.f32.vlgmr.msra.gmra.mrb[106].mxu1 %vm1178_vm5, %v18406_v23 }
 0x9e5   : > { %14414 = vmatpush3.xpose.msk.msra.mxu1 %vm1178_vm5, %v18407_v56  ;;  %14410 = vmatprep.mubr.msk.f32.mxu0 %vm15032_vm4, %v18361_v55 }
 0x9e6   : > { %14418 = vmatprep.subr.mxu0 %v18361_v55  ;;  %14415 = vmatprep.mubr.msk.f32.mxu1 %vm15032_vm4, %v18361_v55 }
 0x9e7   : > { %14411 = vmatmul.mubr.msk.f32.vlgmr.msra.gmra.mrb[106].mxu0 %vm1178_vm5, %v18408_v48  ;;  %14423 = vmatprep.subr.mxu1 %v18361_v55  ;;  %v10291_v25 = vpop.permute.xlu0 %10290 }
 0x9e8   : > { %14419 = vmatpush3.xpose.msk.msra.mxu0 %vm1178_vm5, %v18409_v29  ;;  %14416 = vmatmul.mubr.msk.f32.vlgmr.msra.gmra.mrb[108].mxu1 %vm1178_vm5, %v18410_v47 }
 0x9e9   : > { %14424 = vmatpush3.xpose.msk.msra.mxu1 %vm1178_vm5, %v17030_v41  ;;  %14420 = vmatprep.mubr.msk.f32.mxu0 %vm15032_vm4, %v18361_v55  ;;  %v10369_v41 = vpop.permute.xlu1 %10368 }
 0x9ea   : > { %14428 = vmatprep.subr.mxu0 %v18361_v55  ;;  %14425 = vmatprep.mubr.msk.f32.mxu1 %vm15032_vm4, %v18361_v55 }
 0x9eb   : > { %14421 = vmatmul.mubr.msk.f32.vlgmr.msra.gmra.mrb[108].mxu0 %vm1178_vm5, %v18411_v59  ;;  %14433 = vmatprep.subr.mxu1 %v18361_v55  ;;  %v10449_v54 = vpop.permute.xlu0 %10448 }
 0x9ec   : > { %14429 = vmatpush3.xpose.msk.msra.mxu0 %vm1178_vm5, %v17072_v33  ;;  %14426 = vmatmul.mubr.msk.f32.vlgmr.msra.gmra.mrb[110].mxu1 %vm1178_vm5, %v9823_v19 }
 0x9ed   : > { %14434 = vmatpush3.xpose.msk.msra.mxu1 %vm1178_vm5, %v9981_v14  ;;  %14430 = vmatprep.mubr.msk.f32.mxu0 %vm15032_vm4, %v18361_v55  ;;  %v10527_v33 = vpop.permute.xlu1 %10526 }
 0x9ee   : > { %14438 = vmatprep.subr.mxu0 %v18361_v55  ;;  %14435 = vmatprep.mubr.msk.f32.mxu1 %vm15032_vm4, %v18361_v55 }
 0x9ef   : > { %14431 = vmatmul.mubr.msk.f32.vlgmr.msra.gmra.mrb[110].mxu0 %vm1178_vm5, %v17150_v18  ;;  %14443 = vmatprep.subr.mxu1 %v18361_v55  ;;  %v10447_v31 = vpop.permute.xlu0 %10446 }
 0x9f0   : > { %14439 = vmatpush3.xpose.msk.msra.mxu0 %vm1178_vm5, %v10059_v35  ;;  %14436 = vmatmul.mubr.msk.f32.vlgmr.msra.gmra.mrb[112].mxu1 %vm1178_vm5, %v9979_v57 }
 0x9f1   : > { %14444 = vmatpush3.xpose.msk.msra.mxu1 %vm1178_vm5, %v10137_v11  ;;  %14440 = vmatprep.mubr.msk.f32.mxu0 %vm15032_vm4, %v18361_v55  ;;  %v10525_v3 = vpop.permute.xlu1 %10524 }
 0x9f2   : > { %14448 = vmatprep.subr.mxu0 %v18361_v55  ;;  %14445 = vmatprep.mubr.msk.f32.mxu1 %vm15032_vm4, %v18361_v55 }
 0x9f3   : > { %14441 = vmatmul.mubr.msk.f32.vlgmr.msra.gmra.mrb[112].mxu0 %vm1178_vm5, %v17152_v16  ;;  %14453 = vmatprep.subr.mxu1 %v18361_v55  ;;  %v10811_v4 = vpop.permute.xlu0 %10810 }
 0x9f4   : > { %14449 = vmatpush3.xpose.msk.msra.mxu0 %vm1178_vm5, %v10215_v51  ;;  %14446 = vmatmul.mubr.msk.f32.vlgmr.msra.gmra.mrb[114].mxu1 %vm1178_vm5, %v10135_v38 }
 0x9f5   : > { %14454 = vmatpush3.xpose.msk.msra.mxu1 %vm1178_vm5, %v10293_v42  ;;  %14450 = vmatprep.mubr.msk.f32.mxu0 %vm15032_vm4, %v18361_v55  ;;  %v10887_v17 = vpop.permute.xlu1 %10886 }
 0x9f6   : > { %14458 = vmatprep.subr.mxu0 %v18361_v55  ;;  %14455 = vmatprep.mubr.msk.f32.mxu1 %vm15032_vm4, %v18361_v55 }
 0x9f7   : > { %14451 = vmatmul.mubr.msk.f32.vlgmr.msra.gmra.mrb[114].mxu0 %vm1178_vm5, %v10213_v13  ;;  %14463 = vmatprep.subr.mxu1 %v18361_v55 }
 0x9f8   : > { %14459 = vmatpush3.xpose.msk.msra.mxu0 %vm1178_vm5, %v10371_v21  ;;  %14456 = vmatmul.mubr.msk.f32.vlgmr.msra.gmra.mrb[116].mxu1 %vm1178_vm5, %v10291_v25 }
 0x9f9   : > { %14464 = vmatpush3.xpose.msk.msra.mxu1 %vm1178_vm5, %v10449_v54  ;;  %14460 = vmatprep.mubr.msk.f32.mxu0 %vm15032_vm4, %v18361_v55 }
 0x9fa   : > { %14468 = vmatprep.subr.mxu0 %v18361_v55  ;;  %14465 = vmatprep.mubr.msk.f32.mxu1 %vm15032_vm4, %v18361_v55 }
 0x9fb   : > { %14461 = vmatmul.mubr.msk.f32.vlgmr.msra.gmra.mrb[116].mxu0 %vm1178_vm5, %v10369_v41  ;;  %14473 = vmatprep.subr.mxu1 %v18361_v55 }
 0x9fc   : > { %14469 = vmatpush3.xpose.msk.msra.mxu0 %vm1178_vm5, %v10527_v33  ;;  %14466 = vmatmul.mubr.msk.f32.vlgmr.msra.gmra.mrb[118].mxu1 %vm1178_vm5, %v10447_v31 }
 0x9fd   : > { %14474 = vmatpush3.msra.mxu1 %v10811_v4  ;;  %14470 = vmatprep.mubr.msk.f32.mxu0 %vm15032_vm4, %v18361_v55 }
 0x9fe   : > { %14478 = vmatprep.subr.mxu0 %v18361_v55  ;;  %14475 = vmatprep.mubr.msk.f32.mxu1 %vm15032_vm4, %v18361_v55 }
 0x9ff   : > { %14471 = vmatmul.mubr.msk.f32.vlgmr.msra.gmra.mrb[118].mxu0 %vm1178_vm5, %v10525_v3  ;;  %14483 = vmatprep.subr.mxu1 %v18361_v55 }
 0xa00   : > { %14479 = vmatpush3.msra.mxu0 %v10887_v17  ;;  %14480 = vmatprep.mubr.msk.f32.mxu0 %vm15032_vm4, %v18361_v55 }
 0xa01   : > { %14488 = vmatprep.subr.mxu0 %v18361_v55 }
 0xa46   : > { %v17266_v28 = vpop.f32.mrb[88].mxu1 }
 0xa47   : > { %v14317_v58 = vpop.f32.mrb[89].mxu1 }
 0xa4a   : > { %v17268_v12 = vpop.f32.mrb[90].mxu1 }
 0xa4b   : > { %v14327_v45 = vpop.f32.mrb[91].mxu1 }
 0xa62   : > { %v17270_v49 = vpop.f32.mrb[88].mxu0 }
 0xa63   : > { %v14322_v5 = vpop.f32.mrb[89].mxu0 }
 0xa66   : > { %v17272_v26 = vpop.f32.mrb[90].mxu0 }
 0xa67   : > { %v14332_v53 = vpop.f32.mrb[91].mxu0 }
 0xa6a   : > { %v17274_v30 = vpop.f32.mrb[92].mxu0 }
 0xa6b   : > { %v17276_v40 = vpop.f32.mrb[92].mxu1  ;;  %v14342_v22 = vpop.f32.mrb[93].mxu0 }
 0xa6c   : > { %v14337_v9 = vpop.f32.mrb[93].mxu1 }
 0xa6e   : > { %v17278_v52 = vpop.f32.mrb[94].mxu0 }
 0xa6f   : > { %v17280_v2 = vpop.f32.mrb[94].mxu1  ;;  %v14352_v6 = vpop.f32.mrb[95].mxu0 }
 0xa70   : > { %v14347_v10 = vpop.f32.mrb[95].mxu1 }
 0xa72   : > { %v17282_v8 = vpop.f32.mrb[96].mxu0 }
 0xa73   : > { %v17284_v15 = vpop.f32.mrb[96].mxu1  ;;  %v14362_v24 = vpop.f32.mrb[97].mxu0 }
 0xa74   : > { %v14357_v18 = vpop.f32.mrb[97].mxu1 }
 0xa76   : > { %v17286_v20 = vpop.f32.mrb[98].mxu0 }
 0xa77   : > { %v17288_v19 = vpop.f32.mrb[98].mxu1  ;;  %v14372_v46 = vpop.f32.mrb[99].mxu0 }
 0xa78   : > { %v14367_v0 = vpop.f32.mrb[99].mxu1 }
 0xa7b   : > { %v17290_v35 = vpop.f32.mrb[100].mxu1 }
 0xa7c   : > { %v14377_v14 = vpop.f32.mrb[101].mxu1 }
 0xaab   : > { %v17292_v43 = vpop.f32.mrb[100].mxu0 }
 0xaac   : > { %v14382_v16 = vpop.f32.mrb[101].mxu0 }
 0xaaf   : > { %v17294_v50 = vpop.f32.mrb[102].mxu1 }
 0xab0   : > { %v17296_v57 = vpop.f32.mrb[102].mxu0  ;;  %v14387_v62 = vpop.f32.mrb[103].mxu1 }
 0xab1   : > { %v14392_v36 = vpop.f32.mrb[103].mxu0 }
 0xab3   : > { %v9428_v27 = vpop.f32.mrb[104].mxu1 }
 0xab4   : > { %v10602_v51 = vmul.f32 0.35355338, %v9428_v27  ;;  %v14397_v11 = vpop.f32.mrb[105].mxu1 }
 0xab6   : > { %v17301_v38 = vadd.f32 %v17298_v39, %v10602_v51  ;;  %v9506_v13 = vpop.f32.mrb[104].mxu0 }
 0xab7   : > { %v10603_v37 = vmul.f32 0.35355338, %v9506_v13  ;;  %v14402_v60 = vpop.f32.mrb[105].mxu0  ;;  %v9584_v42 = vpop.f32.mrb[106].mxu1 }
 0xab8   : > { %v10604_v34 = vmul.f32 0.35355338, %v9584_v42  ;;  %v14407_v23 = vpop.f32.mrb[107].mxu1  ;;  %v10634_v56 = vsel %vm1178_vm5, %v17301_v38, -inf }
 0xab9   : > { %v17306_v21 = vadd.f32 %v17298_v39, %v10603_v37  ;;  %10635 = vmax.xlane.f32.xlu0 %v10634_v56 }
 0xaba   : > { %v17309_v48 = vadd.f32 %v17298_v39, %v10604_v34  ;;  %v9662_v29 = vpop.f32.mrb[106].mxu0 }
 0xabb   : > { %v10605_v47 = vmul.f32 0.35355338, %v9662_v29  ;;  %v14412_v25 = vpop.f32.mrb[107].mxu0  ;;  %v9740_v59 = vpop.f32.mrb[108].mxu1  ;;  %v10637_v41 = vsel %vm1178_vm5, %v17306_v21, -inf }
 0xabc   : > { %v10606_v54 = vmul.f32 0.35355338, %v9740_v59  ;;  %10638 = vmax.xlane.f32.xlu1 %v10637_v41  ;;  %v14417_v33 = vpop.f32.mrb[109].mxu1  ;;  %v10640_v31 = vsel %vm1178_vm5, %v17309_v48, -inf }
 0xabd   : > { %v17316_v3 = vadd.f32 %v17298_v39, %v10605_v47  ;;  %10641 = vmax.xlane.f32.xlu0 %v10640_v31 }
 0xabe   : > { %v9818_v4 = vpop.f32.mrb[108].mxu0  ;;  %v17319_v5 = vadd.f32 %v17298_v39, %v10606_v54 }
 0xabf   : > { %v10607_v17 = vmul.f32 0.35355338, %v9818_v4  ;;  %v14422_v58 = vpop.f32.mrb[109].mxu0  ;;  %v9896_v45 = vpop.f32.mrb[110].mxu1  ;;  %v10643_v9 = vsel %vm1178_vm5, %v17316_v3, -inf }
 0xac0   : > { %v10608_v53 = vmul.f32 0.35355338, %v9896_v45  ;;  %v14427_v22 = vpop.f32.mrb[111].mxu1  ;;  %v10646_v36 = vsel %vm1178_vm5, %v17319_v5, -inf }
 0xac1   : > { %v17324_v6 = vadd.f32 %v17298_v39, %v10607_v17  ;;  %10644 = vmax.xlane.f32.xlu0 %v10643_v9 }
 0xac2   : > { %v9974_v10 = vpop.f32.mrb[110].mxu0  ;;  %v17329_v14 = vadd.f32 %v17298_v39, %v10608_v53 }
 0xac3   : > { %v10609_v24 = vmul.f32 0.35355338, %v9974_v10  ;;  %v14432_v18 = vpop.f32.mrb[111].mxu0  ;;  %v10649_v46 = vsel %vm1178_vm5, %v17324_v6, -inf  ;;  %v10052_v0 = vpop.f32.mrb[112].mxu1 }
 0xac4   : > { %10650 = vmax.xlane.f32.xlu1 %v10649_v46  ;;  %v10610_v16 = vmul.f32 0.35355338, %v10052_v0  ;;  %v14437_v62 = vpop.f32.mrb[113].mxu1  ;;  %v10652_v56 = vsel %vm1178_vm5, %v17329_v14, -inf }
 0xac5   : > { %v17334_v27 = vadd.f32 %v17298_v39, %v10609_v24  ;;  %10647 = vmax.xlane.f32.xlu0 %v10646_v36 }
 0xac6   : > { %v10130_v51 = vpop.f32.mrb[112].mxu0  ;;  %v17339_v42 = vadd.f32 %v17298_v39, %v10610_v16 }
 0xac7   : > { %v10611_v11 = vmul.f32 0.35355338, %v10130_v51  ;;  %v14442_v13 = vpop.f32.mrb[113].mxu0  ;;  %v10655_v37 = vsel %vm1178_vm5, %v17334_v27, -inf  ;;  %v10208_v60 = vpop.f32.mrb[114].mxu1 }
 0xac8   : > { %10656 = vmax.xlane.f32.xlu1 %v10655_v37  ;;  %v10612_v34 = vmul.f32 0.35355338, %v10208_v60  ;;  %v14447_v23 = vpop.f32.mrb[115].mxu1  ;;  %v10658_v17 = vsel %vm1178_vm5, %v17339_v42, -inf }
 0xac9   : > { %v17344_v29 = vadd.f32 %v17298_v39, %v10611_v11  ;;  %10653 = vmax.xlane.f32.xlu0 %v10652_v56  ;;  %v17388_v56 = vpop.permute.xlu1 %11038 }
 0xaca   : > { %v10286_v47 = vpop.f32.mrb[114].mxu0  ;;  %v17349_v33 = vadd.f32 %v17298_v39, %v10612_v34 }
 0xacb   : > { %v10613_v25 = vmul.f32 0.35355338, %v10286_v47  ;;  %v14452_v59 = vpop.f32.mrb[115].mxu0  ;;  %v10661_v41 = vsel %vm1178_vm5, %v17344_v29, -inf  ;;  %v10364_v54 = vpop.f32.mrb[116].mxu1 }
 0xacc   : > { %10662 = vmax.xlane.f32.xlu1 %v10661_v41  ;;  %v10614_v31 = vmul.f32 0.35355338, %v10364_v54  ;;  %v14457_v4 = vpop.f32.mrb[117].mxu1  ;;  %v10664_v0 = vsel %vm1178_vm5, %v17349_v33, -inf  ;;  %v17392_v47 = vpop.permute.xlu0 %10962 }
 0xacd   : > { %v17354_v58 = vadd.f32 %v17298_v39, %v10613_v25  ;;  %10659 = vmax.xlane.f32.xlu0 %v10658_v17 }
 0xace   : > { %v10442_v45 = vpop.f32.mrb[116].mxu0  ;;  %v17359_v24 = vadd.f32 %v17298_v39, %v10614_v31 }
 0xacf   : > { %v10615_v53 = vmul.f32 0.35355338, %v10442_v45  ;;  %v14462_v22 = vpop.f32.mrb[117].mxu0  ;;  %v10667_v9 = vsel %vm1178_vm5, %v17354_v58, -inf  ;;  %v10520_v10 = vpop.f32.mrb[118].mxu1 }
 0xad0   : > { %10668 = vmax.xlane.f32.xlu1 %v10667_v9  ;;  %v10616_v18 = vmul.f32 0.35355338, %v10520_v10  ;;  %v14467_v46 = vpop.f32.mrb[119].mxu1  ;;  %v10670_v13 = vsel %vm1178_vm5, %v17359_v24, -inf }
 0xad1   : > { %v17364_v16 = vadd.f32 %v17298_v39, %v10615_v53  ;;  %10665 = vmax.xlane.f32.xlu0 %v10664_v0 }
 0xad2   : > { %v10598_v62 = vpop.f32.mrb[118].mxu0  ;;  %v17369_v11 = vadd.f32 %v17298_v39, %v10616_v18 }
 0xad3   : > { %v14472_v36 = vpop.f32.mrb[119].mxu0  ;;  %v10673_v51 = vsel %vm1178_vm5, %v17364_v16, -inf  ;;  %v10617_v60 = vmul.f32 0.35355338, %v10598_v62 }
 0xad4   : > { %10674 = vmax.xlane.f32.xlu1 %v10673_v51  ;;  %v10676_v37 = vsel %vm1178_vm5, %v17369_v11, -inf }
 0xad5   : > { %10671 = vmax.xlane.f32.xlu0 %v10670_v13  ;;  %v17382_v34 = vadd.f32 %v17298_v39, %v10617_v60 }
 0xad7   : > { %v10679_v23 = vsel %vm1178_vm5, %v17382_v34, -inf }
 0xad9   : > { %10677 = vmax.xlane.f32.xlu0 %v10676_v37 }
 0xae5   : > { %11646 = vrot.lane.b32.xlu1 %v15592_v32, %s15043_s20  ;;  %v17390_v32 = vpop.permute.xlu1 %11114 }
 0xaef   : > { %11570 = vrot.lane.b32.xlu0 %v15580_v61, %s15043_s20  ;;  %v17394_v61 = vpop.permute.xlu1 %11190 }
 0xaf3   : > { %11722 = vrot.lane.b32.xlu0 %v15588_v63, %s15043_s20  ;;  %v17396_v63 = vpop.permute.xlu0 %11266  ;;  %v17398_v25 = vpop.permute.xlu1 %11342 }
 0xaf7   : > { %v17400_v39 = vpop.permute.xlu0 %11418  ;;  %v17402_v59 = vpop.permute.xlu1 %11494 }
 0xb09   : > { %10680 = vmax.xlane.f32.xlu1 %v10679_v23 }
 0xb1a   : > { %11798 = vrot.lane.b32.xlu1 %v15600_v44, %s15043_s20 }
 0xb46   : > { %v10636_v41 = vpop.xlane.xlu0 %10635 }
 0xb47   : > { %v10682_v54 = vsub.f32 %v17301_v38, %v10636_v41 }
 0xb49   : > { %v10698_v44 = vmul.f32 1.442695, %v10682_v54  ;;  %v10639_v31 = vpop.xlane.xlu1 %10638 }
 0xb4a   : > { %v10683_v4 = vsub.f32 %v17306_v21, %v10639_v31  ;;  %v10642_v17 = vpop.xlane.xlu0 %10641 }
 0xb4b   : > { %14901 = vpow2.f32 %v10698_v44  ;;  %v10684_v45 = vsub.f32 %v17309_v48, %v10642_v17 }
 0xb4c   : > { %v10700_v53 = vmul.f32 1.442695, %v10683_v4 }
 0xb4d   : > { %v10702_v22 = vmul.f32 1.442695, %v10684_v45 }
 0xb4e   : > { %14903 = vpow2.f32 %v10700_v53  ;;  %v10645_v9 = vpop.xlane.xlu0 %10644 }
 0xb4f   : > { %14905 = vpow2.f32 %v10702_v22  ;;  %v10685_v10 = vsub.f32 %v17316_v3, %v10645_v9 }
 0xb51   : > { %v10704_v18 = vmul.f32 1.442695, %v10685_v10  ;;  %v10651_v46 = vpop.xlane.xlu1 %10650 }
 0xb52   : > { %v10687_v0 = vsub.f32 %v17324_v6, %v10651_v46  ;;  %v10648_v38 = vpop.xlane.xlu0 %10647 }
 0xb53   : > { %14907 = vpow2.f32 %v10704_v18  ;;  %v10686_v62 = vsub.f32 %v17319_v5, %v10648_v38 }
 0xb54   : > { %v10708_v21 = vmul.f32 1.442695, %v10687_v0 }
 0xb55   : > { %v17410_v36 = vpop.eup %14901  ;;  %v10706_v51 = vmul.f32 1.442695, %v10686_v62  ;;  %v10657_v48 = vpop.xlane.xlu1 %10656 }
 0xb56   : > { %14909 = vpow2.f32 %v10708_v21  ;;  %v10689_v13 = vsub.f32 %v17334_v27, %v10657_v48  ;;  %v10654_v37 = vpop.xlane.xlu0 %10653  ;;  %v10730_v3 = vsel %vm1178_vm5, %v17410_v36, 0.0 }
 0xb57   : > { %14911 = vpow2.f32 %v10706_v51  ;;  %v10688_v60 = vsub.f32 %v17329_v14, %v10654_v37  ;;  %10731 = vadd.xlane.f32.xlu0 %v10730_v3 }
 0xb58   : > { %v17416_v6 = vpop.eup %14903  ;;  %v10712_v23 = vmul.f32 1.442695, %v10689_v13 }
 0xb59   : > { %v17418_v5 = vpop.eup %14905  ;;  %v10710_v41 = vmul.f32 1.442695, %v10688_v60  ;;  %v10663_v54 = vpop.xlane.xlu1 %10662  ;;  %v10733_v44 = vsel %vm1178_vm5, %v17416_v6, 0.0 }
 0xb5a   : > { %14913 = vpow2.f32 %v10712_v23  ;;  %v10691_v27 = vsub.f32 %v17344_v29, %v10663_v54  ;;  %10734 = vadd.xlane.f32.xlu1 %v10733_v44  ;;  %v10660_v31 = vpop.xlane.xlu0 %10659  ;;  %v10736_v4 = vsel %vm1178_vm5, %v17418_v5, 0.0 }
 0xb5b   : > { %14915 = vpow2.f32 %v10710_v41  ;;  %v10690_v14 = vsub.f32 %v17339_v42, %v10660_v31  ;;  %10737 = vadd.xlane.f32.xlu0 %v10736_v4 }
 0xb5c   : > { %v10716_v17 = vmul.f32 1.442695, %v10691_v27 }
 0xb5d   : > { %v17426_v45 = vpop.eup %14907  ;;  %v10714_v53 = vmul.f32 1.442695, %v10690_v14  ;;  %v10669_v22 = vpop.xlane.xlu1 %10668 }
 0xb5e   : > { %14917 = vpow2.f32 %v10716_v17  ;;  %v10693_v9 = vsub.f32 %v17354_v58, %v10669_v22  ;;  %v10666_v10 = vpop.xlane.xlu0 %10665  ;;  %v10739_v29 = vsel %vm1178_vm5, %v17426_v45, 0.0 }
 0xb5f   : > { %14919 = vpow2.f32 %v10714_v53  ;;  %v10692_v18 = vsub.f32 %v17349_v33, %v10666_v10  ;;  %10740 = vadd.xlane.f32.xlu1 %v10739_v29 }
 0xb60   : > { %v17432_v46 = vpop.eup %14909  ;;  %v10720_v42 = vmul.f32 1.442695, %v10693_v9 }
 0xb61   : > { %v17434_v0 = vpop.eup %14911  ;;  %v10718_v38 = vmul.f32 1.442695, %v10692_v18  ;;  %v10675_v62 = vpop.xlane.xlu1 %10674  ;;  %v10745_v58 = vsel %vm1178_vm5, %v17432_v46, 0.0 }
 0xb62   : > { %14921 = vpow2.f32 %v10720_v42  ;;  %v10695_v21 = vsub.f32 %v17364_v16, %v10675_v62  ;;  %v10672_v51 = vpop.xlane.xlu0 %10671  ;;  %v10742_v48 = vsel %vm1178_vm5, %v17434_v0, 0.0  ;;  %v18413_v62 = vld [vmem:[#allocation26_spill] sm:$0xff] }
 0xb63   : > { %14923 = vpow2.f32 %v10718_v38  ;;  %v10694_v33 = vsub.f32 %v17359_v24, %v10672_v51  ;;  %10746 = vadd.xlane.f32.xlu1 %v10745_v58  ;;  %10743 = vadd.xlane.f32.xlu0 %v10742_v48  ;;  %v18412_v38 = vld [vmem:[#allocation29_spill] sm:$0xff]  ;;  %v18414_v48 = vld [vmem:[#allocation27_spill] sm:$0xff] }
 0xb64   : > { %v17442_v13 = vpop.eup %14913  ;;  %v10724_v37 = vmul.f32 1.442695, %v10695_v21 }
 0xb65   : > { %v17444_v3 = vpop.eup %14915  ;;  %v10722_v60 = vmul.f32 1.442695, %v10694_v33  ;;  %v10751_v23 = vsel %vm1178_vm5, %v17442_v13, 0.0  ;;  %v17485_v21 = vpop.permute.xlu1 %11646  ;;  %v18415_v33 = vld [vmem:[#allocation32_spill] sm:$0xff] }
 0xb66   : > { %14925 = vpow2.f32 %v10724_v37  ;;  %v10678_v16 = vpop.xlane.xlu0 %10677  ;;  %v10748_v41 = vsel %vm1178_vm5, %v17444_v3, 0.0 }
 0xb67   : > { %14927 = vpow2.f32 %v10722_v60  ;;  %v10696_v54 = vsub.f32 %v17369_v11, %v10678_v16  ;;  %10752 = vadd.xlane.f32.xlu1 %v10751_v23  ;;  %10749 = vadd.xlane.f32.xlu0 %v10748_v41  ;;  %v18420_v60 = vld [vmem:[#allocation30_spill] sm:$0xff]  ;;  %v18425_v23 = vld [vmem:[#allocation35_spill] sm:$0xff] }
 0xb68   : > { %v17451_v24 = vpop.eup %14917 }
 0xb69   : > { %v17453_v44 = vpop.eup %14919  ;;  %v10726_v27 = vmul.f32 1.442695, %v10696_v54  ;;  %v10757_v31 = vsel %vm1178_vm5, %v17451_v24, 0.0 }
 0xb6a   : > { %v10754_v4 = vsel %vm1178_vm5, %v17453_v44, 0.0 }
 0xb6b   : > { %14929 = vpow2.f32 %v10726_v27  ;;  %10758 = vadd.xlane.f32.xlu1 %v10757_v31  ;;  %10755 = vadd.xlane.f32.xlu0 %v10754_v4 }
 0xb6c   : > { %v17459_v14 = vpop.eup %14921 }
 0xb6d   : > { %v17461_v17 = vpop.eup %14923  ;;  %v10763_v11 = vsel %vm1178_vm5, %v17459_v14, 0.0 }
 0xb6e   : > { %v10760_v53 = vsel %vm1178_vm5, %v17461_v17, 0.0 }
 0xb6f   : > { %10764 = vadd.xlane.f32.xlu1 %v10763_v11  ;;  %10761 = vadd.xlane.f32.xlu0 %v10760_v53  ;;  %v18426_v11 = vld [vmem:[#allocation37_spill] sm:$0xff] }
 0xb70   : > { %v17467_v22 = vpop.eup %14925 }
 0xb71   : > { %v17469_v9 = vpop.eup %14927  ;;  %v10769_v10 = vsel %vm1178_vm5, %v17467_v22, 0.0 }
 0xb72   : > { %v10766_v29 = vsel %vm1178_vm5, %v17469_v9, 0.0 }
 0xb73   : > { %10770 = vadd.xlane.f32.xlu1 %v10769_v10  ;;  %10767 = vadd.xlane.f32.xlu0 %v10766_v29 }
 0xb75   : > { %v17475_v18 = vpop.eup %14929 }
 0xb76   : > { %v10772_v42 = vsel %vm1178_vm5, %v17475_v18, 0.0 }
 0xb77   : > { %10773 = vadd.xlane.f32.xlu1 %v10772_v42  ;;  %v18427_v42 = vld [vmem:[#allocation39_spill] sm:$0xff] }
 0xb88   : > { %11950 = vrot.lane.b32.xlu1 %v15606_v1, %s15043_s20 }
 0xb8c   : > { %6538 = vrot.lane.b32.xlu1 %v18412_v38, %s15044_s15 }
 0xb90   : > { %6542 = vrot.lane.b32.xlu1 %v18413_v62, %s15044_s15 }
 0xb94   : > { %9291 = vrot.lane.b32.xlu1 %v17270_v49, %s15045_s14 }
 0xb96   : > { %v10681_v51 = vpop.xlane.xlu1 %10680 }
 0xb97   : > { %v10697_v58 = vsub.f32 %v17382_v34, %v10681_v51  ;;  %v18417_v34 = vld [vmem:[#allocation36_spill] sm:$0xff] }
 0xb98   : > { %9295 = vrot.lane.b32.xlu1 %v17272_v26, %s15045_s14  ;;  %v18416_v26 = vld [vmem:[#allocation34_spill] sm:$0xff] }
 0xb99   : > { %v10728_v1 = vmul.f32 1.442695, %v10697_v58 }
 0xb9b   : > { %14931 = vpow2.f32 %v10728_v1 }
 0xb9c   : > { %6546 = vrot.lane.b32.xlu1 %v18414_v48, %s15044_s15 }
 0xba0   : > { %6550 = vrot.lane.b32.xlu1 %v18415_v33, %s15044_s15 }
 0xba4   : > { %9299 = vrot.lane.b32.xlu1 %v17274_v30, %s15045_s14  ;;  %v18418_v30 = vld [vmem:[#allocation38_spill] sm:$0xff] }
 0xba5   : > { %v17498_v37 = vpop.eup %14931 }
 0xba6   : > { %v10775_v49 = vsel %vm1178_vm5, %v17498_v37, 0.0 }
 0xba7   : > { %10776 = vadd.xlane.f32.xlu0 %v10775_v49 }
 0xba8   : > { %9303 = vrot.lane.b32.xlu1 %v17278_v52, %s15045_s14  ;;  %v18419_v52 = vld [vmem:[#allocation40_spill] sm:$0xff] }
 0xbac   : > { %6554 = vrot.lane.b32.xlu1 %v18416_v26, %s15044_s15 }
 0xbb0   : > { %6558 = vrot.lane.b32.xlu1 %v18417_v34, %s15044_s15 }
 0xbb4   : > { %9307 = vrot.lane.b32.xlu1 %v17282_v8, %s15045_s14  ;;  %v18421_v8 = vld [vmem:[#allocation25_spill] sm:$0xff] }
 0xbb8   : > { %9311 = vrot.lane.b32.xlu1 %v17286_v20, %s15045_s14  ;;  %v18423_v20 = vld [vmem:[#allocation31_spill] sm:$0xff] }
 0xbbc   : > { %6562 = vrot.lane.b32.xlu1 %v18418_v30, %s15044_s15 }
 0xbbd   : > { %11874 = vrot.lane.b32.xlu0 %v15596_v7, %s15043_s20  ;;  %v18422_v7 = vld [vmem:[#allocation28_spill] sm:$0xff] }
 0xbc0   : > { %6566 = vrot.lane.b32.xlu1 %v18419_v52, %s15044_s15 }
 0xbc1   : > { %6536 = vrot.lane.b32.xlu0 %v18420_v60, %s15044_s15 }
 0xbc4   : > { %9315 = vrot.lane.b32.xlu1 %v17292_v43, %s15045_s14  ;;  %v17536_v43 = vpop.permute.xlu0 %11570 }
 0xbc5   : > { %6540 = vrot.lane.b32.xlu0 %v18421_v8, %s15044_s15 }
 0xbc8   : > { %9319 = vrot.lane.b32.xlu1 %v17296_v57, %s15045_s14  ;;  %v17540_v57 = vpop.permute.xlu0 %11722 }
 0xbc9   : > { %9289 = vrot.lane.b32.xlu0 %v17266_v28, %s15045_s14  ;;  %v18424_v28 = vld [vmem:[#allocation33_spill] sm:$0xff] }
 0xbcd   : > { %9293 = vrot.lane.b32.xlu0 %v17268_v12, %s15045_s14  ;;  %v17544_v12 = vpop.permute.xlu1 %11798 }
 0xbd1   : > { %6544 = vrot.lane.b32.xlu0 %v18422_v7, %s15044_s15 }
 0xbd5   : > { %6548 = vrot.lane.b32.xlu0 %v18423_v20, %s15044_s15 }
 0xbd9   : > { %9297 = vrot.lane.b32.xlu0 %v17276_v40, %s15045_s14 }
 0xbdd   : > { %9301 = vrot.lane.b32.xlu0 %v17280_v2, %s15045_s14 }
 0xbe1   : > { %6552 = vrot.lane.b32.xlu0 %v18424_v28, %s15044_s15 }
 0xbe4   : > { %v10732_v16 = vpop.xlane.xlu0 %10731 }
 0xbe5   : > { %6556 = vrot.lane.b32.xlu0 %v18425_v23, %s15044_s15  ;;  %14933 = vrcp.f32 %v10732_v16 }
 0xbe7   : > { %v10735_v41 = vpop.xlane.xlu1 %10734 }
 0xbe8   : > { %14935 = vrcp.f32 %v10735_v41  ;;  %v10738_v40 = vpop.xlane.xlu0 %10737 }
 0xbe9   : > { %9305 = vrot.lane.b32.xlu0 %v17284_v15, %s15045_s14  ;;  %14937 = vrcp.f32 %v10738_v40 }
 0xbec   : > { %v10741_v2 = vpop.xlane.xlu1 %10740 }
 0xbed   : > { %14939 = vrcp.f32 %v10741_v2  ;;  %9309 = vrot.lane.b32.xlu0 %v17288_v19, %s15045_s14 }
 0xbef   : > { %v14934_v54 = vpop.eup %14933 }
 0xbf0   : > { %v10747_v27 = vpop.xlane.xlu1 %10746  ;;  %v10744_v31 = vpop.xlane.xlu0 %10743  ;;  %v10794_v4 = vmul.f32 %v14934_v54, %v17410_v36 }
 0xbf1   : > { %14941 = vrcp.f32 %v10747_v27  ;;  %6560 = vrot.lane.b32.xlu0 %v18426_v11, %s15044_s15 }
 0xbf2   : > { %v14936_v53 = vpop.eup %14935  ;;  %14943 = vrcp.f32 %v10744_v31  ;;  %14476 = vmatmul.mubr.msk.f32.vlgmr.msra.gmra.mrb[120].mxu1 %vm1178_vm5, %v10794_v4 }
 0xbf3   : > { %v14938_v15 = vpop.eup %14937  ;;  %v10795_v10 = vmul.f32 %v14936_v53, %v17416_v6  ;;  %14484 = vmatpush3.msra.mxu1 %v17392_v47  ;;  %14485 = vmatprep.mubr.msk.f32.mxu1 %vm15032_vm4, %v18361_v55 }
 0xbf4   : > { %v10796_v19 = vmul.f32 %v14938_v15, %v17418_v5  ;;  %v10753_v29 = vpop.xlane.xlu1 %10752  ;;  %v10750_v36 = vpop.xlane.xlu0 %10749  ;;  %14493 = vmatprep.subr.mxu1 %v18361_v55 }
 0xbf5   : > { %14481 = vmatmul.mubr.msk.f32.vlgmr.msra.gmra.mrb[120].mxu0 %vm1178_vm5, %v10795_v10  ;;  %14945 = vrcp.f32 %v10753_v29  ;;  %6564 = vrot.lane.b32.xlu0 %v18427_v42, %s15044_s15  ;;  %s18447_s15 = smov (!%p13574_p6), %s18446_s19 }
 0xbf6   : > { %14489 = vmatpush3.msra.mxu0 %v17388_v56  ;;  %14947 = vrcp.f32 %v10750_v36  ;;  %14486 = vmatmul.mubr.msk.f32.vlgmr.msra.gmra.mrb[122].mxu1 %vm1178_vm5, %v10796_v19 }
 0xbf7   : > { %v14940_v47 = vpop.eup %14939  ;;  %14494 = vmatpush3.msra.mxu1 %v17390_v32  ;;  %14490 = vmatprep.mubr.msk.f32.mxu0 %vm15032_vm4, %v18361_v55 }
 0xbf8   : > { %v10797_v6 = vmul.f32 %v14940_v47, %v17426_v45  ;;  %v10759_v5 = vpop.xlane.xlu1 %10758  ;;  %v10756_v38 = vpop.xlane.xlu0 %10755  ;;  %14498 = vmatprep.subr.mxu0 %v18361_v55  ;;  %14495 = vmatprep.mubr.msk.f32.mxu1 %vm15032_vm4, %v18361_v55 }
 0xbf9   : > { %14949 = vrcp.f32 %v10759_v5  ;;  %9313 = vrot.lane.b32.xlu0 %v17290_v35, %s15045_s14  ;;  %14503 = vmatprep.subr.mxu1 %v18361_v55 }
 0xbfa   : > { %14951 = vrcp.f32 %v10756_v38  ;;  %14491 = vmatmul.mubr.msk.f32.vlgmr.msra.gmra.mrb[122].mxu0 %vm1178_vm5, %v10797_v6 }
 0xbfb   : > { %v14942_v56 = vpop.eup %14941  ;;  %14499 = vmatpush3.msra.mxu0 %v17394_v61  ;;  %14500 = vmatprep.mubr.msk.f32.mxu0 %vm15032_vm4, %v18361_v55 }
 0xbfc   : > { %v14944_v32 = vpop.eup %14943  ;;  %v10799_v45 = vmul.f32 %v14942_v56, %v17432_v46  ;;  %v10765_v62 = vpop.xlane.xlu1 %10764  ;;  %14508 = vmatprep.subr.mxu0 %v18361_v55  ;;  %v14669_v56 = vld [vmem:[%s18428_s25] sm:$0xff]  }
 0xbfd   : > { %v10762_v51 = vpop.xlane.xlu0 %10761  ;;  %v10798_v35 = vmul.f32 %v14944_v32, %v17434_v0  ;;  %14953 = vrcp.f32 %v10765_v62  ;;  %9317 = vrot.lane.b32.xlu0 %v17294_v50, %s15045_s14  ;;  %v14670_v62 = vld [vmem:[%s18428_s25 + $0x8] sm:$0xff]  }
 0xbfe   : > { %14955 = vrcp.f32 %v10762_v51  ;;  %14501 = vmatmul.mubr.msk.f32.vlgmr.msra.gmra.mrb[124].mxu0 %vm1178_vm5, %v10799_v45 }
 0xbff   : > { %v14946_v61 = vpop.eup %14945  ;;  %14496 = vmatmul.mubr.msk.f32.vlgmr.msra.gmra.mrb[124].mxu1 %vm1178_vm5, %v10798_v35  ;;  %14509 = vmatpush3.msra.mxu0 %v17398_v25 }
 0xc00   : > { %v14948_v58 = vpop.eup %14947  ;;  %v10801_v46 = vmul.f32 %v14946_v61, %v17442_v13  ;;  %14504 = vmatpush3.msra.mxu1 %v17396_v63  ;;  %v10771_v1 = vpop.xlane.xlu1 %10770  ;;  %14505 = vmatprep.mubr.msk.f32.mxu1 %vm15032_vm4, %v18361_v55 }
 0xc01   : > { %v10768_v48 = vpop.xlane.xlu0 %10767  ;;  %v10800_v50 = vmul.f32 %v14948_v58, %v17444_v3  ;;  %14957 = vrcp.f32 %v10771_v1  ;;  %14510 = vmatprep.mubr.msk.f32.mxu0 %vm15032_vm4, %v18361_v55  ;;  %14513 = vmatprep.subr.mxu1 %v18361_v55 }
 0xc02   : > { %14959 = vrcp.f32 %v10768_v48  ;;  %14518 = vmatprep.subr.mxu0 %v18361_v55  ;;  %14511 = vmatmul.mubr.msk.f32.vlgmr.msra.gmra.mrb[126].mxu0 %vm1178_vm5, %v10801_v46 }
 0xc03   : > { %v14950_v25 = vpop.eup %14949  ;;  %14506 = vmatmul.mubr.msk.f32.vlgmr.msra.gmra.mrb[126].mxu1 %vm1178_vm5, %v10800_v50  ;;  %14519 = vmatpush3.msra.mxu0 %v17402_v59 }
 0xc04   : > { %v14952_v63 = vpop.eup %14951  ;;  %v10803_v0 = vmul.f32 %v14950_v25, %v17451_v24  ;;  %14514 = vmatpush3.msra.mxu1 %v17400_v39  ;;  %v10774_v13 = vpop.xlane.xlu1 %10773  ;;  %14515 = vmatprep.mubr.msk.f32.mxu1 %vm15032_vm4, %v18361_v55 }
 0xc05   : > { %v10802_v3 = vmul.f32 %v14952_v63, %v17453_v44  ;;  %14520 = vmatprep.mubr.msk.f32.mxu0 %vm15032_vm4, %v18361_v55  ;;  %14523 = vmatprep.subr.mxu1 %v18361_v55  ;;  %14961 = vrcp.f32 %v10774_v13 }
 0xc06   : > { %14528 = vmatprep.subr.mxu0 %v18361_v55  ;;  %14521 = vmatmul.mubr.msk.f32.vlgmr.msra.gmra.mrb[128].mxu0 %vm1178_vm5, %v10803_v0 }
 0xc07   : > { %v14954_v59 = vpop.eup %14953  ;;  %14516 = vmatmul.mubr.msk.f32.vlgmr.msra.gmra.mrb[128].mxu1 %vm1178_vm5, %v10802_v3  ;;  %14529 = vmatpush3.msra.mxu0 %v17485_v21 }
 0xc08   : > { %v14956_v39 = vpop.eup %14955  ;;  %v10805_v24 = vmul.f32 %v14954_v59, %v17459_v14  ;;  %14524 = vmatpush3.msra.mxu1 %v17536_v43  ;;  %v11951_v44 = vpop.permute.xlu1 %11950  ;;  %14525 = vmatprep.mubr.msk.f32.mxu1 %vm15032_vm4, %v18361_v55 }
 0xc09   : > { %v10804_v33 = vmul.f32 %v14956_v39, %v17461_v17  ;;  %14530 = vmatprep.mubr.msk.f32.mxu0 %vm15032_vm4, %v18361_v55  ;;  %14533 = vmatprep.subr.mxu1 %v18361_v55 }
 0xc0a   : > { %14538 = vmatprep.subr.mxu0 %v18361_v55  ;;  %14531 = vmatmul.mubr.msk.f32.vlgmr.msra.gmra.mrb[130].mxu0 %vm1178_vm5, %v10805_v24 }
 0xc0b   : > { %v14958_v21 = vpop.eup %14957  ;;  %14526 = vmatmul.mubr.msk.f32.vlgmr.msra.gmra.mrb[130].mxu1 %vm1178_vm5, %v10804_v33  ;;  %14539 = vmatpush3.msra.mxu0 %v17544_v12 }
 0xc0c   : > { %v14960_v14 = vpop.eup %14959  ;;  %v10807_v49 = vmul.f32 %v14958_v21, %v17467_v22  ;;  %14534 = vmatpush3.msra.mxu1 %v17540_v57  ;;  %v6539_v17 = vpop.permute.xlu1 %6538  ;;  %14535 = vmatprep.mubr.msk.f32.mxu1 %vm15032_vm4, %v18361_v55 }
 0xc0d   : > { %v10806_v26 = vmul.f32 %v14960_v14, %v17469_v9  ;;  %6586 = vst.msk [vmem:[#allocation3 + $0x8] sm:$0xff] %vm6584_vm6, %v6539_v17  ;;  %14540 = vmatprep.mubr.msk.f32.mxu0 %vm15032_vm4, %v18361_v55  ;;  %14548 = vmatprep.subr.mxu0 %v18361_v55 }
 0xc0e   : > { %14541 = vmatmul.mubr.msk.f32.vlgmr.msra.gmra.mrb[132].mxu0 %vm1178_vm5, %v10807_v49  ;;  %14543 = vmatprep.subr.mxu1 %v18361_v55 }
 0xc0f   : > { %14536 = vmatmul.mubr.msk.f32.vlgmr.msra.gmra.mrb[132].mxu1 %vm1178_vm5, %v10806_v26  ;;  %14549 = vmatpush3.msra.mxu0 %v11951_v44  ;;  %v14962_v57 = vpop.eup %14961 }
 0xc10   : > { %v6543_v22 = vpop.permute.xlu1 %6542  ;;  %14545 = vmatprep.mubr.msk.f32.mxu1 %vm15032_vm4, %v18361_v55  ;;  %14550 = vmatprep.mubr.msk.f32.mxu0 %vm15032_vm4, %v18361_v55  ;;  %v10808_v28 = vmul.f32 %v14962_v57, %v17475_v18 }
 0xc11   : > { %6588 = vst.msk [vmem:[#allocation3 + $0x18] sm:$0xff] %vm6584_vm6, %v6543_v22  ;;  %14553 = vmatprep.subr.bf16.mxu0 %v14669_v56 }
 0xc14   : > { %v9292_v9 = vpop.permute.xlu1 %9291 }
 0xc15   : > { %9339 = vst.msk [vmem:[#allocation3 + $0x8] sm:$0xff] %vm9337_vm7, %v9292_v9 }
 0xc18   : > { %v9296_v34 = vpop.permute.xlu1 %9295 }
 0xc19   : > { %9341 = vst.msk [vmem:[#allocation3 + $0x18] sm:$0xff] %vm9337_vm7, %v9296_v34 }
 0xc1c   : > { %v6547_v30 = vpop.permute.xlu1 %6546 }
 0xc1d   : > { %6590 = vst.msk [vmem:[#allocation3 + $0x28] sm:$0xff] %vm6584_vm6, %v6547_v30 }
 0xc20   : > { %v6551_v52 = vpop.permute.xlu1 %6550 }
 0xc21   : > { %6592 = vst.msk [vmem:[#allocation3 + $0x38] sm:$0xff] %vm6584_vm6, %v6551_v52 }
 0xc24   : > { %v9300_v60 = vpop.permute.xlu1 %9299 }
 0xc25   : > { %9343 = vst.msk [vmem:[#allocation3 + $0x28] sm:$0xff] %vm9337_vm7, %v9300_v60 }
 0xc28   : > { %v9304_v8 = vpop.permute.xlu1 %9303 }
 0xc29   : > { %9345 = vst.msk [vmem:[#allocation3 + $0x38] sm:$0xff] %vm9337_vm7, %v9304_v8 }
 0xc2c   : > { %v6555_v55 = vpop.permute.xlu1 %6554 }
 0xc2d   : > { %6594 = vst.msk [vmem:[#allocation3 + $0x48] sm:$0xff] %vm6584_vm6, %v6555_v55 }
 0xc30   : > { %v6559_v7 = vpop.permute.xlu1 %6558 }
 0xc31   : > { %6596 = vst.msk [vmem:[#allocation3 + $0x58] sm:$0xff] %vm6584_vm6, %v6559_v7 }
 0xc34   : > { %v10777_v20 = vpop.xlane.xlu0 %10776  ;;  %v9308_v43 = vpop.permute.xlu1 %9307 }
 0xc35   : > { %14963 = vrcp.f32 %v10777_v20  ;;  %9347 = vst.msk [vmem:[#allocation3 + $0x48] sm:$0xff] %vm9337_vm7, %v9308_v43 }
 0xc38   : > { %v11875_v12 = vpop.permute.xlu0 %11874  ;;  %v9312_v16 = vpop.permute.xlu1 %9311 }
 0xc39   : > { %9349 = vst.msk [vmem:[#allocation3 + $0x58] sm:$0xff] %vm9337_vm7, %v9312_v16  ;;  %14544 = vmatpush3.msra.mxu1 %v11875_v12 }
 0xc3a   : > { %14546 = vmatmul.mubr.msk.f32.vlgmr.msra.gmra.mrb[134].mxu1 %vm1178_vm5, %v10808_v28  ;;  %14617 = vmatprep.subr.bf16.mxu1 %v14669_v56 }
 0xc3b   : > { %14619 = vmatpush3.bf16.msra.mxu1 %v14669_v56 }
 0xc3c   : > { %v6537_v23 = vpop.permute.xlu0 %6536  ;;  %v6563_v41 = vpop.permute.xlu1 %6562  ;;  %14618 = vmatprep.subr.bf16.mxu1 %v14670_v62 }
 0xc3d   : > { %6585 = vst.msk [vmem:[#allocation3] sm:$0xff] %vm6584_vm6, %v6537_v23  ;;  %6598 = vst.msk [vmem:[#allocation3 + $0x68] sm:$0xff] %vm6584_vm6, %v6563_v41 }
 0xc3f   : > { %v14964_v40 = vpop.eup %14963  ;;  %14620 = vmatpush3.bf16.msra.mxu1 %v14670_v62 }
 0xc40   : > { %v10809_v2 = vmul.f32 %v14964_v40, %v17498_v37  ;;  %v6541_v54 = vpop.permute.xlu0 %6540  ;;  %v6567_v27 = vpop.permute.xlu1 %6566 }
 0xc41   : > { %6587 = vst.msk [vmem:[#allocation3 + $0x10] sm:$0xff] %vm6584_vm6, %v6541_v54  ;;  %6600 = vst.msk [vmem:[#allocation3 + $0x78] sm:$0xff] %vm6584_vm6, %v6567_v27 }
 0xc42   : > { %14551 = vmatmul.mubr.msk.f32.vlgmr.msra.gmra.mrb[134].mxu0 %vm1178_vm5, %v10809_v2 }
 0xc43   : > { %14554 = vmatpush3.bf16.msra.mxu0 %v14669_v56 }
 0xc44   : > { %v9290_v18 = vpop.permute.xlu0 %9289  ;;  %v9316_v31 = vpop.permute.xlu1 %9315  ;;  %14555 = vmatprep.subr.bf16.mxu0 %v14670_v62 }
 0xc45   : > { %9338 = vst.msk [vmem:[#allocation3] sm:$0xff] %vm9337_vm7, %v9290_v18  ;;  %9351 = vst.msk [vmem:[#allocation3 + $0x68] sm:$0xff] %vm9337_vm7, %v9316_v31 }
 0xc47   : > { %14556 = vmatpush3.bf16.msra.mxu0 %v14670_v62 }
 0xc48   : > { %v9294_v4 = vpop.permute.xlu0 %9293  ;;  %v9320_v11 = vpop.permute.xlu1 %9319 }
 0xc49   : > { %9340 = vst.msk [vmem:[#allocation3 + $0x10] sm:$0xff] %vm9337_vm7, %v9294_v4  ;;  %9353 = vst.msk [vmem:[#allocation3 + $0x78] sm:$0xff] %vm9337_vm7, %v9320_v11 }
 0xc4c   : > { %v6545_v37 = vpop.permute.xlu0 %6544 }
 0xc4d   : > { %6589 = vst.msk [vmem:[#allocation3 + $0x20] sm:$0xff] %vm6584_vm6, %v6545_v37 }
 0xc50   : > { %v6549_v53 = vpop.permute.xlu0 %6548 }
 0xc51   : > { %6591 = vst.msk [vmem:[#allocation3 + $0x30] sm:$0xff] %vm6584_vm6, %v6549_v53 }
 0xc54   : > { %v9298_v15 = vpop.permute.xlu0 %9297 }
 0xc55   : > { %9342 = vst.msk [vmem:[#allocation3 + $0x20] sm:$0xff] %vm9337_vm7, %v9298_v15 }
 0xc58   : > { %v9302_v10 = vpop.permute.xlu0 %9301 }
 0xc59   : > { %9344 = vst.msk [vmem:[#allocation3 + $0x30] sm:$0xff] %vm9337_vm7, %v9302_v10 }
 0xc5c   : > { %v6553_v19 = vpop.permute.xlu0 %6552 }
 0xc5d   : > { %6593 = vst.msk [vmem:[#allocation3 + $0x40] sm:$0xff] %vm6584_vm6, %v6553_v19 }
 0xc60   : > { %v6557_v29 = vpop.permute.xlu0 %6556 }
 0xc61   : > { %6595 = vst.msk [vmem:[#allocation3 + $0x50] sm:$0xff] %vm6584_vm6, %v6557_v29 }
 0xc64   : > { %v9306_v36 = vpop.permute.xlu0 %9305 }
 0xc65   : > { %9346 = vst.msk [vmem:[#allocation3 + $0x40] sm:$0xff] %vm9337_vm7, %v9306_v36 }
 0xc68   : > { %v9310_v42 = vpop.permute.xlu0 %9309 }
 0xc69   : > { %9348 = vst.msk [vmem:[#allocation3 + $0x50] sm:$0xff] %vm9337_vm7, %v9310_v42 }
 0xc6c   : > { %v6561_v47 = vpop.permute.xlu0 %6560 }
 0xc6d   : > { %6597 = vst.msk [vmem:[#allocation3 + $0x60] sm:$0xff] %vm6584_vm6, %v6561_v47 }
 0xc70   : > { %v6565_v6 = vpop.permute.xlu0 %6564 }
 0xc71   : > { %6599 = vst.msk [vmem:[#allocation3 + $0x70] sm:$0xff] %vm6584_vm6, %v6565_v6 }
 0xc74   : > { %v9314_v5 = vpop.permute.xlu0 %9313 }
 0xc75   : > { %9350 = vst.msk [vmem:[#allocation3 + $0x60] sm:$0xff] %vm9337_vm7, %v9314_v5 }
 0xc78   : > { %v9318_v38 = vpop.permute.xlu0 %9317 }
 0xc79   : > { %9352 = vst.msk [vmem:[#allocation3 + $0x70] sm:$0xff] %vm9337_vm7, %v9318_v38 }
 0xcc5   : > { %v10882_v32 = vpop.f32.mrb[120].mxu1 }
 0xcc6   : > { %12042 = vrot.lane.b32.xlu0 %v10882_v32, %s15046_s28  ;;  %v14477_v45 = vpop.f32.mrb[121].mxu1 }
 0xcc8   : > { %v10958_v51 = vpop.f32.mrb[120].mxu0 }
 0xcc9   : > { %v14482_v35 = vpop.f32.mrb[121].mxu0  ;;  %12044 = vrot.lane.b32.xlu1 %v10958_v51, %s15046_s28  ;;  %v11034_v61 = vpop.f32.mrb[122].mxu1 }
 0xcca   : > { %12046 = vrot.lane.b32.xlu0 %v11034_v61, %s15046_s28  ;;  %v14487_v58 = vpop.f32.mrb[123].mxu1 }
 0xccd   : > { %v11110_v46 = vpop.f32.mrb[122].mxu0 }
 0xcce   : > { %v14492_v1 = vpop.f32.mrb[123].mxu0  ;;  %12048 = vrot.lane.b32.xlu1 %v11110_v46, %s15046_s28 }
 0xcd1   : > { %v11262_v48 = vpop.f32.mrb[124].mxu0 }
 0xcd2   : > { %v11186_v50 = vpop.f32.mrb[124].mxu1  ;;  %v14502_v25 = vpop.f32.mrb[125].mxu0  ;;  %12052 = vrot.lane.b32.xlu1 %v11262_v48, %s15046_s28  ;;  %v17723_v48 = vld [vmem:[%s18429_s16] ss:$0 sm:$0xff] }
 0xcd3   : > { %12050 = vrot.lane.b32.xlu0 %v11186_v50, %s15046_s28  ;;  %v14497_v63 = vpop.f32.mrb[125].mxu1 }
 0xcd5   : > { %v11414_v0 = vpop.f32.mrb[126].mxu0 }
 0xcd6   : > { %v11338_v13 = vpop.f32.mrb[126].mxu1  ;;  %v14512_v3 = vpop.f32.mrb[127].mxu0  ;;  %12056 = vrot.lane.b32.xlu1 %v11414_v0, %s15046_s28 }
 0xcd7   : > { %12054 = vrot.lane.b32.xlu0 %v11338_v13, %s15046_s28  ;;  %v14507_v59 = vpop.f32.mrb[127].mxu1 }
 0xcd8   : > { %v18430_v59 = vld [vmem:[#allocation9_spill] sm:$0xff] }
 0xcd9   : > { %v11566_v39 = vpop.f32.mrb[128].mxu0 }
 0xcda   : > { %v11490_v24 = vpop.f32.mrb[128].mxu1  ;;  %v14522_v44 = vpop.f32.mrb[129].mxu0  ;;  %12060 = vrot.lane.b32.xlu1 %v11566_v39, %s15046_s28 }
 0xcdb   : > { %12058 = vrot.lane.b32.xlu0 %v11490_v24, %s15046_s28  ;;  %v14517_v33 = vpop.f32.mrb[129].mxu1  ;;  %v18431_v44 = vld [vmem:[#allocation11_spill] sm:$0xff] }
 0xcdd   : > { %v11718_v21 = vpop.f32.mrb[130].mxu0 }
 0xcde   : > { %v11642_v14 = vpop.f32.mrb[130].mxu1  ;;  %v14532_v49 = vpop.f32.mrb[131].mxu0  ;;  %12064 = vrot.lane.b32.xlu1 %v11718_v21, %s15046_s28 }
 0xcdf   : > { %12062 = vrot.lane.b32.xlu0 %v11642_v14, %s15046_s28  ;;  %v14527_v17 = vpop.f32.mrb[131].mxu1  ;;  %v18432_v14 = vld [vmem:[#allocation10_spill] sm:$0xff] }
 0xce1   : > { %v11870_v26 = vpop.f32.mrb[132].mxu0 }
 0xce2   : > { %v11794_v22 = vpop.f32.mrb[132].mxu1  ;;  %v14542_v9 = vpop.f32.mrb[133].mxu0  ;;  %12068 = vrot.lane.b32.xlu1 %v11870_v26, %s15046_s28 }
 0xce3   : > { %12066 = vrot.lane.b32.xlu0 %v11794_v22, %s15046_s28  ;;  %v14537_v34 = vpop.f32.mrb[133].mxu1  ;;  %v18433_v9 = vld [vmem:[#allocation12_spill] sm:$0xff] }
 0xd0d   : > { %v11946_v30 = vpop.f32.mrb[134].mxu1 }
 0xd0e   : > { %12070 = vrot.lane.b32.xlu0 %v11946_v30, %s15046_s28  ;;  %v14547_v52 = vpop.f32.mrb[135].mxu1 }
 0xd15   : > { %v12022_v60 = vpop.f32.mrb[134].mxu0 }
 0xd16   : > { %12072 = vrot.lane.b32.xlu1 %v12022_v60, %s15046_s28  ;;  %v14552_v8 = vpop.f32.mrb[135].mxu0 }
 0xd38   : > { %v12043_v55 = vpop.permute.xlu0 %12042 }
 0xd39   : > { %12091 = vst.msk [vmem:[#allocation3] sm:$0xff] %vm12090_vm8, %v12043_v55 }
 0xd3b   : > { %v12045_v7 = vpop.permute.xlu1 %12044 }
 0xd3c   : > { %12092 = vst.msk [vmem:[#allocation3 + $0x8] sm:$0xff] %vm12090_vm8, %v12045_v7  ;;  %v12047_v20 = vpop.permute.xlu0 %12046 }
 0xd3d   : > { %12093 = vst.msk [vmem:[#allocation3 + $0x10] sm:$0xff] %vm12090_vm8, %v12047_v20 }
 0xd40   : > { %v12049_v43 = vpop.permute.xlu1 %12048  ;;  %v12107_v57 = vld [vmem:[#allocation3] sm:$0xff] }
 0xd41   : > { %12094 = vst.msk [vmem:[#allocation3 + $0x18] sm:$0xff] %vm12090_vm8, %v12049_v43 }
 0xd43   : > { %v12108_v28 = vld [vmem:[#allocation3 + $0x8] sm:$0xff] }
 0xd44   : > { %v12053_v12 = vpop.permute.xlu1 %12052  ;;  %v12123_v16 = vpack.c.bf16 %v12108_v28, %v12107_v57  ;;  %v12109_v40 = vld [vmem:[#allocation3 + $0x10] sm:$0xff]  ;;  %v18434_v57 = vld [vmem:[#allocation13_spill] sm:$0xff] }
 0xd45   : > { %12096 = vst.msk [vmem:[#allocation3 + $0x28] sm:$0xff] %vm12090_vm8, %v12053_v12  ;;  %v12051_v23 = vpop.permute.xlu0 %12050 }
 0xd46   : > { %12095 = vst.msk [vmem:[#allocation3 + $0x20] sm:$0xff] %vm12090_vm8, %v12051_v23  ;;  %14557 = vmatprep.mubr.msk.bf16.mxu0 %vm769_vm3, %v12123_v16  ;;  %v18435_v16 = vld [vmem:[#allocation14_spill] sm:$0xff] }
 0xd48   : > { %v12057_v41 = vpop.permute.xlu1 %12056  ;;  %v12110_v2 = vld [vmem:[#allocation3 + $0x18] sm:$0xff] }
 0xd49   : > { %12098 = vst.msk [vmem:[#allocation3 + $0x38] sm:$0xff] %vm12090_vm8, %v12057_v41  ;;  %v12055_v54 = vpop.permute.xlu0 %12054  ;;  %v12124_v27 = vpack.c.bf16 %v12110_v2, %v12109_v40  ;;  %v18436_v41 = vld [vmem:[#allocation16_spill] sm:$0xff] }
 0xd4a   : > { %12097 = vst.msk [vmem:[#allocation3 + $0x30] sm:$0xff] %vm12090_vm8, %v12055_v54 }
 0xd4b   : > { %14558 = vmatmul.mubr.msk.bf16.vlgmr.msra.gmra.mrb[136].mxu0 %vm769_vm3, %v12124_v27  ;;  %v18437_v27 = vld [vmem:[#allocation15_spill] sm:$0xff] }
 0xd4c   : > { %v12061_v18 = vpop.permute.xlu1 %12060  ;;  %v12112_v31 = vld [vmem:[#allocation3 + $0x28] sm:$0xff] }
 0xd4d   : > { %12100 = vst.msk [vmem:[#allocation3 + $0x48] sm:$0xff] %vm12090_vm8, %v12061_v18  ;;  %v12059_v4 = vpop.permute.xlu0 %12058  ;;  %v12111_v11 = vld [vmem:[#allocation3 + $0x20] sm:$0xff] }
 0xd4e   : > { %12099 = vst.msk [vmem:[#allocation3 + $0x40] sm:$0xff] %vm12090_vm8, %v12059_v4  ;;  %v12125_v37 = vpack.c.bf16 %v12112_v31, %v12111_v11 }
 0xd50   : > { %14561 = vmatprep.mubr.msk.bf16.mxu0 %vm769_vm3, %v12125_v37  ;;  %v12065_v53 = vpop.permute.xlu1 %12064  ;;  %v12114_v15 = vld [vmem:[#allocation3 + $0x38] sm:$0xff] }
 0xd51   : > { %12102 = vst.msk [vmem:[#allocation3 + $0x58] sm:$0xff] %vm12090_vm8, %v12065_v53  ;;  %v12063_v10 = vpop.permute.xlu0 %12062  ;;  %v12113_v19 = vld [vmem:[#allocation3 + $0x30] sm:$0xff] }
 0xd52   : > { %12101 = vst.msk [vmem:[#allocation3 + $0x50] sm:$0xff] %vm12090_vm8, %v12063_v10  ;;  %v12126_v29 = vpack.c.bf16 %v12114_v15, %v12113_v19 }
 0xd54   : > { %14562 = vmatmul.mubr.msk.bf16.gmra.mrb[140].mxu0 %vm769_vm3, %v12126_v29  ;;  %v12069_v36 = vpop.permute.xlu1 %12068  ;;  %v12116_v42 = vld [vmem:[#allocation3 + $0x48] sm:$0xff] }
 0xd55   : > { %12104 = vst.msk [vmem:[#allocation3 + $0x68] sm:$0xff] %vm12090_vm8, %v12069_v36  ;;  %v12067_v47 = vpop.permute.xlu0 %12066  ;;  %v12115_v6 = vld [vmem:[#allocation3 + $0x40] sm:$0xff]  ;;  %v18438_v36 = vld [vmem:[#allocation17_spill] sm:$0xff] }
 0xd56   : > { %12103 = vst.msk [vmem:[#allocation3 + $0x60] sm:$0xff] %vm12090_vm8, %v12067_v47  ;;  %v12127_v5 = vpack.c.bf16 %v12116_v42, %v12115_v6  ;;  %v18439_v6 = vld [vmem:[#allocation18_spill] sm:$0xff] }
 0xd58   : > { %14565 = vmatprep.mubr.msk.bf16.mxu1 %vm769_vm3, %v12127_v5  ;;  %v12118_v38 = vld [vmem:[#allocation3 + $0x58] sm:$0xff] }
 0xd59   : > { %v12117_v56 = vld [vmem:[#allocation3 + $0x50] sm:$0xff] }
 0xd5a   : > { %v12128_v32 = vpack.c.bf16 %v12118_v38, %v12117_v56  ;;  %v18440_v38 = vld [vmem:[#allocation20_spill] sm:$0xff] }
 0xd5c   : > { %14566 = vmatmul.mubr.msk.bf16.vlgmr.msra.gmra.mrb[136].mxu1 %vm769_vm3, %v12128_v32  ;;  %v12120_v45 = vld [vmem:[#allocation3 + $0x68] sm:$0xff] }
 0xd5d   : > { %v12119_v62 = vld [vmem:[#allocation3 + $0x60] sm:$0xff] }
 0xd5e   : > { %v12129_v51 = vpack.c.bf16 %v12120_v45, %v12119_v62  ;;  %v18441_v45 = vld [vmem:[#allocation19_spill] sm:$0xff] }
 0xd60   : > { %14569 = vmatprep.mubr.msk.bf16.mxu1 %vm769_vm3, %v12129_v51 }
 0xd80   : > { %v12071_v35 = vpop.permute.xlu0 %12070 }
 0xd81   : > { %12105 = vst.msk [vmem:[#allocation3 + $0x70] sm:$0xff] %vm12090_vm8, %v12071_v35 }
 0xd88   : > { %v12073_v61 = vpop.permute.xlu1 %12072  ;;  %v12121_v58 = vld [vmem:[#allocation3 + $0x70] sm:$0xff] }
 0xd89   : > { %12106 = vst.msk [vmem:[#allocation3 + $0x78] sm:$0xff] %vm12090_vm8, %v12073_v61 }
 0xd90   : > { %v12122_v46 = vld [vmem:[#allocation3 + $0x78] sm:$0xff] }
 0xd91   : > { %v12130_v1 = vpack.c.bf16 %v12122_v46, %v12121_v58 }
 0xd93   : > { %14570 = vmatmul.mubr.msk.bf16.gmra.mrb[140].mxu1 %vm769_vm3, %v12130_v1 }
 0xe1e   : > { %v14559_v50 = vpop.f32.mrb[136].mxu0 }
 0xe1f   : > { %v12212_v25 = vpop.f32.mrb[137].mxu0  ;;  %v12221_v63 = vadd.f32 %v14559_v50, %v17723_v48 }
 0xe20   : > { %v12213_v0 = vadd.f32 %v17723_v48, %v12212_v25  ;;  %v14560_v13 = vpop.f32.mrb[138].mxu0 }
 0xe21   : > { %v12215_v3 = vpop.f32.mrb[139].mxu0  ;;  %v17732_v33 = vadd.f32 %v12221_v63, %v18431_v44  ;;  %v12224_v21 = vadd.f32 %v14560_v13, %v17723_v48 }
 0xe22   : > { %v17728_v39 = vadd.f32 %v12213_v0, %v18430_v59  ;;  %v12216_v24 = vadd.f32 %v17723_v48, %v12215_v3  ;;  %v18442_v0 = vld [vmem:[#allocation21_spill] sm:$0xff] }
 0xe23   : > { %v17743_v34 = vadd.f32 %v12224_v21, %v18433_v9  ;;  %v12299_v52 = vsel %vm769_vm3, %v17732_v33, 0.0  ;;  %v18444_v21 = vld [vmem:[#allocation22_spill] sm:$0xff] }
 0xe24   : > { %v17736_v49 = vadd.f32 %v12216_v24, %v18432_v14  ;;  %v12293_v17 = vsel %vm769_vm3, %v17728_v39, 0.0  ;;  %v18443_v24 = vld [vmem:[#allocation23_spill] sm:$0xff] }
 0xe25   : > { %12294 = vadd.xlane.f32.xlu0 %v12293_v17  ;;  %v12302_v12 = vsel %vm769_vm3, %v17743_v34, 0.0 }
 0xe26   : > { %v12296_v26 = vsel %vm769_vm3, %v17736_v49, 0.0 }
 0xe27   : > { %v14563_v22 = vpop.f32.mrb[140].mxu0  ;;  %12297 = vadd.xlane.f32.xlu1 %v12296_v26  ;;  %v18445_v26 = vld [vmem:[#allocation24_spill] sm:$0xff] }
 0xe28   : > { %v12228_v30 = vpop.f32.mrb[141].mxu0  ;;  %v12237_v43 = vadd.f32 %v14563_v22, %v17723_v48 }
 0xe29   : > { %v12229_v60 = vadd.f32 %v17723_v48, %v12228_v30  ;;  %v14564_v8 = vpop.f32.mrb[142].mxu0  ;;  %12300 = vadd.xlane.f32.xlu0 %v12299_v52 }
 0xe2a   : > { %v12231_v55 = vpop.f32.mrb[143].mxu0  ;;  %v12240_v7 = vadd.f32 %v14564_v8, %v17723_v48  ;;  %v17765_v18 = vadd.f32 %v12237_v43, %v18437_v27 }
 0xe2b   : > { %v12232_v20 = vadd.f32 %v17723_v48, %v12231_v55  ;;  %v17752_v28 = vadd.f32 %v12229_v60, %v18434_v57 }
 0xe2c   : > { %v17760_v40 = vadd.f32 %v12240_v7, %v18436_v41  ;;  %v12311_v47 = vsel %vm769_vm3, %v17765_v18, 0.0 }
 0xe2d   : > { %v17757_v23 = vadd.f32 %v12232_v20, %v18435_v16  ;;  %12303 = vadd.xlane.f32.xlu0 %v12302_v12  ;;  %v12305_v4 = vsel %vm769_vm3, %v17752_v28, 0.0 }
 0xe2e   : > { %v12314_v19 = vsel %vm769_vm3, %v17760_v40, 0.0 }
 0xe2f   : > { %v14567_v2 = vpop.f32.mrb[136].mxu1  ;;  %v12308_v54 = vsel %vm769_vm3, %v17757_v23, 0.0 }
 0xe30   : > { %12309 = vadd.xlane.f32.xlu1 %v12308_v54  ;;  %v12244_v31 = vpop.f32.mrb[137].mxu1  ;;  %v12253_v29 = vadd.f32 %v14567_v2, %v17723_v48 }
 0xe31   : > { %v12245_v11 = vadd.f32 %v17723_v48, %v12244_v31  ;;  %v14568_v37 = vpop.f32.mrb[138].mxu1  ;;  %12306 = vadd.xlane.f32.xlu0 %v12305_v4 }
 0xe32   : > { %v12247_v53 = vpop.f32.mrb[139].mxu1  ;;  %v12256_v15 = vadd.f32 %v14568_v37, %v17723_v48  ;;  %v17789_v62 = vadd.f32 %v12253_v29, %v18441_v45 }
 0xe33   : > { %v12248_v10 = vadd.f32 %v17723_v48, %v12247_v53  ;;  %v17776_v42 = vadd.f32 %v12245_v11, %v18438_v36 }
 0xe34   : > { %12315 = vadd.xlane.f32.xlu1 %v12314_v19  ;;  %v17784_v56 = vadd.f32 %v12256_v15, %v18440_v38  ;;  %v12323_v61 = vsel %vm769_vm3, %v17789_v62, 0.0 }
 0xe35   : > { %v17781_v5 = vadd.f32 %v12248_v10, %v18439_v6  ;;  %12312 = vadd.xlane.f32.xlu0 %v12311_v47  ;;  %v12317_v51 = vsel %vm769_vm3, %v17776_v42, 0.0 }
 0xe36   : > { %v12326_v35 = vsel %vm769_vm3, %v17784_v56, 0.0 }
 0xe37   : > { %v12320_v32 = vsel %vm769_vm3, %v17781_v5, 0.0 }
 0xe38   : > { %12321 = vadd.xlane.f32.xlu1 %v12320_v32 }
 0xe39   : > { %12318 = vadd.xlane.f32.xlu0 %v12317_v51 }
 0xe3c   : > { %12327 = vadd.xlane.f32.xlu1 %v12326_v35 }
 0xe3d   : > { %12324 = vadd.xlane.f32.xlu0 %v12323_v61 }
 0xe66   : > { %v14571_v58 = vpop.f32.mrb[140].mxu1 }
 0xe67   : > { %v12260_v46 = vpop.f32.mrb[141].mxu1  ;;  %v12269_v1 = vadd.f32 %v14571_v58, %v17723_v48 }
 0xe68   : > { %v12261_v50 = vadd.f32 %v17723_v48, %v12260_v46  ;;  %v14572_v25 = vpop.f32.mrb[142].mxu1 }
 0xe69   : > { %v12263_v63 = vpop.f32.mrb[143].mxu1  ;;  %v12272_v3 = vadd.f32 %v14572_v25, %v17723_v48  ;;  %v17805_v44 = vadd.f32 %v12269_v1, %v18443_v24 }
 0xe6a   : > { %v17800_v13 = vadd.f32 %v12261_v50, %v18442_v0  ;;  %v12264_v59 = vadd.f32 %v17723_v48, %v12263_v63 }
 0xe6b   : > { %v17813_v22 = vadd.f32 %v12272_v3, %v18445_v26  ;;  %v12335_v48 = vsel %vm769_vm3, %v17805_v44, 0.0 }
 0xe6c   : > { %v17808_v14 = vadd.f32 %v12264_v59, %v18444_v21  ;;  %v12329_v17 = vsel %vm769_vm3, %v17800_v13, 0.0 }
 0xe6d   : > { %12330 = vadd.xlane.f32.xlu0 %v12329_v17  ;;  %v12338_v30 = vsel %vm769_vm3, %v17813_v22, 0.0 }
 0xe6e   : > { %v12332_v9 = vsel %vm769_vm3, %v17808_v14, 0.0 }
 0xe6f   : > { %12333 = vadd.xlane.f32.xlu1 %v12332_v9 }
 0xe71   : > { %12336 = vadd.xlane.f32.xlu0 %v12335_v48 }
 0xe73   : > { %12339 = vadd.xlane.f32.xlu1 %v12338_v30 }
 0xeb2   : > { %v12295_v52 = vpop.xlane.xlu0 %12294 }
 0xeb3   : > { %v12341_v60 = vmul.f32 0.03125, %v12295_v52 }
 0xeb4   : > { %v12298_v8 = vpop.xlane.xlu1 %12297 }
 0xeb5   : > { %v17822_v55 = vsub.f32 %v17728_v39, %v12341_v60  ;;  %v12342_v7 = vmul.f32 0.03125, %v12298_v8  ;;  %v14672_v60 = vld [vmem:[%s15190_s3 + $0x8] sm:$0xff]  }
 0xeb6   : > { %v12301_v20 = vpop.xlane.xlu0 %12300 }
 0xeb7   : > { %v17825_v43 = vsub.f32 %v17736_v49, %v12342_v7  ;;  %v12343_v57 = vmul.f32 0.03125, %v12301_v20  ;;  %v12373_v12 = vmul.f32 %v17822_v55, %v17822_v55 }
 0xeb9   : > { %v17830_v16 = vsub.f32 %v17732_v33, %v12343_v57  ;;  %v12389_v41 = vsel %vm769_vm3, %v12373_v12, 0.0  ;;  %v12374_v2 = vmul.f32 %v17825_v43, %v17825_v43 }
 0xeba   : > { %12390 = vadd.xlane.f32.xlu0 %v12389_v41  ;;  %v12304_v39 = vpop.xlane.xlu0 %12303 }
 0xebb   : > { %v12344_v54 = vmul.f32 0.03125, %v12304_v39  ;;  %v12392_v27 = vsel %vm769_vm3, %v12374_v2, 0.0  ;;  %v12375_v49 = vmul.f32 %v17830_v16, %v17830_v16 }
 0xebc   : > { %12393 = vadd.xlane.f32.xlu1 %v12392_v27 }
 0xebd   : > { %v17839_v31 = vsub.f32 %v17743_v34, %v12344_v54  ;;  %v12310_v4 = vpop.xlane.xlu1 %12309  ;;  %v12395_v33 = vsel %vm769_vm3, %v12375_v49, 0.0 }
 0xebe   : > { %v12346_v11 = vmul.f32 0.03125, %v12310_v4  ;;  %12396 = vadd.xlane.f32.xlu0 %v12395_v33  ;;  %v12307_v37 = vpop.xlane.xlu0 %12306 }
 0xebf   : > { %v12345_v53 = vmul.f32 0.03125, %v12307_v37  ;;  %v12376_v15 = vmul.f32 %v17839_v31, %v17839_v31 }
 0xec0   : > { %v17845_v10 = vsub.f32 %v17757_v23, %v12346_v11 }
 0xec1   : > { %v17848_v19 = vsub.f32 %v17752_v28, %v12345_v53  ;;  %v12316_v29 = vpop.xlane.xlu1 %12315  ;;  %v12398_v34 = vsel %vm769_vm3, %v12376_v15, 0.0 }
 0xec2   : > { %v12348_v36 = vmul.f32 0.03125, %v12316_v29  ;;  %12399 = vadd.xlane.f32.xlu1 %v12398_v34  ;;  %v12313_v47 = vpop.xlane.xlu0 %12312  ;;  %v12378_v6 = vmul.f32 %v17845_v10, %v17845_v10  ;;  %v14673_v29 = vld [vmem:[%s15200_s26] sm:$0xff]   ;;  %v14674_v34 = vld [vmem:[%s15200_s26 + $0x8] sm:$0xff]  }
 0xec3   : > { %v12347_v38 = vmul.f32 0.03125, %v12313_v47  ;;  %v12377_v32 = vmul.f32 %v17848_v19, %v17848_v19  ;;  %14593 = vmatprep.subr.bf16.mxu1 %v14673_v29 }
 0xec4   : > { %v17856_v45 = vsub.f32 %v17760_v40, %v12348_v36  ;;  %v12404_v51 = vsel %vm769_vm3, %v12378_v6, 0.0  ;;  %14594 = vmatpush3.bf16.msra.mxu1 %v14673_v29 }
 0xec5   : > { %v17859_v23 = vsub.f32 %v17765_v18, %v12347_v38  ;;  %v12322_v28 = vpop.xlane.xlu1 %12321  ;;  %v12401_v35 = vsel %vm769_vm3, %v12377_v32, 0.0  ;;  %14595 = vmatprep.subr.bf16.mxu1 %v14674_v34 }
 0xec6   : > { %v12350_v61 = vmul.f32 0.03125, %v12322_v28  ;;  %12405 = vadd.xlane.f32.xlu1 %v12404_v51  ;;  %12402 = vadd.xlane.f32.xlu0 %v12401_v35  ;;  %v12319_v58 = vpop.xlane.xlu0 %12318  ;;  %v12380_v46 = vmul.f32 %v17856_v45, %v17856_v45 }
 0xec7   : > { %v12349_v1 = vmul.f32 0.03125, %v12319_v58  ;;  %v12379_v40 = vmul.f32 %v17859_v23, %v17859_v23 }
 0xec8   : > { %v17868_v50 = vsub.f32 %v17781_v5, %v12350_v61  ;;  %v12410_v63 = vsel %vm769_vm3, %v12380_v46, 0.0  ;;  %14596 = vmatpush3.bf16.msra.mxu1 %v14674_v34 }
 0xec9   : > { %v17871_v18 = vsub.f32 %v17776_v42, %v12349_v1  ;;  %v12328_v25 = vpop.xlane.xlu1 %12327  ;;  %v12407_v0 = vsel %vm769_vm3, %v12379_v40, 0.0 }
 0xeca   : > { %v12352_v3 = vmul.f32 0.03125, %v12328_v25  ;;  %12411 = vadd.xlane.f32.xlu1 %v12410_v63  ;;  %12408 = vadd.xlane.f32.xlu0 %v12407_v0  ;;  %v12325_v59 = vpop.xlane.xlu0 %12324  ;;  %v12382_v24 = vmul.f32 %v17868_v50, %v17868_v50 }
 0xecb   : > { %v12351_v21 = vmul.f32 0.03125, %v12325_v59  ;;  %v12381_v5 = vmul.f32 %v17871_v18, %v17871_v18 }
 0xecc   : > { %v17880_v42 = vsub.f32 %v17784_v56, %v12352_v3  ;;  %v12416_v26 = vsel %vm769_vm3, %v12382_v24, 0.0  ;;  %v17926_v3 = vld [vmem:[%s677_s13] ss:$0 sm:$0xff] }
 0xecd   : > { %v17883_v17 = vsub.f32 %v17789_v62, %v12351_v21  ;;  %v12413_v9 = vsel %vm769_vm3, %v12381_v5, 0.0  ;;  %v14671_v62 = vld [vmem:[%s15190_s3] sm:$0xff]   ;;  %s18448_s3 = sld [smem:[#allocation53_spill]] (!%p13574_p6) }
 0xece   : > { %12417 = vadd.xlane.f32.xlu1 %v12416_v26  ;;  %12414 = vadd.xlane.f32.xlu0 %v12413_v9  ;;  %v12384_v48 = vmul.f32 %v17880_v42, %v17880_v42 }
 0xecf   : > { %v12383_v30 = vmul.f32 %v17883_v17, %v17883_v17  ;;  %14573 = vmatprep.subr.bf16.mxu0 %v14671_v62 }
 0xed0   : > { %v12422_v52 = vsel %vm769_vm3, %v12384_v48, 0.0  ;;  %14574 = vmatpush3.bf16.msra.mxu0 %v14671_v62 }
 0xed1   : > { %v12419_v56 = vsel %vm769_vm3, %v12383_v30, 0.0  ;;  %14575 = vmatprep.subr.bf16.mxu0 %v14672_v60 }
 0xed2   : > { %12423 = vadd.xlane.f32.xlu1 %v12422_v52  ;;  %12420 = vadd.xlane.f32.xlu0 %v12419_v56 }
 0xed4   : > { %14576 = vmatpush3.bf16.msra.mxu0 %v14672_v60  ;;  %v17936_v60 = vld [vmem:[%s680_s17] ss:$0 sm:$0xff] }
 0xefa   : > { %v12331_v8 = vpop.xlane.xlu0 %12330 }
 0xefb   : > { %v12353_v7 = vmul.f32 0.03125, %v12331_v8 }
 0xefc   : > { %v12334_v20 = vpop.xlane.xlu1 %12333 }
 0xefd   : > { %v17896_v57 = vsub.f32 %v17800_v13, %v12353_v7  ;;  %v12354_v12 = vmul.f32 0.03125, %v12334_v20 }
 0xefe   : > { %v12337_v41 = vpop.xlane.xlu0 %12336 }
 0xeff   : > { %v17899_v2 = vsub.f32 %v17808_v14, %v12354_v12  ;;  %v12355_v39 = vmul.f32 0.03125, %v12337_v41  ;;  %v12385_v54 = vmul.f32 %v17896_v57, %v17896_v57 }
 0xf00   : > { %v12340_v27 = vpop.xlane.xlu1 %12339 }
 0xf01   : > { %v17904_v49 = vsub.f32 %v17805_v44, %v12355_v39  ;;  %v12356_v4 = vmul.f32 0.03125, %v12340_v27  ;;  %v12425_v33 = vsel %vm769_vm3, %v12385_v54, 0.0  ;;  %v12386_v13 = vmul.f32 %v17899_v2, %v17899_v2 }
 0xf02   : > { %12426 = vadd.xlane.f32.xlu0 %v12425_v33 }
 0xf03   : > { %v17910_v14 = vsub.f32 %v17813_v22, %v12356_v4  ;;  %v12428_v11 = vsel %vm769_vm3, %v12386_v13, 0.0  ;;  %v12387_v37 = vmul.f32 %v17904_v49, %v17904_v49 }
 0xf04   : > { %12429 = vadd.xlane.f32.xlu1 %v12428_v11 }
 0xf05   : > { %v12431_v53 = vsel %vm769_vm3, %v12387_v37, 0.0  ;;  %v12388_v44 = vmul.f32 %v17910_v14, %v17910_v14 }
 0xf06   : > { %12432 = vadd.xlane.f32.xlu0 %v12431_v53 }
 0xf07   : > { %v12434_v15 = vsel %vm769_vm3, %v12388_v44, 0.0 }
 0xf08   : > { %12435 = vadd.xlane.f32.xlu1 %v12434_v15 }
 0xf47   : > { %v12391_v22 = vpop.xlane.xlu0 %12390 }
 0xf48   : > { %v12437_v36 = vmul.f32 0.03125, %v12391_v22 }
 0xf49   : > { %v12394_v47 = vpop.xlane.xlu1 %12393 }
 0xf4a   : > { %v12453_v6 = vadd.f32 1e-05, %v12437_v36  ;;  %v12438_v38 = vmul.f32 0.03125, %v12394_v47 }
 0xf4b   : > { %v12397_v32 = vpop.xlane.xlu0 %12396 }
 0xf4c   : > { %14965 = vrsqrt.f32 %v12453_v6  ;;  %v12454_v28 = vadd.f32 1e-05, %v12438_v38  ;;  %v12439_v51 = vmul.f32 0.03125, %v12397_v32 }
 0xf4e   : > { %14967 = vrsqrt.f32 %v12454_v28  ;;  %v12455_v35 = vadd.f32 1e-05, %v12439_v51 }
 0xf4f   : > { %v12400_v61 = vpop.xlane.xlu1 %12399 }
 0xf50   : > { %14969 = vrsqrt.f32 %v12455_v35  ;;  %v12440_v58 = vmul.f32 0.03125, %v12400_v61 }
 0xf52   : > { %v12456_v46 = vadd.f32 1e-05, %v12440_v58 }
 0xf53   : > { %v12406_v1 = vpop.xlane.xlu1 %12405  ;;  %v12403_v40 = vpop.xlane.xlu0 %12402 }
 0xf54   : > { %14971 = vrsqrt.f32 %v12456_v46  ;;  %v12442_v25 = vmul.f32 0.03125, %v12406_v1  ;;  %v12441_v63 = vmul.f32 0.03125, %v12403_v40 }
 0xf56   : > { %v14966_v0 = vpop.eup %14965  ;;  %v12458_v59 = vadd.f32 1e-05, %v12442_v25  ;;  %v12457_v24 = vadd.f32 1e-05, %v12441_v63 }
 0xf57   : > { %v12485_v21 = vmul.f32 %v14966_v0, %v17822_v55  ;;  %v12412_v5 = vpop.xlane.xlu1 %12411  ;;  %v12409_v26 = vpop.xlane.xlu0 %12408 }
 0xf58   : > { %v14968_v9 = vpop.eup %14967  ;;  %14973 = vrsqrt.f32 %v12458_v59  ;;  %v12444_v48 = vmul.f32 0.03125, %v12412_v5  ;;  %v12443_v30 = vmul.f32 0.03125, %v12409_v26 }
 0xf59   : > { %v12486_v52 = vmul.f32 %v14968_v9, %v17825_v43  ;;  %14975 = vrsqrt.f32 %v12457_v24  ;;  %v12507_v56 = vmul.f32 %v17926_v3, %v12485_v21 }
 0xf5a   : > { %v14970_v62 = vpop.eup %14969  ;;  %v12460_v8 = vadd.f32 1e-05, %v12444_v48  ;;  %v12459_v55 = vadd.f32 1e-05, %v12443_v30 }
 0xf5b   : > { %v12487_v7 = vmul.f32 %v14970_v62, %v17830_v16  ;;  %v12418_v20 = vpop.xlane.xlu1 %12417  ;;  %v12415_v12 = vpop.xlane.xlu0 %12414  ;;  %v12508_v41 = vmul.f32 %v17926_v3, %v12486_v52  ;;  %v17941_v54 = vadd.f32 %v17936_v60, %v12507_v56 }
 0xf5c   : > { %14977 = vrsqrt.f32 %v12460_v8  ;;  %v12446_v43 = vmul.f32 0.03125, %v12418_v20  ;;  %v12445_v39 = vmul.f32 0.03125, %v12415_v12 }
 0xf5d   : > { %14979 = vrsqrt.f32 %v12459_v55  ;;  %v17944_v27 = vadd.f32 %v17936_v60, %v12508_v41  ;;  %v12509_v11 = vmul.f32 %v17926_v3, %v12487_v7 }
 0xf5e   : > { %v14972_v4 = vpop.eup %14971  ;;  %v12462_v33 = vadd.f32 1e-05, %v12446_v43  ;;  %v12461_v13 = vadd.f32 1e-05, %v12445_v39 }
 0xf5f   : > { %v12488_v16 = vmul.f32 %v14972_v4, %v17839_v31  ;;  %v12424_v37 = vpop.xlane.xlu1 %12423  ;;  %v12421_v53 = vpop.xlane.xlu0 %12420  ;;  %v12545_v44 = vpack.c.bf16 %v17944_v27, %v17941_v54  ;;  %v17953_v38 = vadd.f32 %v17936_v60, %v12509_v11 }
 0xf60   : > { %14981 = vrsqrt.f32 %v12462_v33  ;;  %v12448_v15 = vmul.f32 0.03125, %v12424_v37  ;;  %v12447_v29 = vmul.f32 0.03125, %v12421_v53 }
 0xf61   : > { %v12510_v34 = vmul.f32 %v17926_v3, %v12488_v16  ;;  %14983 = vrsqrt.f32 %v12461_v13  ;;  %14577 = vmatprep.mubr.msk.bf16.mxu0 %vm769_vm3, %v12545_v44 }
 0xf62   : > { %v14974_v22 = vpop.eup %14973  ;;  %v12464_v36 = vadd.f32 1e-05, %v12448_v15  ;;  %v12463_v47 = vadd.f32 1e-05, %v12447_v29 }
 0xf63   : > { %v14976_v6 = vpop.eup %14975  ;;  %v17956_v31 = vadd.f32 %v17936_v60, %v12510_v34  ;;  %v12490_v32 = vmul.f32 %v14974_v22, %v17845_v10 }
 0xf64   : > { %v12489_v28 = vmul.f32 %v14976_v6, %v17848_v19  ;;  %14985 = vrsqrt.f32 %v12464_v36 }
 0xf65   : > { %14987 = vrsqrt.f32 %v12463_v47  ;;  %v12546_v51 = vpack.c.bf16 %v17956_v31, %v17953_v38  ;;  %v12512_v35 = vmul.f32 %v17926_v3, %v12490_v32 }
 0xf66   : > { %v14978_v61 = vpop.eup %14977  ;;  %v12511_v58 = vmul.f32 %v17926_v3, %v12489_v28 }
 0xf67   : > { %v14980_v46 = vpop.eup %14979  ;;  %v12492_v1 = vmul.f32 %v14978_v61, %v17856_v45  ;;  %14578 = vmatmul.mubr.msk.bf16.vlgmr.msra.gmra.mrb[144].mxu0 %vm769_vm3, %v12546_v51  ;;  %v17967_v40 = vadd.f32 %v17936_v60, %v12512_v35 }
 0xf68   : > { %v12491_v10 = vmul.f32 %v14980_v46, %v17859_v23  ;;  %v17971_v19 = vadd.f32 %v17936_v60, %v12511_v58 }
 0xf69   : > { %v12514_v25 = vmul.f32 %v17926_v3, %v12492_v1  ;;  %v14675_v1 = vld [vmem:[%s15200_s26 + $0x10] sm:$0xff]  }
 0xf6a   : > { %v14982_v63 = vpop.eup %14981  ;;  %v12547_v0 = vpack.c.bf16 %v17967_v40, %v17971_v19  ;;  %v12513_v59 = vmul.f32 %v17926_v3, %v12491_v10  ;;  %14597 = vmatprep.subr.bf16.mxu1 %v14675_v1  ;;  %v14676_v10 = vld [vmem:[%s15200_s26 + $0x18] sm:$0xff]  }
 0xf6b   : > { %v14984_v24 = vpop.eup %14983  ;;  %v12494_v45 = vmul.f32 %v14982_v63, %v17868_v50  ;;  %v17979_v21 = vadd.f32 %v17936_v60, %v12514_v25  ;;  %14598 = vmatpush3.bf16.msra.mxu1 %v14675_v1 }
 0xf6c   : > { %v12493_v5 = vmul.f32 %v14984_v24, %v17871_v18  ;;  %14581 = vmatprep.mubr.msk.bf16.mxu0 %vm769_vm3, %v12547_v0  ;;  %v17984_v23 = vadd.f32 %v17936_v60, %v12513_v59  ;;  %14599 = vmatprep.subr.bf16.mxu1 %v14676_v10 }
 0xf6d   : > { %v12516_v26 = vmul.f32 %v17926_v3, %v12494_v45 }
 0xf6e   : > { %v14986_v9 = vpop.eup %14985  ;;  %v12548_v48 = vpack.c.bf16 %v17979_v21, %v17984_v23  ;;  %v12515_v30 = vmul.f32 %v17926_v3, %v12493_v5 }
 0xf6f   : > { %v14988_v52 = vpop.eup %14987  ;;  %v12496_v50 = vmul.f32 %v14986_v9, %v17880_v42  ;;  %v17992_v56 = vadd.f32 %v17936_v60, %v12516_v26  ;;  %14600 = vmatpush3.bf16.msra.mxu1 %v14676_v10 }
 0xf70   : > { %v12495_v18 = vmul.f32 %v14988_v52, %v17883_v17  ;;  %14582 = vmatmul.mubr.msk.bf16.gmra.mrb[148].mxu0 %vm769_vm3, %v12548_v48  ;;  %v17997_v62 = vadd.f32 %v17936_v60, %v12515_v30 }
 0xf71   : > { %v12518_v8 = vmul.f32 %v17926_v3, %v12496_v50 }
 0xf72   : > { %v12549_v55 = vpack.c.bf16 %v17992_v56, %v17997_v62  ;;  %v12517_v7 = vmul.f32 %v17926_v3, %v12495_v18 }
 0xf73   : > { %v18004_v20 = vadd.f32 %v17936_v60, %v12518_v8 }
 0xf74   : > { %14585 = vmatprep.mubr.msk.bf16.mxu0 %vm769_vm3, %v12549_v55  ;;  %v18008_v42 = vadd.f32 %v17936_v60, %v12517_v7 }
 0xf76   : > { %v12550_v17 = vpack.c.bf16 %v18004_v20, %v18008_v42 }
 0xf78   : > { %14586 = vmatmul.mubr.msk.bf16.gmra.mrb[152].mxu0 %vm769_vm3, %v12550_v17 }
 0xf8f   : > { %v12427_v12 = vpop.xlane.xlu0 %12426 }
 0xf90   : > { %v12449_v41 = vmul.f32 0.03125, %v12427_v12 }
 0xf91   : > { %v12430_v43 = vpop.xlane.xlu1 %12429 }
 0xf92   : > { %v12465_v39 = vadd.f32 1e-05, %v12449_v41  ;;  %v12450_v4 = vmul.f32 0.03125, %v12430_v43 }
 0xf93   : > { %v12433_v33 = vpop.xlane.xlu0 %12432 }
 0xf94   : > { %14989 = vrsqrt.f32 %v12465_v39  ;;  %v12466_v13 = vadd.f32 1e-05, %v12450_v4  ;;  %v12451_v11 = vmul.f32 0.03125, %v12433_v33 }
 0xf95   : > { %v12436_v16 = vpop.xlane.xlu1 %12435 }
 0xf96   : > { %14991 = vrsqrt.f32 %v12466_v13  ;;  %v12467_v37 = vadd.f32 1e-05, %v12451_v11  ;;  %v12452_v53 = vmul.f32 0.03125, %v12436_v16 }
 0xf98   : > { %14993 = vrsqrt.f32 %v12467_v37  ;;  %v12468_v44 = vadd.f32 1e-05, %v12452_v53 }
 0xf9a   : > { %14995 = vrsqrt.f32 %v12468_v44 }
 0xf9e   : > { %v14990_v15 = vpop.eup %14989 }
 0xf9f   : > { %v12497_v29 = vmul.f32 %v14990_v15, %v17896_v57 }
 0xfa0   : > { %v14992_v34 = vpop.eup %14991 }
 0xfa1   : > { %v12498_v22 = vmul.f32 %v14992_v34, %v17899_v2  ;;  %v12519_v36 = vmul.f32 %v17926_v3, %v12497_v29 }
 0xfa2   : > { %v14994_v47 = vpop.eup %14993 }
 0xfa3   : > { %v12499_v6 = vmul.f32 %v14994_v47, %v17904_v49  ;;  %v12520_v32 = vmul.f32 %v17926_v3, %v12498_v22  ;;  %v18020_v35 = vadd.f32 %v17936_v60, %v12519_v36 }
 0xfa4   : > { %v14996_v28 = vpop.eup %14995 }
 0xfa5   : > { %v12500_v51 = vmul.f32 %v14996_v28, %v17910_v14  ;;  %v18023_v57 = vadd.f32 %v17936_v60, %v12520_v32  ;;  %v12521_v2 = vmul.f32 %v17926_v3, %v12499_v6 }
 0xfa7   : > { %v12551_v61 = vpack.c.bf16 %v18023_v57, %v18020_v35  ;;  %v12522_v49 = vmul.f32 %v17926_v3, %v12500_v51  ;;  %v18031_v58 = vadd.f32 %v17936_v60, %v12521_v2  ;;  %v13550_v3 = vld [vmem:[%s688_s5] ss:$0 sm:$0xff] }
 0xfa9   : > { %14589 = vmatprep.mubr.msk.bf16.mxu0 %vm769_vm3, %v12551_v61  ;;  %v18034_v14 = vadd.f32 %v17936_v60, %v12522_v49 }
 0xfab   : > { %v12552_v46 = vpack.c.bf16 %v18034_v14, %v18031_v58 }
 0xfad   : > { %14590 = vmatmul.mubr.msk.bf16.gmra.mrb[156].mxu0 %vm769_vm3, %v12552_v46 }
0x103a   : > { %v14579_v25 = vpop.f32.mrb[144].mxu0 }
0x103b   : > { %v12643_v63 = vadd.f32 %v14579_v25, %v13550_v3  ;;  %v12634_v60 = vpop.f32.mrb[145].mxu0 }
0x103c   : > { %v12635_v0 = vadd.f32 %v13550_v3, %v12634_v60  ;;  %v14580_v59 = vpop.f32.mrb[146].mxu0 }
0x103d   : > { %v12646_v24 = vadd.f32 %v14580_v59, %v13550_v3  ;;  %v12637_v45 = vpop.f32.mrb[147].mxu0  ;;  %v12699_v26 = vmax.f32 %v12643_v63, 0.0 }
0x103e   : > { %v12638_v5 = vadd.f32 %v13550_v3, %v12637_v45  ;;  %v12697_v48 = vmax.f32 %v12635_v0, 0.0 }
0x103f   : > { %v12700_v9 = vmax.f32 %v12646_v24, 0.0 }
0x1040   : > { %v12698_v30 = vmax.f32 %v12638_v5, 0.0 }
0x1041   : > { %v12714_v52 = vpack.c.bf16 %v12700_v9, %v12699_v26  ;;  %v13561_v9 = vld [vmem:[%s696_s30] ss:$0 sm:$0xff] }
0x1042   : > { %v12713_v50 = vpack.c.bf16 %v12698_v30, %v12697_v48 }
0x1043   : > { %v14583_v18 = vpop.f32.mrb[148].mxu0 }
0x1044   : > { %v12659_v8 = vadd.f32 %v14583_v18, %v13550_v3  ;;  %v12650_v55 = vpop.f32.mrb[149].mxu0  ;;  %14601 = vmatprep.mubr.msk.bf16.mxu1 %vm12760_vm9, %v12713_v50 }
0x1045   : > { %v12651_v7 = vadd.f32 %v13550_v3, %v12650_v55  ;;  %v14584_v17 = vpop.f32.mrb[150].mxu0  ;;  %14602 = vmatmul.mubr.msk.bf16.vlgmr.msra.gmra.mrb[144].mxu1 %vm12760_vm9, %v12714_v52 }
0x1046   : > { %v12662_v12 = vadd.f32 %v14584_v17, %v13550_v3  ;;  %v12653_v41 = vpop.f32.mrb[151].mxu0  ;;  %v12703_v39 = vmax.f32 %v12659_v8, 0.0 }
0x1047   : > { %v12654_v43 = vadd.f32 %v13550_v3, %v12653_v41  ;;  %v12701_v33 = vmax.f32 %v12651_v7, 0.0 }
0x1048   : > { %v12704_v4 = vmax.f32 %v12662_v12, 0.0 }
0x1049   : > { %v12702_v13 = vmax.f32 %v12654_v43, 0.0 }
0x104a   : > { %v12716_v11 = vpack.c.bf16 %v12704_v4, %v12703_v39 }
0x104b   : > { %v12715_v16 = vpack.c.bf16 %v12702_v13, %v12701_v33  ;;  %v14587_v37 = vpop.f32.mrb[152].mxu0 }
0x104c   : > { %v12675_v53 = vadd.f32 %v14587_v37, %v13550_v3  ;;  %v12666_v44 = vpop.f32.mrb[153].mxu0 }
0x104d   : > { %v12667_v15 = vadd.f32 %v13550_v3, %v12666_v44  ;;  %v14588_v29 = vpop.f32.mrb[154].mxu0  ;;  %14605 = vmatprep.mubr.msk.bf16.mxu1 %vm12760_vm9, %v12715_v16 }
0x104e   : > { %v12678_v34 = vadd.f32 %v14588_v29, %v13550_v3  ;;  %v12669_v22 = vpop.f32.mrb[155].mxu0  ;;  %14606 = vmatmul.mubr.msk.bf16.gmra.mrb[148].mxu1 %vm12760_vm9, %v12716_v11  ;;  %v12707_v47 = vmax.f32 %v12675_v53, 0.0 }
0x104f   : > { %v12670_v36 = vadd.f32 %v13550_v3, %v12669_v22  ;;  %v12705_v32 = vmax.f32 %v12667_v15, 0.0 }
0x1050   : > { %v12708_v6 = vmax.f32 %v12678_v34, 0.0 }
0x1051   : > { %v12706_v28 = vmax.f32 %v12670_v36, 0.0 }
0x1052   : > { %v12718_v51 = vpack.c.bf16 %v12708_v6, %v12707_v47 }
0x1053   : > { %v12717_v2 = vpack.c.bf16 %v12706_v28, %v12705_v32 }
0x1055   : > { %14609 = vmatprep.mubr.msk.bf16.mxu1 %vm12760_vm9, %v12717_v2 }
0x1056   : > { %14610 = vmatmul.mubr.msk.bf16.gmra.mrb[152].mxu1 %vm12760_vm9, %v12718_v51 }
0x1080   : > { %v14591_v61 = vpop.f32.mrb[156].mxu0 }
0x1081   : > { %v12691_v49 = vadd.f32 %v14591_v61, %v13550_v3  ;;  %v12682_v46 = vpop.f32.mrb[157].mxu0 }
0x1082   : > { %v12683_v1 = vadd.f32 %v13550_v3, %v12682_v46  ;;  %v14592_v10 = vpop.f32.mrb[158].mxu0 }
0x1083   : > { %v12694_v25 = vadd.f32 %v14592_v10, %v13550_v3  ;;  %v12685_v63 = vpop.f32.mrb[159].mxu0  ;;  %v12711_v0 = vmax.f32 %v12691_v49, 0.0 }
0x1084   : > { %v12686_v60 = vadd.f32 %v13550_v3, %v12685_v63  ;;  %v12709_v24 = vmax.f32 %v12683_v1, 0.0  ;;  %v15005_v1 = vld [vmem:[%s18447_s15 + $0x10] ss:$8 sps:$4 sm:$0xff] (!%p13574_p6)  }
0x1085   : > { %v12712_v59 = vmax.f32 %v12694_v25, 0.0 }
0x1086   : > { %v12710_v45 = vmax.f32 %v12686_v60, 0.0 }
0x1087   : > { %v12720_v5 = vpack.c.bf16 %v12712_v59, %v12711_v0 }
0x1088   : > { %v12719_v26 = vpack.c.bf16 %v12710_v45, %v12709_v24 }
0x108a   : > { %14613 = vmatprep.mubr.msk.bf16.mxu1 %vm12760_vm9, %v12719_v26 }
0x108b   : > { %14614 = vmatmul.mubr.msk.bf16.gmra.mrb[156].mxu1 %vm12760_vm9, %v12720_v5  ;;  %v12932_v5 = vlaneseq (!%p13574_p6) }
0x108d   : > { %v12933_v26 = vshrl.u32 (!%p13574_p6), %v12932_v5, 7 }
0x1118   : > { %v14603_v48 = vpop.f32.mrb[144].mxu1 }
0x1119   : > { %v12828_v30 = vadd.f32 %v14603_v48, %v13561_v9  ;;  %v12819_v52 = vpop.f32.mrb[145].mxu1  ;;  %v12930_v48 = vld [vmem:[%s18448_s3] sm:$0x3] (!%p13574_p6) }
0x111a   : > { %v12820_v50 = vadd.f32 %v13561_v9, %v12819_v52  ;;  %v14604_v3 = vpop.f32.mrb[146].mxu1 }
0x111b   : > { %v18060_v18 = vadd.f32 %v12828_v30, %v17953_v38  ;;  %v12831_v8 = vadd.f32 %v14604_v3, %v13561_v9  ;;  %v12822_v55 = vpop.f32.mrb[147].mxu1  ;;  %v12938_v30 = vsub.s32 (!%p13574_p6), 1, %v12933_v26 }
0x111c   : > { %v18063_v7 = vadd.f32 %v12820_v50, %v17941_v54  ;;  %v12823_v17 = vadd.f32 %v13561_v9, %v12822_v55 }
0x111d   : > { %12900 = vst.msk [vmem:[#allocation2 + $0x10] sm:$0xff] %vm769_vm3, %v18060_v18  ;;  %v18068_v12 = vadd.f32 %v12831_v8, %v17956_v31  ;;  %v18149_v50 = vrot.slane (!%p13574_p6), %v12930_v48, %v12938_v30 }
0x111e   : > { %12898 = vst.msk [vmem:[#allocation2] sm:$0xff] %vm769_vm3, %v18063_v7  ;;  %v18073_v41 = vadd.f32 %v12823_v17, %v17944_v27 }
0x111f   : > { %12901 = vst.msk [vmem:[#allocation2 + $0x18] sm:$0xff] %vm769_vm3, %v18068_v12  ;;  %v12919_v63 = vpack.c.bf16 (!%p13574_p6), %v18068_v12, %v18060_v18 }
0x1120   : > { %12899 = vst.msk [vmem:[#allocation2 + $0x8] sm:$0xff] %vm769_vm3, %v18073_v41  ;;  %v12918_v10 = vpack.c.bf16 (!%p13574_p6), %v18073_v41, %v18063_v7 }
0x1121   : > { %v14607_v54 = vpop.f32.mrb[148].mxu1 }
0x1122   : > { %v12844_v38 = vadd.f32 %v14607_v54, %v13561_v9  ;;  %v12835_v43 = vpop.f32.mrb[149].mxu1 }
0x1123   : > { %v12836_v39 = vadd.f32 %v13561_v9, %v12835_v43  ;;  %v14608_v4 = vpop.f32.mrb[150].mxu1 }
0x1124   : > { %v18080_v31 = vadd.f32 %v12844_v38, %v17984_v23  ;;  %v12847_v33 = vadd.f32 %v14608_v4, %v13561_v9  ;;  %v12838_v13 = vpop.f32.mrb[151].mxu1 }
0x1125   : > { %v18083_v11 = vadd.f32 %v12836_v39, %v17971_v19  ;;  %v12839_v27 = vadd.f32 %v13561_v9, %v12838_v13 }
0x1126   : > { %12904 = vst.msk [vmem:[#allocation2 + $0x30] sm:$0xff] %vm769_vm3, %v18080_v31  ;;  %v18088_v16 = vadd.f32 %v12847_v33, %v17979_v21 }
0x1127   : > { %12902 = vst.msk [vmem:[#allocation2 + $0x20] sm:$0xff] %vm769_vm3, %v18083_v11  ;;  %v18093_v37 = vadd.f32 %v12839_v27, %v17967_v40 }
0x1128   : > { %12905 = vst.msk [vmem:[#allocation2 + $0x38] sm:$0xff] %vm769_vm3, %v18088_v16  ;;  %v12921_v24 = vpack.c.bf16 (!%p13574_p6), %v18088_v16, %v18080_v31 }
0x1129   : > { %12903 = vst.msk [vmem:[#allocation2 + $0x28] sm:$0xff] %vm769_vm3, %v18093_v37  ;;  %v14611_v19 = vpop.f32.mrb[152].mxu1  ;;  %v12920_v0 = vpack.c.bf16 (!%p13574_p6), %v18093_v37, %v18083_v11 }
0x112a   : > { %v12860_v23 = vadd.f32 %v14611_v19, %v13561_v9  ;;  %v12851_v53 = vpop.f32.mrb[153].mxu1 }
0x112b   : > { %v12852_v44 = vadd.f32 %v13561_v9, %v12851_v53  ;;  %v14612_v15 = vpop.f32.mrb[154].mxu1 }
0x112c   : > { %v12892_v21 = vadd.f32 %v12860_v23, %v18008_v42  ;;  %v12863_v29 = vadd.f32 %v14612_v15, %v13561_v9  ;;  %v12854_v34 = vpop.f32.mrb[155].mxu1 }
0x112d   : > { %v12890_v22 = vadd.f32 %v12852_v44, %v17997_v62  ;;  %v12855_v36 = vadd.f32 %v13561_v9, %v12854_v34 }
0x112e   : > { %12908 = vst.msk [vmem:[#allocation2 + $0x50] sm:$0xff] %vm769_vm3, %v12892_v21  ;;  %v12893_v40 = vadd.f32 %v12863_v29, %v18004_v20 }
0x112f   : > { %12906 = vst.msk [vmem:[#allocation2 + $0x40] sm:$0xff] %vm769_vm3, %v12890_v22  ;;  %v12891_v47 = vadd.f32 %v12855_v36, %v17992_v56 }
0x1130   : > { %12909 = vst.msk [vmem:[#allocation2 + $0x58] sm:$0xff] %vm769_vm3, %v12893_v40  ;;  %v12923_v60 = vpack.c.bf16 (!%p13574_p6), %v12893_v40, %v12892_v21 }
0x1131   : > { %12907 = vst.msk [vmem:[#allocation2 + $0x48] sm:$0xff] %vm769_vm3, %v12891_v47  ;;  %v12922_v25 = vpack.c.bf16 (!%p13574_p6), %v12891_v47, %v12890_v22 }
0x115e   : > { %v14615_v6 = vpop.f32.mrb[156].mxu1 }
0x115f   : > { %v12876_v32 = vadd.f32 %v14615_v6, %v13561_v9  ;;  %v12867_v42 = vpop.f32.mrb[157].mxu1 }
0x1160   : > { %v12868_v28 = vadd.f32 %v13561_v9, %v12867_v42  ;;  %v14616_v51 = vpop.f32.mrb[158].mxu1  ;;  %12917 = sbr.rel (%p13574_p6) target bundleno = 4702 (0x125e), region = 88 }
0x1161   : > { %v12896_v62 = vadd.f32 %v12876_v32, %v18031_v58  ;;  %v12879_v2 = vadd.f32 %v14616_v51, %v13561_v9  ;;  %v12870_v61 = vpop.f32.mrb[159].mxu1  ;;  %v15002_v58 = vld [vmem:[%s18447_s15] ss:$8 sps:$4 sm:$0xff] (!%p13574_p6)  }
0x1162   : > { %v12894_v49 = vadd.f32 %v12868_v28, %v18020_v35  ;;  %v12871_v20 = vadd.f32 %v13561_v9, %v12870_v61  ;;  %v15000_v35 = vld [vmem:[%s18446_s19 + $0x4] ss:$8 sps:$4 sm:$0xff] (!%p13574_p6)   ;;  %v12934_v9 = vsub.s32 (!%p13574_p6), 0, %v12933_v26 }
0x1163   : > { %12912 = vst.msk [vmem:[#allocation2 + $0x70] sm:$0xff] %vm769_vm3, %v12896_v62  ;;  %v12897_v56 = vadd.f32 %v12879_v2, %v18034_v14  ;;  %v15047_v14 = vmov (!%p13574_p6), 0   ;;  %12986 = vmatprep.subr.bf16.mxu0 (!%p13574_p6), %v15000_v35  ;;  %14621 = vmatprep.subr.bf16.mxu1 (!%p13574_p6), %v15000_v35 }
0x1164   : > { %12910 = vst.msk [vmem:[#allocation2 + $0x60] sm:$0xff] %vm769_vm3, %v12894_v49  ;;  %v12895_v46 = vadd.f32 %v12871_v20, %v18023_v57  ;;  %13018 = vmatprep.mubr.bf16.mxu0 (!%p13574_p6), %v15047_v14  ;;  %13058 = vmatprep.mubr.bf16.mxu1 (!%p13574_p6), %v15047_v14  ;;  %v15003_v57 = vld [vmem:[%s18447_s15 + $0x14] ss:$8 sps:$4 sm:$0xff] (!%p13574_p6)   ;;  %v18147_v52 = vrot.slane (!%p13574_p6), %v12930_v48, %v12934_v9 }
0x1165   : > { %12913 = vst.msk [vmem:[#allocation2 + $0x78] sm:$0xff] %vm769_vm3, %v12897_v56  ;;  %12987 = vmatpush1.bf16.msra.mxu0 (!%p13574_p6), %v15002_v58  ;;  %14623 = vmatpush1.bf16.msra.mxu1 (!%p13574_p6), %v15002_v58  ;;  %v12925_v45 = vpack.c.bf16 (!%p13574_p6), %v12897_v56, %v12896_v62 }
0x1166   : > { %12911 = vst.msk [vmem:[#allocation2 + $0x68] sm:$0xff] %vm769_vm3, %v12895_v46  ;;  %12988 = vmatprep.subr.bf16.mxu0 (!%p13574_p6), %v15003_v57  ;;  %14622 = vmatprep.subr.bf16.mxu1 (!%p13574_p6), %v15003_v57  ;;  %v12924_v59 = vpack.c.bf16 (!%p13574_p6), %v12895_v46, %v12894_v49 }
0x1169   : > { %12989 = vmatpush1.bf16.msra.mxu0 %v15005_v1  ;;  %14624 = vmatpush1.bf16.msra.mxu1 %v15005_v1 }
0x116c   : > { %13579 = vmatmul.mubr.msk.bf16.vlgmr.msra.gmra.mrb[0].mxu0 %vm769_vm3, %v12918_v10  ;;  %13583 = vmatmul.mubr.msk.bf16.vlgmr.msra.gmra.mrb[0].mxu1 %vm769_vm3, %v12922_v25 }
0x116d   : > { %13028 = vmatprep.mubr.bf16.mxu0 %v15047_v14  ;;  %13068 = vmatprep.mubr.bf16.mxu1 %v15047_v14 }
0x1174   : > { %13580 = vmatmul.mubr.msk.bf16.gmra.mrb[4].mxu0 %vm769_vm3, %v12919_v63  ;;  %13584 = vmatmul.mubr.msk.bf16.gmra.mrb[4].mxu1 %vm769_vm3, %v12923_v60 }
0x1175   : > { %13038 = vmatprep.mubr.bf16.mxu0 %v15047_v14  ;;  %13078 = vmatprep.mubr.bf16.mxu1 %v15047_v14 }
0x117c   : > { %13581 = vmatmul.mubr.msk.bf16.gmra.mrb[8].mxu0 %vm769_vm3, %v12920_v0  ;;  %13585 = vmatmul.mubr.msk.bf16.gmra.mrb[8].mxu1 %vm769_vm3, %v12924_v59 }
0x117d   : > { %13048 = vmatprep.mubr.bf16.mxu0 %v15047_v14  ;;  %13088 = vmatprep.mubr.bf16.mxu1 %v15047_v14 }
0x1184   : > { %13582 = vmatmul.mubr.msk.bf16.gmra.mrb[12].mxu0 %vm769_vm3, %v12921_v24  ;;  %13586 = vmatmul.mubr.msk.bf16.gmra.mrb[12].mxu1 %vm769_vm3, %v12925_v45 }
0x123f   : > { %v13020_v3 = vpop.f32.mrb[0].mxu0  ;;  %v13060_v18 = vpop.f32.mrb[0].mxu1 }
0x1240   : > { %v13021_v8 = vadd.f32 %v13020_v3, %v18147_v52  ;;  %v13061_v55 = vadd.f32 %v13060_v18, %v18147_v52  ;;  %v13022_v7 = vpop.f32.mrb[1].mxu0  ;;  %v13062_v17 = vpop.f32.mrb[1].mxu1 }
0x1241   : > { %v13023_v12 = vadd.f32 %v13022_v7, %v18149_v50  ;;  %v13063_v41 = vadd.f32 %v13062_v17, %v18149_v50  ;;  %v13024_v54 = vpop.f32.mrb[2].mxu0  ;;  %v13064_v38 = vpop.f32.mrb[2].mxu1 }
0x1242   : > { %13099 = vst [vmem:[%s18449_s24] sm:$0xff] %v13021_v8  ;;  %13115 = vst [vmem:[%s18449_s24 + $0x80] sm:$0xff] %v13061_v55  ;;  %v13025_v43 = vadd.f32 %v13024_v54, %v18147_v52  ;;  %v13065_v39 = vadd.f32 %v13064_v38, %v18147_v52  ;;  %v13026_v4 = vpop.f32.mrb[3].mxu0  ;;  %v13066_v31 = vpop.f32.mrb[3].mxu1 }
0x1243   : > { %13100 = vst [vmem:[%s18449_s24 + $0x8] sm:$0xff] %v13023_v12  ;;  %13116 = vst [vmem:[%s18449_s24 + $0x88] sm:$0xff] %v13063_v41  ;;  %v13027_v33 = vadd.f32 %v13026_v4, %v18149_v50  ;;  %v13067_v13 = vadd.f32 %v13066_v31, %v18149_v50 }
0x1244   : > { %13101 = vst [vmem:[%s18449_s24 + $0x10] sm:$0xff] %v13025_v43  ;;  %13117 = vst [vmem:[%s18449_s24 + $0x90] sm:$0xff] %v13065_v39 }
0x1245   : > { %13102 = vst [vmem:[%s18449_s24 + $0x18] sm:$0xff] %v13027_v33  ;;  %13118 = vst [vmem:[%s18449_s24 + $0x98] sm:$0xff] %v13067_v13 }
0x1247   : > { %v13030_v11 = vpop.f32.mrb[4].mxu0  ;;  %v13070_v27 = vpop.f32.mrb[4].mxu1 }
0x1248   : > { %v13031_v16 = vadd.f32 %v13030_v11, %v18147_v52  ;;  %v13071_v37 = vadd.f32 %v13070_v27, %v18147_v52  ;;  %v13032_v19 = vpop.f32.mrb[5].mxu0  ;;  %v13072_v23 = vpop.f32.mrb[5].mxu1 }
0x1249   : > { %v13033_v53 = vadd.f32 %v13032_v19, %v18149_v50  ;;  %v13073_v44 = vadd.f32 %v13072_v23, %v18149_v50  ;;  %v13034_v15 = vpop.f32.mrb[6].mxu0  ;;  %v13074_v21 = vpop.f32.mrb[6].mxu1 }
0x124a   : > { %13103 = vst [vmem:[%s18449_s24 + $0x20] sm:$0xff] %v13031_v16  ;;  %13119 = vst [vmem:[%s18449_s24 + $0xa0] sm:$0xff] %v13071_v37  ;;  %v13035_v29 = vadd.f32 %v13034_v15, %v18147_v52  ;;  %v13075_v34 = vadd.f32 %v13074_v21, %v18147_v52  ;;  %v13036_v22 = vpop.f32.mrb[7].mxu0  ;;  %v13076_v36 = vpop.f32.mrb[7].mxu1 }
0x124b   : > { %13104 = vst [vmem:[%s18449_s24 + $0x28] sm:$0xff] %v13033_v53  ;;  %13120 = vst [vmem:[%s18449_s24 + $0xa8] sm:$0xff] %v13073_v44  ;;  %v13037_v40 = vadd.f32 %v13036_v22, %v18149_v50  ;;  %v13077_v47 = vadd.f32 %v13076_v36, %v18149_v50 }
0x124c   : > { %13105 = vst [vmem:[%s18449_s24 + $0x30] sm:$0xff] %v13035_v29  ;;  %13121 = vst [vmem:[%s18449_s24 + $0xb0] sm:$0xff] %v13075_v34 }
0x124d   : > { %13106 = vst [vmem:[%s18449_s24 + $0x38] sm:$0xff] %v13037_v40  ;;  %13122 = vst [vmem:[%s18449_s24 + $0xb8] sm:$0xff] %v13077_v47 }
0x124f   : > { %v13040_v6 = vpop.f32.mrb[8].mxu0  ;;  %v13080_v32 = vpop.f32.mrb[8].mxu1 }
0x1250   : > { %v13041_v42 = vadd.f32 %v13040_v6, %v18147_v52  ;;  %v13081_v28 = vadd.f32 %v13080_v32, %v18147_v52  ;;  %v13042_v51 = vpop.f32.mrb[9].mxu0  ;;  %v13082_v62 = vpop.f32.mrb[9].mxu1 }
0x1251   : > { %v13043_v2 = vadd.f32 %v13042_v51, %v18149_v50  ;;  %v13083_v61 = vadd.f32 %v13082_v62, %v18149_v50  ;;  %v13044_v49 = vpop.f32.mrb[10].mxu0  ;;  %v13084_v20 = vpop.f32.mrb[10].mxu1 }
0x1252   : > { %13107 = vst [vmem:[%s18449_s24 + $0x40] sm:$0xff] %v13041_v42  ;;  %13123 = vst [vmem:[%s18449_s24 + $0xc0] sm:$0xff] %v13081_v28  ;;  %v13045_v56 = vadd.f32 %v13044_v49, %v18147_v52  ;;  %v13085_v46 = vadd.f32 %v13084_v20, %v18147_v52  ;;  %v13046_v35 = vpop.f32.mrb[11].mxu0  ;;  %v13086_v58 = vpop.f32.mrb[11].mxu1 }
0x1253   : > { %13108 = vst [vmem:[%s18449_s24 + $0x48] sm:$0xff] %v13043_v2  ;;  %13124 = vst [vmem:[%s18449_s24 + $0xc8] sm:$0xff] %v13083_v61  ;;  %v13047_v14 = vadd.f32 %v13046_v35, %v18149_v50  ;;  %v13087_v57 = vadd.f32 %v13086_v58, %v18149_v50 }
0x1254   : > { %13109 = vst [vmem:[%s18449_s24 + $0x50] sm:$0xff] %v13045_v56  ;;  %13125 = vst [vmem:[%s18449_s24 + $0xd0] sm:$0xff] %v13085_v46 }
0x1255   : > { %13110 = vst [vmem:[%s18449_s24 + $0x58] sm:$0xff] %v13047_v14  ;;  %13126 = vst [vmem:[%s18449_s24 + $0xd8] sm:$0xff] %v13087_v57 }
0x1257   : > { %v13050_v1 = vpop.f32.mrb[12].mxu0  ;;  %v13090_v10 = vpop.f32.mrb[12].mxu1 }
0x1258   : > { %v13051_v25 = vadd.f32 %v13050_v1, %v18147_v52  ;;  %v13091_v63 = vadd.f32 %v13090_v10, %v18147_v52  ;;  %v13052_v60 = vpop.f32.mrb[13].mxu0  ;;  %v13092_v0 = vpop.f32.mrb[13].mxu1 }
0x1259   : > { %v13053_v59 = vadd.f32 %v13052_v60, %v18149_v50  ;;  %v13093_v24 = vadd.f32 %v13092_v0, %v18149_v50  ;;  %v13054_v45 = vpop.f32.mrb[14].mxu0  ;;  %v13094_v5 = vpop.f32.mrb[14].mxu1 }
0x125a   : > { %13111 = vst [vmem:[%s18449_s24 + $0x60] sm:$0xff] %v13051_v25  ;;  %13127 = vst [vmem:[%s18449_s24 + $0xe0] sm:$0xff] %v13091_v63  ;;  %v13055_v26 = vadd.f32 %v13054_v45, %v18147_v52  ;;  %v13095_v9 = vadd.f32 %v13094_v5, %v18147_v52  ;;  %v13056_v48 = vpop.f32.mrb[15].mxu0  ;;  %v13096_v30 = vpop.f32.mrb[15].mxu1 }
0x125b   : > { %13112 = vst [vmem:[%s18449_s24 + $0x68] sm:$0xff] %v13053_v59  ;;  %13128 = vst [vmem:[%s18449_s24 + $0xe8] sm:$0xff] %v13093_v24  ;;  %v13057_v3 = vadd.f32 %v13056_v48, %v18149_v50  ;;  %v13097_v18 = vadd.f32 %v13096_v30, %v18149_v50 }
0x125c   : > { %13113 = vst [vmem:[%s18449_s24 + $0x70] sm:$0xff] %v13055_v26  ;;  %13129 = vst [vmem:[%s18449_s24 + $0xf0] sm:$0xff] %v13095_v9 }
0x125d   : > { %13114 = vst [vmem:[%s18449_s24 + $0x78] sm:$0xff] %v13057_v3  ;;  %13130 = vst [vmem:[%s18449_s24 + $0xf8] sm:$0xff] %v13097_v18 }
0x125e PF: > { %s18450_s14 = sld [smem:[#allocation6_spill]]  ;;  %s18451_s18 = sld [smem:[#allocation5_spill]] }
0x125f   : > { %s18452_s19 = sld [smem:[#allocation7_spill]] }
0x1264   : > { %s25_s20 = sadd.s32 1, %s18450_s14  }
0x1265   : > { %p22_p7 = scmp.ge.s32.totalorder %s25_s20, 4  }
0x1267   :  { %24 = sbr.rel (!%p22_p7) target bundleno = 6 (0x6), region = 154 }

</bundles_post_ra>
